<compile_context>
chip_gen: v7x
topology: tpu7x:2x2x1
jax: 0.10.0
libtpu: 0.0.40
codegen_flags: <defaults>
</compile_context>

<pallas_src>
import functools

import jax
import jax.numpy as jnp
from jax.experimental import pallas as pl
from jax.experimental.pallas import tpu as pltpu


def _make_firstnet_kernel(H, W, C1, C2):
    """Fused conv3x3(1->C1)+relu+pool2 -> conv3x3(C1->C2)+relu+pool2 for one batch element."""
    assert H % 4 == 0 and W % 16 == 0, (H, W)
    assert 2 * C1 == 128, C1            # pair-packed im2col slots assume C1 == 64
    H2, W2 = H // 2, W // 2             # after first pool
    H4, W4 = H // 4, W // 4             # after second pool
    K2 = 5 * 128                        # im2col contraction: 9 taps * 64ch packed into 5 lane-tiles

    def kernel(x_ref, w1_ref, b1_ref, w2_ref, b2_ref, o_ref,
               s1a_ref, s1b_ref, p_ref, slab_ref, s2a_ref, s2b_ref):
        # x_ref   : (1, H+2, W+2, 1)     zero-padded input tile (one batch element)
        # w1_ref  : (3, 3, 1, C1)        conv1 weights (HWIO)
        # b1_ref  : (1, C1)
        # w2_ref  : (640, C2)            conv2 weights, taps packed at row t*64, rows 576..639 zero
        # b2_ref  : (1, C2)
        # o_ref   : (1, H4*W4, C2)       lane-dense output slab (row = i*W4 + j)

        # ---------- layer 1: 3x3 conv (Cin=1) as 9 shifted broadcast-FMAs on the VPU ----------
        acc = jnp.broadcast_to(b1_ref[...], (H, W, C1))              # bias-initialized accum
        for dy in range(3):
            for dx in range(3):
                patch = x_ref[0, pl.ds(dy, H), pl.ds(dx, W), :]      # (H, W, 1)
                acc = acc + patch * w1_ref[dy, dx]                   # (1, C1) broadcasts
        acc = jnp.maximum(acc, 0.0)

        # ---------- layer-1 2x2/2 max-pool, entirely in VMEM ----------
        # H-pool: pair rows via a major-dim split (layout-preserving reshape).
        s1a_ref[...] = acc.reshape(H2, 2, W, C1)
        hm1 = jnp.maximum(s1a_ref[:, 0, :, :], s1a_ref[:, 1, :, :])  # (H2, W, C1)
        # W-pool: even/odd sublane-strided loads from a flat (H2*W, C1) scratch.
        s1b_ref[...] = hm1.reshape(H2 * W, C1)
        wm1 = jnp.maximum(s1b_ref[pl.ds(0, H2 * W2, 2), :],
                          s1b_ref[pl.ds(1, H2 * W2, 2), :])          # (H2*W2, C1), row = i*W2+j

        # ---------- layer-2 halo: zero-padded activation kept in VMEM ----------
        # Data is placed at [1:H2+1, 8:8+W2] so the interior store is sublane-tile aligned;
        # the 9 tap reads below use (cheap, supported) unaligned offsets instead.
        p_ref[...] = jnp.zeros_like(p_ref)
        p_ref[pl.ds(1, H2), pl.ds(8, W2), :] = wm1.reshape(H2, W2, C1)

        # ---------- layer 2: single im2col matmul on the MXU ----------
        # Taps are packed pair-wise: tap t occupies slab columns [t*64, t*64+64), so every
        # store below is a dense 128-lane store and no scratch zero-fill is needed.
        def tap(t):
            dy, dx = divmod(t, 3)
            return p_ref[pl.ds(dy, H2), pl.ds(7 + dx, W2), :].reshape(H2 * W2, C1)

        for pr in range(4):
            slab_ref[:, pl.ds(pr * 128, 128)] = jnp.concatenate(
                [tap(2 * pr), tap(2 * pr + 1)], axis=-1)
        t8 = tap(8)
        slab_ref[:, pl.ds(4 * 128, 128)] = jnp.concatenate(
            [t8, jnp.zeros_like(t8)], axis=-1)                       # zero lanes hit zero weight rows

        acc2 = jnp.dot(slab_ref[...], w2_ref[...],
                       preferred_element_type=jnp.float32)           # (H2*W2, C2)
        acc2 = jnp.maximum(acc2 + b2_ref[...], 0.0)

        # ---------- layer-2 2x2/2 max-pool + one dense lane-128 output store ----------
        s2a_ref[...] = acc2.reshape(H4, 2, W2, C2)
        hm2 = jnp.maximum(s2a_ref[:, 0, :, :], s2a_ref[:, 1, :, :])  # (H4, W2, C2)
        s2b_ref[...] = hm2.reshape(H4 * W2, C2)
        wm2 = jnp.maximum(s2b_ref[pl.ds(0, H4 * W4, 2), :],
                          s2b_ref[pl.ds(1, H4 * W4, 2), :])          # (H4*W4, C2)
        o_ref[0] = wm2.astype(o_ref.dtype)

    return kernel


def firstnet_pallas(x_nchw, params):
    """FirstNet.forward: NCHW in, NCHW out, one fused Pallas kernel over the batch."""
    B, Cin, H, W = x_nchw.shape
    assert Cin == 1
    C1, C2 = 64, 128
    H2, W2, H4, W4 = H // 2, W // 2, H // 4, W // 4

    # NCHW (B,1,H,W) -> NHWC (B,H,W,1) is a pure reshape for Cin == 1.
    x = x_nchw.reshape(B, H, W, 1)
    xp = jnp.pad(x, ((0, 0), (1, 1), (1, 1), (0, 0)))      # the only wrapper-side pad

    w1 = params["w1"]                                      # (3, 3, 1, 64) HWIO
    b1 = params["b1"].reshape(1, C1)
    # conv2 weights -> (640, C2): tap t = dy*3+dx occupies rows [t*64, t*64+64);
    # rows 576..639 are zero so the in-kernel zero half-slot contributes nothing.
    w2p = jnp.pad(params["w2"].reshape(9 * C1, C2), ((0, 128 - C1), (0, 0)))
    b2 = params["b2"].reshape(1, C2)

    kernel = _make_firstnet_kernel(H, W, C1, C2)
    out = pl.pallas_call(
        kernel,
        out_shape=jax.ShapeDtypeStruct((B, H4 * W4, C2), x_nchw.dtype),
        grid_spec=pltpu.PrefetchScalarGridSpec(
            num_scalar_prefetch=0,
            grid=(B,),
            in_specs=[
                pl.BlockSpec((1, H + 2, W + 2, 1), lambda b: (b, 0, 0, 0)),
                pl.BlockSpec((3, 3, 1, C1), lambda b: (0, 0, 0, 0)),
                pl.BlockSpec((1, C1), lambda b: (0, 0)),
                pl.BlockSpec((5 * 128, C2), lambda b: (0, 0)),
                pl.BlockSpec((1, C2), lambda b: (0, 0)),
            ],
            out_specs=pl.BlockSpec((1, H4 * W4, C2), lambda b: (b, 0, 0)),
            scratch_shapes=[
                pltpu.VMEM((H2, 2, W, C1), jnp.float32),        # s1a: conv1 result (H-pool view)
                pltpu.VMEM((H2 * W, C1), jnp.float32),          # s1b: H-pooled, flat
                pltpu.VMEM((H2 + 2, W2 + 9, C1), jnp.float32),  # p:   padded layer-1 activation
                pltpu.VMEM((H2 * W2, 5 * 128), jnp.float32),    # slab: pair-packed im2col LHS
                pltpu.VMEM((H4, 2, W2, C2), jnp.float32),       # s2a: conv2 result (H-pool view)
                pltpu.VMEM((H4 * W2, C2), jnp.float32),         # s2b: H-pooled, flat
            ],
        ),
        compiler_params=pltpu.CompilerParams(dimension_semantics=("parallel",)),
    )(xp, w1, b1, w2p, b2)

    # (B, H4*W4, C2) lane-dense slab -> NCHW (B, C2, H4, W4)
    return out.reshape(B, H4, W4, C2).transpose(0, 3, 1, 2)


firstnet_forward = jax.jit(firstnet_pallas)


def init_params(key):
    """Deterministic parameters matching FirstNet's shapes (weights in HWIO)."""
    k1, k2, k3, k4 = jax.random.split(key, 4)

    def uinit(k, shape, fan_in):
        bound = 1.0 / jnp.sqrt(float(fan_in))
        return jax.random.uniform(k, shape, jnp.float32, -bound, bound)

    return {
        "w1": uinit(k1, (3, 3, 1, 64), 1 * 9),       # conv1: 1 -> 64, k=3
        "b1": uinit(k2, (64,), 1 * 9),
        "w2": uinit(k3, (3, 3, 64, 128), 64 * 9),    # conv2: 64 -> 128, k=3
        "b2": uinit(k4, (128,), 64 * 9),
    }


def firstnet_reference(x_nchw, params):
    """Pure-JAX reference (lax.conv + reduce_window) for validation."""
    x = jnp.transpose(x_nchw, (0, 2, 3, 1))

    def block(x, w, b):
        y = jax.lax.conv_general_dilated(
            x, w, window_strides=(1, 1), padding="SAME",
            dimension_numbers=("NHWC", "HWIO", "NHWC"))
        y = jax.nn.relu(y + b)
        return jax.lax.reduce_window(y, -jnp.inf, jax.lax.max,
                                     (1, 2, 2, 1), (1, 2, 2, 1), "VALID")

    x = block(x, params["w1"], params["b1"])
    x = block(x, params["w2"], params["b2"])
    return jnp.transpose(x, (0, 3, 1, 2))


if __name__ == "__main__":
    key = jax.random.PRNGKey(0)
    pkey, xkey = jax.random.split(key)
    params = init_params(pkey)

    # FirstNet's conv1 has in_channels=1 -> input is NCHW (B, 1, H, W).
    x = jax.random.normal(xkey, (2, 1, 16, 16), dtype=jnp.float32)

    out = jax.block_until_ready(firstnet_forward(x, params))
    assert out.shape == (2, 128, 4, 4), out.shape

    ref = jax.block_until_ready(firstnet_reference(x, params))
    err = float(jnp.max(jnp.abs(out - ref)))
    assert jnp.allclose(out, ref, rtol=1e-3, atol=1e-4), err

    print("KERNEL_OK")
</pallas_src>

<mosaic_0001>
module attributes {stable_mosaic.version = 11 : i64} {
  func.func @kernel(%arg0: i32, %arg1: memref<1x18x18x1xf32, #tpu.memory_space<vmem>>, %arg2: memref<3x3x1x64xf32, #tpu.memory_space<vmem>>, %arg3: memref<1x64xf32, #tpu.memory_space<vmem>>, %arg4: memref<640x128xf32, #tpu.memory_space<vmem>>, %arg5: memref<1x128xf32, #tpu.memory_space<vmem>>, %arg6: memref<1x16x128xf32, #tpu.memory_space<vmem>>, %arg7: memref<8x2x16x64xf32, #tpu.memory_space<vmem>>, %arg8: memref<128x64xf32, #tpu.memory_space<vmem>>, %arg9: memref<10x17x64xf32, #tpu.memory_space<vmem>>, %arg10: memref<64x640xf32, #tpu.memory_space<vmem>>, %arg11: memref<4x2x8x128xf32, #tpu.memory_space<vmem>>, %arg12: memref<32x128xf32, #tpu.memory_space<vmem>>) attributes {dimension_semantics = [#tpu.dimension_semantics<parallel>], iteration_bounds = array<i64: 2>, scalar_prefetch = 0 : i64, scratch_operands = 6 : i64, tpu.core_type = #tpu.core_type<tc>, window_params = [{transform_indices = @transform_0, window_bounds = array<i64: 1, 18, 18, 1>}, {pipeline_mode = #tpu.pipeline_mode<synchronous>, transform_indices = @transform_1, window_bounds = array<i64: 3, 3, 1, 64>}, {pipeline_mode = #tpu.pipeline_mode<synchronous>, transform_indices = @transform_2, window_bounds = array<i64: 1, 64>}, {pipeline_mode = #tpu.pipeline_mode<synchronous>, transform_indices = @transform_3, window_bounds = array<i64: 640, 128>}, {pipeline_mode = #tpu.pipeline_mode<synchronous>, transform_indices = @transform_4, window_bounds = array<i64: 1, 128>}, {transform_indices = @transform_5, window_bounds = array<i64: 1, 16, 128>}]} {
    %c0 = arith.constant 0 : index
    %c0_0 = arith.constant 0 : index
    %0 = vector.load %arg3[%c0, %c0_0] : memref<1x64xf32, #tpu.memory_space<vmem>>, vector<1x64xf32>
    %1 = vector.shape_cast %0 : vector<1x64xf32> to vector<1x1x64xf32>
    %2 = vector.broadcast %1 : vector<1x1x64xf32> to vector<16x16x64xf32>
    %c0_1 = arith.constant 0 : index
    %c0_2 = arith.constant 0 : index
    %c0_3 = arith.constant 0 : index
    %c0_4 = arith.constant 0 : index
    %3 = vector.load %arg1[%c0_1, %c0_2, %c0_3, %c0_4] : memref<1x18x18x1xf32, #tpu.memory_space<vmem>>, vector<1x16x16x1xf32>
    %4 = vector.shape_cast %3 : vector<1x16x16x1xf32> to vector<16x16x1xf32>
    %c0_5 = arith.constant 0 : index
    %c0_6 = arith.constant 0 : index
    %c0_7 = arith.constant 0 : index
    %c0_8 = arith.constant 0 : index
    %5 = vector.load %arg2[%c0_5, %c0_6, %c0_7, %c0_8] : memref<3x3x1x64xf32, #tpu.memory_space<vmem>>, vector<1x1x1x64xf32>
    %6 = vector.shape_cast %5 : vector<1x1x1x64xf32> to vector<1x64xf32>
    %7 = vector.shape_cast %6 : vector<1x64xf32> to vector<1x1x64xf32>
    %8 = vector.broadcast %4 : vector<16x16x1xf32> to vector<16x16x64xf32>
    %9 = vector.broadcast %7 : vector<1x1x64xf32> to vector<16x16x64xf32>
    %10 = arith.mulf %8, %9 : vector<16x16x64xf32>
    %11 = arith.addf %2, %10 : vector<16x16x64xf32>
    %c0_9 = arith.constant 0 : index
    %c0_10 = arith.constant 0 : index
    %c1 = arith.constant 1 : index
    %c0_11 = arith.constant 0 : index
    %12 = vector.load %arg1[%c0_9, %c0_10, %c1, %c0_11] : memref<1x18x18x1xf32, #tpu.memory_space<vmem>>, vector<1x16x16x1xf32>
    %13 = vector.shape_cast %12 : vector<1x16x16x1xf32> to vector<16x16x1xf32>
    %c0_12 = arith.constant 0 : index
    %c1_13 = arith.constant 1 : index
    %c0_14 = arith.constant 0 : index
    %c0_15 = arith.constant 0 : index
    %14 = vector.load %arg2[%c0_12, %c1_13, %c0_14, %c0_15] : memref<3x3x1x64xf32, #tpu.memory_space<vmem>>, vector<1x1x1x64xf32>
    %15 = vector.shape_cast %14 : vector<1x1x1x64xf32> to vector<1x64xf32>
    %16 = vector.shape_cast %15 : vector<1x64xf32> to vector<1x1x64xf32>
    %17 = vector.broadcast %13 : vector<16x16x1xf32> to vector<16x16x64xf32>
    %18 = vector.broadcast %16 : vector<1x1x64xf32> to vector<16x16x64xf32>
    %19 = arith.mulf %17, %18 : vector<16x16x64xf32>
    %20 = arith.addf %11, %19 : vector<16x16x64xf32>
    %c0_16 = arith.constant 0 : index
    %c0_17 = arith.constant 0 : index
    %c2 = arith.constant 2 : index
    %c0_18 = arith.constant 0 : index
    %21 = vector.load %arg1[%c0_16, %c0_17, %c2, %c0_18] : memref<1x18x18x1xf32, #tpu.memory_space<vmem>>, vector<1x16x16x1xf32>
    %22 = vector.shape_cast %21 : vector<1x16x16x1xf32> to vector<16x16x1xf32>
    %c0_19 = arith.constant 0 : index
    %c2_20 = arith.constant 2 : index
    %c0_21 = arith.constant 0 : index
    %c0_22 = arith.constant 0 : index
    %23 = vector.load %arg2[%c0_19, %c2_20, %c0_21, %c0_22] : memref<3x3x1x64xf32, #tpu.memory_space<vmem>>, vector<1x1x1x64xf32>
    %24 = vector.shape_cast %23 : vector<1x1x1x64xf32> to vector<1x64xf32>
    %25 = vector.shape_cast %24 : vector<1x64xf32> to vector<1x1x64xf32>
    %26 = vector.broadcast %22 : vector<16x16x1xf32> to vector<16x16x64xf32>
    %27 = vector.broadcast %25 : vector<1x1x64xf32> to vector<16x16x64xf32>
    %28 = arith.mulf %26, %27 : vector<16x16x64xf32>
    %29 = arith.addf %20, %28 : vector<16x16x64xf32>
    %c0_23 = arith.constant 0 : index
    %c1_24 = arith.constant 1 : index
    %c0_25 = arith.constant 0 : index
    %c0_26 = arith.constant 0 : index
    %30 = vector.load %arg1[%c0_23, %c1_24, %c0_25, %c0_26] : memref<1x18x18x1xf32, #tpu.memory_space<vmem>>, vector<1x16x16x1xf32>
    %31 = vector.shape_cast %30 : vector<1x16x16x1xf32> to vector<16x16x1xf32>
    %c1_27 = arith.constant 1 : index
    %c0_28 = arith.constant 0 : index
    %c0_29 = arith.constant 0 : index
    %c0_30 = arith.constant 0 : index
    %32 = vector.load %arg2[%c1_27, %c0_28, %c0_29, %c0_30] : memref<3x3x1x64xf32, #tpu.memory_space<vmem>>, vector<1x1x1x64xf32>
    %33 = vector.shape_cast %32 : vector<1x1x1x64xf32> to vector<1x64xf32>
    %34 = vector.shape_cast %33 : vector<1x64xf32> to vector<1x1x64xf32>
    %35 = vector.broadcast %31 : vector<16x16x1xf32> to vector<16x16x64xf32>
    %36 = vector.broadcast %34 : vector<1x1x64xf32> to vector<16x16x64xf32>
    %37 = arith.mulf %35, %36 : vector<16x16x64xf32>
    %38 = arith.addf %29, %37 : vector<16x16x64xf32>
    %c0_31 = arith.constant 0 : index
    %c1_32 = arith.constant 1 : index
    %c1_33 = arith.constant 1 : index
    %c0_34 = arith.constant 0 : index
    %39 = vector.load %arg1[%c0_31, %c1_32, %c1_33, %c0_34] : memref<1x18x18x1xf32, #tpu.memory_space<vmem>>, vector<1x16x16x1xf32>
    %40 = vector.shape_cast %39 : vector<1x16x16x1xf32> to vector<16x16x1xf32>
    %c1_35 = arith.constant 1 : index
    %c1_36 = arith.constant 1 : index
    %c0_37 = arith.constant 0 : index
    %c0_38 = arith.constant 0 : index
    %41 = vector.load %arg2[%c1_35, %c1_36, %c0_37, %c0_38] : memref<3x3x1x64xf32, #tpu.memory_space<vmem>>, vector<1x1x1x64xf32>
    %42 = vector.shape_cast %41 : vector<1x1x1x64xf32> to vector<1x64xf32>
    %43 = vector.shape_cast %42 : vector<1x64xf32> to vector<1x1x64xf32>
    %44 = vector.broadcast %40 : vector<16x16x1xf32> to vector<16x16x64xf32>
    %45 = vector.broadcast %43 : vector<1x1x64xf32> to vector<16x16x64xf32>
    %46 = arith.mulf %44, %45 : vector<16x16x64xf32>
    %47 = arith.addf %38, %46 : vector<16x16x64xf32>
    %c0_39 = arith.constant 0 : index
    %c1_40 = arith.constant 1 : index
    %c2_41 = arith.constant 2 : index
    %c0_42 = arith.constant 0 : index
    %48 = vector.load %arg1[%c0_39, %c1_40, %c2_41, %c0_42] : memref<1x18x18x1xf32, #tpu.memory_space<vmem>>, vector<1x16x16x1xf32>
    %49 = vector.shape_cast %48 : vector<1x16x16x1xf32> to vector<16x16x1xf32>
    %c1_43 = arith.constant 1 : index
    %c2_44 = arith.constant 2 : index
    %c0_45 = arith.constant 0 : index
    %c0_46 = arith.constant 0 : index
    %50 = vector.load %arg2[%c1_43, %c2_44, %c0_45, %c0_46] : memref<3x3x1x64xf32, #tpu.memory_space<vmem>>, vector<1x1x1x64xf32>
    %51 = vector.shape_cast %50 : vector<1x1x1x64xf32> to vector<1x64xf32>
    %52 = vector.shape_cast %51 : vector<1x64xf32> to vector<1x1x64xf32>
    %53 = vector.broadcast %49 : vector<16x16x1xf32> to vector<16x16x64xf32>
    %54 = vector.broadcast %52 : vector<1x1x64xf32> to vector<16x16x64xf32>
    %55 = arith.mulf %53, %54 : vector<16x16x64xf32>
    %56 = arith.addf %47, %55 : vector<16x16x64xf32>
    %c0_47 = arith.constant 0 : index
    %c2_48 = arith.constant 2 : index
    %c0_49 = arith.constant 0 : index
    %c0_50 = arith.constant 0 : index
    %57 = vector.load %arg1[%c0_47, %c2_48, %c0_49, %c0_50] : memref<1x18x18x1xf32, #tpu.memory_space<vmem>>, vector<1x16x16x1xf32>
    %58 = vector.shape_cast %57 : vector<1x16x16x1xf32> to vector<16x16x1xf32>
    %c2_51 = arith.constant 2 : index
    %c0_52 = arith.constant 0 : index
    %c0_53 = arith.constant 0 : index
    %c0_54 = arith.constant 0 : index
    %59 = vector.load %arg2[%c2_51, %c0_52, %c0_53, %c0_54] : memref<3x3x1x64xf32, #tpu.memory_space<vmem>>, vector<1x1x1x64xf32>
    %60 = vector.shape_cast %59 : vector<1x1x1x64xf32> to vector<1x64xf32>
    %61 = vector.shape_cast %60 : vector<1x64xf32> to vector<1x1x64xf32>
    %62 = vector.broadcast %58 : vector<16x16x1xf32> to vector<16x16x64xf32>
    %63 = vector.broadcast %61 : vector<1x1x64xf32> to vector<16x16x64xf32>
    %64 = arith.mulf %62, %63 : vector<16x16x64xf32>
    %65 = arith.addf %56, %64 : vector<16x16x64xf32>
    %c0_55 = arith.constant 0 : index
    %c2_56 = arith.constant 2 : index
    %c1_57 = arith.constant 1 : index
    %c0_58 = arith.constant 0 : index
    %66 = vector.load %arg1[%c0_55, %c2_56, %c1_57, %c0_58] : memref<1x18x18x1xf32, #tpu.memory_space<vmem>>, vector<1x16x16x1xf32>
    %67 = vector.shape_cast %66 : vector<1x16x16x1xf32> to vector<16x16x1xf32>
    %c2_59 = arith.constant 2 : index
    %c1_60 = arith.constant 1 : index
    %c0_61 = arith.constant 0 : index
    %c0_62 = arith.constant 0 : index
    %68 = vector.load %arg2[%c2_59, %c1_60, %c0_61, %c0_62] : memref<3x3x1x64xf32, #tpu.memory_space<vmem>>, vector<1x1x1x64xf32>
    %69 = vector.shape_cast %68 : vector<1x1x1x64xf32> to vector<1x64xf32>
    %70 = vector.shape_cast %69 : vector<1x64xf32> to vector<1x1x64xf32>
    %71 = vector.broadcast %67 : vector<16x16x1xf32> to vector<16x16x64xf32>
    %72 = vector.broadcast %70 : vector<1x1x64xf32> to vector<16x16x64xf32>
    %73 = arith.mulf %71, %72 : vector<16x16x64xf32>
    %74 = arith.addf %65, %73 : vector<16x16x64xf32>
    %c0_63 = arith.constant 0 : index
    %c2_64 = arith.constant 2 : index
    %c2_65 = arith.constant 2 : index
    %c0_66 = arith.constant 0 : index
    %75 = vector.load %arg1[%c0_63, %c2_64, %c2_65, %c0_66] : memref<1x18x18x1xf32, #tpu.memory_space<vmem>>, vector<1x16x16x1xf32>
    %76 = vector.shape_cast %75 : vector<1x16x16x1xf32> to vector<16x16x1xf32>
    %c2_67 = arith.constant 2 : index
    %c2_68 = arith.constant 2 : index
    %c0_69 = arith.constant 0 : index
    %c0_70 = arith.constant 0 : index
    %77 = vector.load %arg2[%c2_67, %c2_68, %c0_69, %c0_70] : memref<3x3x1x64xf32, #tpu.memory_space<vmem>>, vector<1x1x1x64xf32>
    %78 = vector.shape_cast %77 : vector<1x1x1x64xf32> to vector<1x64xf32>
    %79 = vector.shape_cast %78 : vector<1x64xf32> to vector<1x1x64xf32>
    %80 = vector.broadcast %76 : vector<16x16x1xf32> to vector<16x16x64xf32>
    %81 = vector.broadcast %79 : vector<1x1x64xf32> to vector<16x16x64xf32>
    %82 = arith.mulf %80, %81 : vector<16x16x64xf32>
    %83 = arith.addf %74, %82 : vector<16x16x64xf32>
    %cst = arith.constant 0.000000e+00 : f32
    %84 = vector.broadcast %cst : f32 to vector<16x16x64xf32>
    %85 = arith.maximumf %83, %84 : vector<16x16x64xf32>
    %86 = vector.shape_cast %85 : vector<16x16x64xf32> to vector<8x2x16x64xf32>
    %c0_71 = arith.constant 0 : index
    %c0_72 = arith.constant 0 : index
    %c0_73 = arith.constant 0 : index
    %c0_74 = arith.constant 0 : index
    %87 = vector.load %arg7[%c0_71, %c0_72, %c0_73, %c0_74] : memref<8x2x16x64xf32, #tpu.memory_space<vmem>>, vector<8x2x16x64xf32>
    tpu.vector_store %arg7[%c0_71, %c0_72, %c0_73, %c0_74], %86 {strides = array<i32>} : memref<8x2x16x64xf32, #tpu.memory_space<vmem>>, vector<8x2x16x64xf32>,
    %c0_75 = arith.constant 0 : index
    %c0_76 = arith.constant 0 : index
    %c0_77 = arith.constant 0 : index
    %c0_78 = arith.constant 0 : index
    %88 = vector.load %arg7[%c0_75, %c0_76, %c0_77, %c0_78] : memref<8x2x16x64xf32, #tpu.memory_space<vmem>>, vector<8x1x16x64xf32>
    %89 = vector.shape_cast %88 : vector<8x1x16x64xf32> to vector<8x16x64xf32>
    %c0_79 = arith.constant 0 : index
    %c1_80 = arith.constant 1 : index
    %c0_81 = arith.constant 0 : index
    %c0_82 = arith.constant 0 : index
    %90 = vector.load %arg7[%c0_79, %c1_80, %c0_81, %c0_82] : memref<8x2x16x64xf32, #tpu.memory_space<vmem>>, vector<8x1x16x64xf32>
    %91 = vector.shape_cast %90 : vector<8x1x16x64xf32> to vector<8x16x64xf32>
    %92 = arith.maximumf %89, %91 : vector<8x16x64xf32>
    %93 = vector.shape_cast %92 : vector<8x16x64xf32> to vector<128x64xf32>
    %c0_83 = arith.constant 0 : index
    %c0_84 = arith.constant 0 : index
    %94 = vector.load %arg8[%c0_83, %c0_84] : memref<128x64xf32, #tpu.memory_space<vmem>>, vector<128x64xf32>
    tpu.vector_store %arg8[%c0_83, %c0_84], %93 {strides = array<i32>} : memref<128x64xf32, #tpu.memory_space<vmem>>, vector<128x64xf32>,
    %c0_85 = arith.constant 0 : index
    %c0_86 = arith.constant 0 : index
    %95 = tpu.strided_load %arg8[%c0_85, %c0_86] {strides = array<i32: 2, 1>} : memref<128x64xf32, #tpu.memory_space<vmem>>, vector<64x64xf32>
    %c1_87 = arith.constant 1 : index
    %c0_88 = arith.constant 0 : index
    %96 = tpu.strided_load %arg8[%c1_87, %c0_88] {strides = array<i32: 2, 1>} : memref<128x64xf32, #tpu.memory_space<vmem>>, vector<64x64xf32>
    %97 = arith.maximumf %95, %96 : vector<64x64xf32>
    %cst_89 = arith.constant 0.000000e+00 : f32
    %98 = vector.broadcast %cst_89 : f32 to vector<10x17x64xf32>
    %c0_90 = arith.constant 0 : index
    %c0_91 = arith.constant 0 : index
    %c0_92 = arith.constant 0 : index
    %99 = vector.load %arg9[%c0_90, %c0_91, %c0_92] : memref<10x17x64xf32, #tpu.memory_space<vmem>>, vector<10x17x64xf32>
    tpu.vector_store %arg9[%c0_90, %c0_91, %c0_92], %98 {strides = array<i32>} : memref<10x17x64xf32, #tpu.memory_space<vmem>>, vector<10x17x64xf32>,
    %100 = vector.shape_cast %97 : vector<64x64xf32> to vector<8x8x64xf32>
    %c1_93 = arith.constant 1 : index
    %c8 = arith.constant 8 : index
    %c0_94 = arith.constant 0 : index
    %101 = vector.load %arg9[%c1_93, %c8, %c0_94] : memref<10x17x64xf32, #tpu.memory_space<vmem>>, vector<8x8x64xf32>
    tpu.vector_store %arg9[%c1_93, %c8, %c0_94], %100 {strides = array<i32>} : memref<10x17x64xf32, #tpu.memory_space<vmem>>, vector<8x8x64xf32>,
    %c0_95 = arith.constant 0 : index
    %c7 = arith.constant 7 : index
    %c0_96 = arith.constant 0 : index
    %102 = vector.load %arg9[%c0_95, %c7, %c0_96] : memref<10x17x64xf32, #tpu.memory_space<vmem>>, vector<8x8x64xf32>
    %103 = vector.shape_cast %102 : vector<8x8x64xf32> to vector<64x64xf32>
    %c0_97 = arith.constant 0 : index
    %c8_98 = arith.constant 8 : index
    %c0_99 = arith.constant 0 : index
    %104 = vector.load %arg9[%c0_97, %c8_98, %c0_99] : memref<10x17x64xf32, #tpu.memory_space<vmem>>, vector<8x8x64xf32>
    %105 = vector.shape_cast %104 : vector<8x8x64xf32> to vector<64x64xf32>
    %106 = tpu.concatenate %103, %105 in 1 : vector<64x64xf32>, vector<64x64xf32> -> vector<64x128xf32>
    %c0_100 = arith.constant 0 : index
    %c0_101 = arith.constant 0 : index
    %107 = vector.load %arg10[%c0_100, %c0_101] : memref<64x640xf32, #tpu.memory_space<vmem>>, vector<64x128xf32>
    tpu.vector_store %arg10[%c0_100, %c0_101], %106 {strides = array<i32>} : memref<64x640xf32, #tpu.memory_space<vmem>>, vector<64x128xf32>,
    %c0_102 = arith.constant 0 : index
    %c9 = arith.constant 9 : index
    %c0_103 = arith.constant 0 : index
    %108 = vector.load %arg9[%c0_102, %c9, %c0_103] : memref<10x17x64xf32, #tpu.memory_space<vmem>>, vector<8x8x64xf32>
    %109 = vector.shape_cast %108 : vector<8x8x64xf32> to vector<64x64xf32>
    %c1_104 = arith.constant 1 : index
    %c7_105 = arith.constant 7 : index
    %c0_106 = arith.constant 0 : index
    %110 = vector.load %arg9[%c1_104, %c7_105, %c0_106] : memref<10x17x64xf32, #tpu.memory_space<vmem>>, vector<8x8x64xf32>
    %111 = vector.shape_cast %110 : vector<8x8x64xf32> to vector<64x64xf32>
    %112 = tpu.concatenate %109, %111 in 1 : vector<64x64xf32>, vector<64x64xf32> -> vector<64x128xf32>
    %c0_107 = arith.constant 0 : index
    %c128 = arith.constant 128 : index
    %113 = vector.load %arg10[%c0_107, %c128] : memref<64x640xf32, #tpu.memory_space<vmem>>, vector<64x128xf32>
    tpu.vector_store %arg10[%c0_107, %c128], %112 {strides = array<i32>} : memref<64x640xf32, #tpu.memory_space<vmem>>, vector<64x128xf32>,
    %c1_108 = arith.constant 1 : index
    %c8_109 = arith.constant 8 : index
    %c0_110 = arith.constant 0 : index
    %114 = vector.load %arg9[%c1_108, %c8_109, %c0_110] : memref<10x17x64xf32, #tpu.memory_space<vmem>>, vector<8x8x64xf32>
    %115 = vector.shape_cast %114 : vector<8x8x64xf32> to vector<64x64xf32>
    %c1_111 = arith.constant 1 : index
    %c9_112 = arith.constant 9 : index
    %c0_113 = arith.constant 0 : index
    %116 = vector.load %arg9[%c1_111, %c9_112, %c0_113] : memref<10x17x64xf32, #tpu.memory_space<vmem>>, vector<8x8x64xf32>
    %117 = vector.shape_cast %116 : vector<8x8x64xf32> to vector<64x64xf32>
    %118 = tpu.concatenate %115, %117 in 1 : vector<64x64xf32>, vector<64x64xf32> -> vector<64x128xf32>
    %c0_114 = arith.constant 0 : index
    %c256 = arith.constant 256 : index
    %119 = vector.load %arg10[%c0_114, %c256] : memref<64x640xf32, #tpu.memory_space<vmem>>, vector<64x128xf32>
    tpu.vector_store %arg10[%c0_114, %c256], %118 {strides = array<i32>} : memref<64x640xf32, #tpu.memory_space<vmem>>, vector<64x128xf32>,
    %c2_115 = arith.constant 2 : index
    %c7_116 = arith.constant 7 : index
    %c0_117 = arith.constant 0 : index
    %120 = vector.load %arg9[%c2_115, %c7_116, %c0_117] : memref<10x17x64xf32, #tpu.memory_space<vmem>>, vector<8x8x64xf32>
    %121 = vector.shape_cast %120 : vector<8x8x64xf32> to vector<64x64xf32>
    %c2_118 = arith.constant 2 : index
    %c8_119 = arith.constant 8 : index
    %c0_120 = arith.constant 0 : index
    %122 = vector.load %arg9[%c2_118, %c8_119, %c0_120] : memref<10x17x64xf32, #tpu.memory_space<vmem>>, vector<8x8x64xf32>
    %123 = vector.shape_cast %122 : vector<8x8x64xf32> to vector<64x64xf32>
    %124 = tpu.concatenate %121, %123 in 1 : vector<64x64xf32>, vector<64x64xf32> -> vector<64x128xf32>
    %c0_121 = arith.constant 0 : index
    %c384 = arith.constant 384 : index
    %125 = vector.load %arg10[%c0_121, %c384] : memref<64x640xf32, #tpu.memory_space<vmem>>, vector<64x128xf32>
    tpu.vector_store %arg10[%c0_121, %c384], %124 {strides = array<i32>} : memref<64x640xf32, #tpu.memory_space<vmem>>, vector<64x128xf32>,
    %c2_122 = arith.constant 2 : index
    %c9_123 = arith.constant 9 : index
    %c0_124 = arith.constant 0 : index
    %126 = vector.load %arg9[%c2_122, %c9_123, %c0_124] : memref<10x17x64xf32, #tpu.memory_space<vmem>>, vector<8x8x64xf32>
    %127 = vector.shape_cast %126 : vector<8x8x64xf32> to vector<64x64xf32>
    %cst_125 = arith.constant 0.000000e+00 : f32
    %128 = vector.broadcast %cst_125 : f32 to vector<64x64xf32>
    %129 = tpu.concatenate %127, %128 in 1 : vector<64x64xf32>, vector<64x64xf32> -> vector<64x128xf32>
    %c0_126 = arith.constant 0 : index
    %c512 = arith.constant 512 : index
    %130 = vector.load %arg10[%c0_126, %c512] : memref<64x640xf32, #tpu.memory_space<vmem>>, vector<64x128xf32>
    tpu.vector_store %arg10[%c0_126, %c512], %129 {strides = array<i32>} : memref<64x640xf32, #tpu.memory_space<vmem>>, vector<64x128xf32>,
    %c0_127 = arith.constant 0 : index
    %c0_128 = arith.constant 0 : index
    %131 = vector.load %arg10[%c0_127, %c0_128] : memref<64x640xf32, #tpu.memory_space<vmem>>, vector<64x640xf32>
    %c0_129 = arith.constant 0 : index
    %c0_130 = arith.constant 0 : index
    %132 = vector.load %arg4[%c0_129, %c0_130] : memref<640x128xf32, #tpu.memory_space<vmem>>, vector<640x128xf32>
    %cst_131 = arith.constant dense<0.000000e+00> : vector<64x128xf32>
    %133 = tpu.matmul %131, %132, %cst_131 {dimension_numbers = #tpu.dot_dimension_numbers<[1], [0], [0], [1], [0, 0, 1, 1], [], []>} : vector<64x640xf32>, vector<640x128xf32>, vector<64x128xf32> -> vector<64x128xf32>
    %c0_132 = arith.constant 0 : index
    %c0_133 = arith.constant 0 : index
    %134 = vector.load %arg5[%c0_132, %c0_133] : memref<1x128xf32, #tpu.memory_space<vmem>>, vector<1x128xf32>
    %135 = vector.broadcast %134 : vector<1x128xf32> to vector<64x128xf32>
    %136 = arith.addf %133, %135 : vector<64x128xf32>
    %cst_134 = arith.constant 0.000000e+00 : f32
    %137 = vector.broadcast %cst_134 : f32 to vector<64x128xf32>
    %138 = arith.maximumf %136, %137 : vector<64x128xf32>
    %139 = vector.shape_cast %138 : vector<64x128xf32> to vector<4x2x8x128xf32>
    %c0_135 = arith.constant 0 : index
    %c0_136 = arith.constant 0 : index
    %c0_137 = arith.constant 0 : index
    %c0_138 = arith.constant 0 : index
    %140 = vector.load %arg11[%c0_135, %c0_136, %c0_137, %c0_138] : memref<4x2x8x128xf32, #tpu.memory_space<vmem>>, vector<4x2x8x128xf32>
    tpu.vector_store %arg11[%c0_135, %c0_136, %c0_137, %c0_138], %139 {strides = array<i32>} : memref<4x2x8x128xf32, #tpu.memory_space<vmem>>, vector<4x2x8x128xf32>,
    %c0_139 = arith.constant 0 : index
    %c0_140 = arith.constant 0 : index
    %c0_141 = arith.constant 0 : index
    %c0_142 = arith.constant 0 : index
    %141 = vector.load %arg11[%c0_139, %c0_140, %c0_141, %c0_142] : memref<4x2x8x128xf32, #tpu.memory_space<vmem>>, vector<4x1x8x128xf32>
    %142 = vector.shape_cast %141 : vector<4x1x8x128xf32> to vector<4x8x128xf32>
    %c0_143 = arith.constant 0 : index
    %c1_144 = arith.constant 1 : index
    %c0_145 = arith.constant 0 : index
    %c0_146 = arith.constant 0 : index
    %143 = vector.load %arg11[%c0_143, %c1_144, %c0_145, %c0_146] : memref<4x2x8x128xf32, #tpu.memory_space<vmem>>, vector<4x1x8x128xf32>
    %144 = vector.shape_cast %143 : vector<4x1x8x128xf32> to vector<4x8x128xf32>
    %145 = arith.maximumf %142, %144 : vector<4x8x128xf32>
    %146 = vector.shape_cast %145 : vector<4x8x128xf32> to vector<32x128xf32>
    %c0_147 = arith.constant 0 : index
    %c0_148 = arith.constant 0 : index
    %147 = vector.load %arg12[%c0_147, %c0_148] : memref<32x128xf32, #tpu.memory_space<vmem>>, vector<32x128xf32>
    tpu.vector_store %arg12[%c0_147, %c0_148], %146 {strides = array<i32>} : memref<32x128xf32, #tpu.memory_space<vmem>>, vector<32x128xf32>,
    %c0_149 = arith.constant 0 : index
    %c0_150 = arith.constant 0 : index
    %148 = tpu.strided_load %arg12[%c0_149, %c0_150] {strides = array<i32: 2, 1>} : memref<32x128xf32, #tpu.memory_space<vmem>>, vector<16x128xf32>
    %c1_151 = arith.constant 1 : index
    %c0_152 = arith.constant 0 : index
    %149 = tpu.strided_load %arg12[%c1_151, %c0_152] {strides = array<i32: 2, 1>} : memref<32x128xf32, #tpu.memory_space<vmem>>, vector<16x128xf32>
    %150 = arith.maximumf %148, %149 : vector<16x128xf32>
    %c0_153 = arith.constant 0 : index
    %c0_154 = arith.constant 0 : index
    %c0_155 = arith.constant 0 : index
    %151 = vector.load %arg6[%c0_153, %c0_154, %c0_155] : memref<1x16x128xf32, #tpu.memory_space<vmem>>, vector<1x16x128xf32>
    %152 = vector.shape_cast %151 : vector<1x16x128xf32> to vector<16x128xf32>
    %153 = vector.shape_cast %150 : vector<16x128xf32> to vector<1x16x128xf32>
    tpu.vector_store %arg6[%c0_153, %c0_154, %c0_155], %153 {strides = array<i32>} : memref<1x16x128xf32, #tpu.memory_space<vmem>>, vector<1x16x128xf32>,
    return
  }
  func.func @transform_0(%arg0: i32) -> (i32, i32, i32, i32) {
    %c0_i32 = arith.constant 0 : i32
    %c0_i32_0 = arith.constant 0 : i32
    %c0_i32_1 = arith.constant 0 : i32
    %c0_i32_2 = arith.constant 0 : i32
    return %arg0, %c0_i32, %c0_i32_0, %c0_i32_1 : i32, i32, i32, i32
  }
  func.func @transform_1(%arg0: i32) -> (i32, i32, i32, i32) {
    %c0_i32 = arith.constant 0 : i32
    %c0_i32_0 = arith.constant 0 : i32
    %c0_i32_1 = arith.constant 0 : i32
    %c0_i32_2 = arith.constant 0 : i32
    %c0_i32_3 = arith.constant 0 : i32
    return %c0_i32, %c0_i32_0, %c0_i32_1, %c0_i32_2 : i32, i32, i32, i32
  }
  func.func @transform_2(%arg0: i32) -> (i32, i32) {
    %c0_i32 = arith.constant 0 : i32
    %c0_i32_0 = arith.constant 0 : i32
    %c0_i32_1 = arith.constant 0 : i32
    return %c0_i32, %c0_i32_0 : i32, i32
  }
  func.func @transform_3(%arg0: i32) -> (i32, i32) {
    %c0_i32 = arith.constant 0 : i32
    %c0_i32_0 = arith.constant 0 : i32
    %c0_i32_1 = arith.constant 0 : i32
    return %c0_i32, %c0_i32_0 : i32, i32
  }
  func.func @transform_4(%arg0: i32) -> (i32, i32) {
    %c0_i32 = arith.constant 0 : i32
    %c0_i32_0 = arith.constant 0 : i32
    %c0_i32_1 = arith.constant 0 : i32
    return %c0_i32, %c0_i32_0 : i32, i32
  }
  func.func @transform_5(%arg0: i32) -> (i32, i32, i32) {
    %c0_i32 = arith.constant 0 : i32
    %c0_i32_0 = arith.constant 0 : i32
    %c0_i32_1 = arith.constant 0 : i32
    return %arg0, %c0_i32, %c0_i32_0 : i32, i32, i32
  }
}

</mosaic_0001>

<bundles_post_ra>
// kernel: firstnet_pallas.1
= control target key start
LH: loop header
LB: loop body
LE: loop exit
PB: predicated region body
PF: predicated region fallthrough
CT: control target
= control target key end

     0   :  { %10 = vsyncpa [#allocation9], 0  ;;  %s6692_s0 = inlined_call_operand.vmem [shape: f32[2,18,18,1], index: 0, kind: input, shape index: {}]   ;;  %s6693_s1 = inlined_call_operand.vmem [shape: f32[3,3,1,64], index: 1, kind: input, shape index: {}]   ;;  %s6694_s2 = inlined_call_operand.vmem [shape: f32[1,64], index: 2, kind: input, shape index: {}]   ;;  %s6695_s3 = inlined_call_operand.vmem [shape: f32[640,128], index: 3, kind: input, shape index: {}]   ;;  %s6696_s4 = inlined_call_operand.vmem [shape: f32[1,128], index: 4, kind: input, shape index: {}]   ;;  %s6697_s5 = inlined_call_operand.hbm [shape: f32[2,16,128], index: 5, kind: output, shape index: {}]  }
   0x1   :  { %12 = vsyncpa [#allocation9 + $0x1], 0  ;;  %s4421_s18 = smov 0   ;;  %s4423_s19 = smov 0  }
   0x2   :  { %s4425_s20 = smov 0   ;;  %s4427_s21 = smov 0  }
   0x3 LB: > { %s4442_s22 = sadd.s32 4294967295, %s4383_s21   ;;  %s3659_s23 = sadd.s32 4294967294, %s4383_s21   ;;  %s4383_s21 = sphi %s4427_s21, %s7031_s21   ;;  %s4379_s20 = sphi %s4425_s20, %s7030_s20   ;;  %s4375_s19 = sphi %s4423_s19, %s7029_s19   ;;  %s4371_s18 = sphi %s4421_s18, %s7028_s18  }
   0x4   : > { %s4446_s24 = sadd.s32 1, %s4383_s21   ;;  %s135_s25 = sadd.s32 1, %s4379_s20 }
   0x5   : > { %s132_s26 = ssub.s32 %s4383_s21, %s4446_s24  ;;  %p145_p0 = scmp.ne.s32.totalorder %s4379_s20, %s4375_s19 }
   0x6   : > { %p133_p1 = scmp.eq.s32.totalorder %s132_s26, 0  ;;  %p146_p2 = scmp.eq.s32.totalorder %s4442_s22, 1 }
   0x7   : > { %p151_p3 = scmp.ne.s32.totalorder %s4375_s19, %s4371_s18  ;;  %p152_p4 = scmp.eq.s32.totalorder %s3659_s23, 1 }
   0x8   : > { %s4457_s27 = scalar_select %p133_p1, %s4379_s20, %s135_s25  }
   0x9   : > { %p4459_p5 = por %p146_p2, %p145_p0  ;;  %p4463_p6 = por %p152_p4, %p151_p3 }
   0xa   : > { %p3662_p7 = scmp.ge.s32.totalorder %s4383_s21, 1  ;;  %p190_p8 = scmp.lt.s32.totalorder %s4383_s21, 3 }
   0xc   : > { %p191_p9 = pnand %p3662_p7, %p190_p8 }
   0xe   : > { %194 = sbr.rel (%p191_p9) target bundleno = 1142 (0x476), region = 40 }
  0x15   : > { %p218_p10 = scmp.lt.s32.totalorder %s4442_s22, 1  ;;  %v4385_v0 = vmov 0   ;;  %vm2639_vm0 = vcmask 523264   ;;  %vm2778_vm1 = vcmask 516096   ;;  %s4387_s15 = smov 64  }
  0x16   : > { %4228 = vset.pattern.permute.xlu1 %v4385_v0  ;;  %4227 = vset.pattern.permute.xlu0 %v4385_v0  ;;  %s215_s11 = sand.u32 1, %s4375_s19   ;;  %s3881_s13 = sshll.u32 %s4442_s22, 8 }
  0x17   : > { %s219_s30 = scalar_select %p218_p10, %s4442_s22, 1 }
  0x18   : > { %s3663_s12 = sshll.u32 %s215_s11, 4  ;;  %s6647_s23 = scalar_lea.hbm %s6697_s5, %s3881_s13 }
  0x19   : > { %s4182_s6 = smul.u32 432, %s219_s30  ;;  %s217_s14 = scalar_lea.vmem [#allocation8], %s3663_s12 }
  0x1a   : > { %s3597_s16 = sshll.u32 %s217_s14, 4  ;;  %s6651_s22 = scalar_lea.sflag [#allocation9], %s215_s11  ;;  %s6649_s16 = int_to_ptr.vmem [resolvable:$true] %s3597_s16 }
  0x1b   : > { %s4474_s9 = scalar_lea.vmem %s6692_s0, %s4182_s6  ;;  %s4321_s25 = scalar_lea.vmem %s6649_s16, 256 }
  0x1c   : > { %v4477_v1 = vld [vmem:[%s4474_s9 + $0x18] sm:$0xff]  ;;  %v230_v2 = vld [vmem:[%s4474_s9] sm:$0xff]  ;;  %v231_v4 = vld [vmem:[%s4474_s9 + $0x8] sm:$0xff]  ;;  %p4322_p11 = scmp.ne.s32.totalorder %s6649_s16, %s4321_s25  ;;  %s4388_s26 = smov [#allocation8]  }
  0x1d   : > { %275 = vperm.xlu1 %4228, %v4477_v1   ;;  %265 = vperm.xlu0 %4227, %v230_v2   ;;  %v4482_v3 = vld [vmem:[%s4474_s9 + $0x20] sm:$0xff]  ;;  %v4487_v5 = vld [vmem:[%s4474_s9 + $0x38] sm:$0xff]  ;;  %v4490_v6 = vld [vmem:[%s4474_s9 + $0x30] sm:$0xff]  ;;  %s4325_s30 = sshll.u32 %s4388_s26, 4  ;;  %s4326_s30 = int_to_ptr.vmem [resolvable:$false] %s4325_s30 }
  0x1e   : > { %v4495_v7 = vld [vmem:[%s4474_s9 + $0x50] sm:$0xff]  ;;  %v4498_v8 = vld [vmem:[%s4474_s9 + $0x48] sm:$0xff]  ;;  %v4506_v10 = vld [vmem:[%s4474_s9 + $0x60] sm:$0xff]  ;;  %p4323_p12 = pnand %p4322_p11, %p4459_p5  ;;  %s4327_s6 = scalar_lea.vmem %s4326_s30, 512 }
  0x1f   : > { %v4503_v9 = vld [vmem:[%s4474_s9 + $0x68] sm:$0xff]  ;;  %v4511_v11 = vld [vmem:[%s4474_s9 + $0x80] sm:$0xff]  ;;  %v4514_v12 = vld [vmem:[%s4474_s9 + $0x78] sm:$0xff]  ;;  %p4328_p0 = scmp.lt.s32.totalorder %s6649_s16, %s4326_s30  ;;  %p4329_p1 = scmp.lt.s32.totalorder %s4327_s6, %s4321_s25 }
  0x20   : > { %v4519_v13 = vld [vmem:[%s4474_s9 + $0x98] sm:$0xff]  ;;  %v4522_v14 = vld [vmem:[%s4474_s9 + $0x90] sm:$0xff]  ;;  %v4530_v16 = vld [vmem:[%s4474_s9 + $0xa8] sm:$0xff]  ;;  %p4324_p13 = pneg %p4323_p12 }
  0x21   : > { %280 = vperm.xlu1 %4228, %v4482_v3   ;;  %270 = vperm.xlu0 %4227, %v231_v4   ;;  %v4527_v15 = vld [vmem:[%s4474_s9 + $0xb0] sm:$0xff]  ;;  %v4535_v17 = vld [vmem:[%s4474_s9 + $0xc8] sm:$0xff]  ;;  %v4538_v18 = vld [vmem:[%s4474_s9 + $0xc0] sm:$0xff]  ;;  %p4330_p2 = por %p4329_p1, %p4328_p0 }
  0x22   : > { %v4543_v19 = vld [vmem:[%s4474_s9 + $0xe0] sm:$0xff]  ;;  %v4546_v20 = vld [vmem:[%s4474_s9 + $0xd8] sm:$0xff]  ;;  %v4554_v22 = vld [vmem:[%s4474_s9 + $0xf0] sm:$0xff] }
  0x23   : > { %v4551_v21 = vld [vmem:[%s4474_s9 + $0xf8] sm:$0xff]  ;;  %v4559_v23 = vld [vmem:[%s4474_s9 + $0x110] sm:$0xff]  ;;  %v4562_v24 = vld [vmem:[%s4474_s9 + $0x108] sm:$0xff]  ;;  %p4331_p3 = pnand %p4330_p2, %p4324_p13 }
  0x24   : > { %v4567_v25 = vld [vmem:[%s4474_s9 + $0x128] sm:$0xff]  ;;  %v4570_v26 = vld [vmem:[%s4474_s9 + $0x120] sm:$0xff]  ;;  %v4578_v28 = vld [vmem:[%s4474_s9 + $0x138] sm:$0xff] }
  0x25   : > { %290 = vperm.xlu1 %4228, %v4487_v5   ;;  %285 = vperm.xlu0 %4227, %v4490_v6   ;;  %v4575_v27 = vld [vmem:[%s4474_s9 + $0x140] sm:$0xff]  ;;  %v4583_v29 = vld [vmem:[%s4474_s9 + $0x158] sm:$0xff]  ;;  %v4586_v30 = vld [vmem:[%s4474_s9 + $0x150] sm:$0xff] }
  0x26   : > { %v4591_v31 = vld [vmem:[%s4474_s9 + $0x170] sm:$0xff]  ;;  %v4594_v32 = vld [vmem:[%s4474_s9 + $0x168] sm:$0xff]  ;;  %v4604_v36 = vld [vmem:[%s4474_s9 + $0x19] sm:$0xff] }
  0x27   : > { %v494_v33 = vld [vmem:[%s4474_s9 + $0x9] sm:$0xff]  ;;  %v493_v34 = vld [vmem:[%s4474_s9 + $0x1] sm:$0xff]  ;;  %v4609_v37 = vld [vmem:[%s4474_s9 + $0x39] sm:$0xff] }
  0x28   : > { %v4601_v35 = vld [vmem:[%s4474_s9 + $0x21] sm:$0xff]  ;;  %v4612_v38 = vld [vmem:[%s4474_s9 + $0x31] sm:$0xff]  ;;  %v4620_v40 = vld [vmem:[%s4474_s9 + $0x49] sm:$0xff] }
  0x29   : > { %300 = vperm.xlu1 %4228, %v4495_v7   ;;  %295 = vperm.xlu0 %4227, %v4498_v8   ;;  %v4617_v39 = vld [vmem:[%s4474_s9 + $0x51] sm:$0xff]  ;;  %v4625_v41 = vld [vmem:[%s4474_s9 + $0x69] sm:$0xff]  ;;  %v4628_v42 = vld [vmem:[%s4474_s9 + $0x61] sm:$0xff] }
  0x2a   : > { %v4633_v43 = vld [vmem:[%s4474_s9 + $0x81] sm:$0xff]  ;;  %v4636_v44 = vld [vmem:[%s4474_s9 + $0x79] sm:$0xff]  ;;  %v4644_v46 = vld [vmem:[%s4474_s9 + $0x91] sm:$0xff] }
  0x2b   : > { %6754 = vst [vmem:[#allocation11_spill] sm:$0xff] %v4633_v43  ;;  %6755 = vst [vmem:[#allocation12_spill] sm:$0xff] %v4636_v44  ;;  %v4641_v45 = vld [vmem:[%s4474_s9 + $0x99] sm:$0xff]  ;;  %v4649_v47 = vld [vmem:[%s4474_s9 + $0xb1] sm:$0xff] }
  0x2c   : > { %6756 = vst [vmem:[#allocation13_spill] sm:$0xff] %v4641_v45  ;;  %6757 = vst [vmem:[#allocation14_spill] sm:$0xff] %v4644_v46  ;;  %v4652_v48 = vld [vmem:[%s4474_s9 + $0xa9] sm:$0xff]  ;;  %v4660_v50 = vld [vmem:[%s4474_s9 + $0xc1] sm:$0xff] }
  0x2d   : > { %310 = vperm.xlu1 %4228, %v4503_v9   ;;  %305 = vperm.xlu0 %4227, %v4506_v10   ;;  %6758 = vst [vmem:[#allocation15_spill] sm:$0xff] %v4649_v47  ;;  %6759 = vst [vmem:[#allocation16_spill] sm:$0xff] %v4652_v48  ;;  %v4657_v49 = vld [vmem:[%s4474_s9 + $0xc9] sm:$0xff]  ;;  %v4665_v51 = vld [vmem:[%s4474_s9 + $0xe1] sm:$0xff] }
  0x2e   : > { %6760 = vst [vmem:[#allocation17_spill] sm:$0xff] %v4657_v49  ;;  %6761 = vst [vmem:[#allocation18_spill] sm:$0xff] %v4660_v50  ;;  %v4668_v52 = vld [vmem:[%s4474_s9 + $0xd9] sm:$0xff]  ;;  %v4676_v54 = vld [vmem:[%s4474_s9 + $0xf1] sm:$0xff] }
  0x2f   : > { %6762 = vst [vmem:[#allocation19_spill] sm:$0xff] %v4665_v51  ;;  %6763 = vst [vmem:[#allocation20_spill] sm:$0xff] %v4668_v52  ;;  %v4673_v53 = vld [vmem:[%s4474_s9 + $0xf9] sm:$0xff]  ;;  %v4681_v55 = vld [vmem:[%s4474_s9 + $0x111] sm:$0xff] }
  0x30   : > { %6764 = vst [vmem:[#allocation21_spill] sm:$0xff] %v4673_v53  ;;  %6765 = vst [vmem:[#allocation22_spill] sm:$0xff] %v4676_v54  ;;  %v4684_v56 = vld [vmem:[%s4474_s9 + $0x109] sm:$0xff]  ;;  %v4692_v58 = vld [vmem:[%s4474_s9 + $0x121] sm:$0xff] }
  0x31   : > { %320 = vperm.xlu1 %4228, %v4511_v11   ;;  %315 = vperm.xlu0 %4227, %v4514_v12   ;;  %6766 = vst [vmem:[#allocation23_spill] sm:$0xff] %v4681_v55  ;;  %6767 = vst [vmem:[#allocation24_spill] sm:$0xff] %v4684_v56  ;;  %v4689_v57 = vld [vmem:[%s4474_s9 + $0x129] sm:$0xff]  ;;  %v4697_v59 = vld [vmem:[%s4474_s9 + $0x141] sm:$0xff] }
  0x32   : > { %6768 = vst [vmem:[#allocation25_spill] sm:$0xff] %v4689_v57  ;;  %6769 = vst [vmem:[#allocation26_spill] sm:$0xff] %v4692_v58  ;;  %v4700_v60 = vld [vmem:[%s4474_s9 + $0x139] sm:$0xff]  ;;  %v4708_v62 = vld [vmem:[%s4474_s9 + $0x151] sm:$0xff] }
  0x33   : > { %6770 = vst [vmem:[#allocation27_spill] sm:$0xff] %v4697_v59  ;;  %6771 = vst [vmem:[#allocation28_spill] sm:$0xff] %v4700_v60  ;;  %v4705_v61 = vld [vmem:[%s4474_s9 + $0x159] sm:$0xff]  ;;  %v4713_v63 = vld [vmem:[%s4474_s9 + $0x171] sm:$0xff] }
  0x34   : > { %6772 = vst [vmem:[#allocation29_spill] sm:$0xff] %v4705_v61  ;;  %6773 = vst [vmem:[#allocation30_spill] sm:$0xff] %v4708_v62  ;;  %v4716_v0 = vld [vmem:[%s4474_s9 + $0x169] sm:$0xff] }
  0x35   : > { %330 = vperm.xlu1 %4228, %v4519_v13   ;;  %325 = vperm.xlu0 %4227, %v4522_v14   ;;  %6774 = vst [vmem:[#allocation31_spill] sm:$0xff] %v4713_v63  ;;  %6775 = vst [vmem:[#allocation32_spill] sm:$0xff] %v4716_v0  ;;  %v758_v2 = vld [vmem:[%s4474_s9 + $0xa] sm:$0xff]  ;;  %v757_v4 = vld [vmem:[%s4474_s9 + $0x2] sm:$0xff] }
  0x39   : > { %340 = vperm.xlu1 %4228, %v4527_v15   ;;  %335 = vperm.xlu0 %4227, %v4530_v16  }
  0x3d   : > { %350 = vperm.xlu1 %4228, %v4535_v17   ;;  %345 = vperm.xlu0 %4227, %v4538_v18  }
  0x41   : > { %360 = vperm.xlu1 %4228, %v4543_v19   ;;  %355 = vperm.xlu0 %4227, %v4546_v20  }
  0x45   : > { %370 = vperm.xlu1 %4228, %v4551_v21   ;;  %365 = vperm.xlu0 %4227, %v4554_v22  }
  0x49   : > { %380 = vperm.xlu1 %4228, %v4559_v23   ;;  %375 = vperm.xlu0 %4227, %v4562_v24  }
  0x4d   : > { %390 = vperm.xlu1 %4228, %v4567_v25   ;;  %385 = vperm.xlu0 %4227, %v4570_v26  }
  0x51   : > { %400 = vperm.xlu1 %4228, %v4575_v27   ;;  %395 = vperm.xlu0 %4227, %v4578_v28  }
  0x55   : > { %410 = vperm.xlu1 %4228, %v4583_v29   ;;  %405 = vperm.xlu0 %4227, %v4586_v30  }
  0x59   : > { %420 = vperm.xlu1 %4228, %v4591_v31   ;;  %415 = vperm.xlu0 %4227, %v4594_v32  }
  0x5d   : > { %534 = vperm.xlu1 %4228, %v494_v33   ;;  %529 = vperm.xlu0 %4227, %v493_v34  }
  0x61   : > { %544 = vperm.xlu1 %4228, %v4601_v35   ;;  %539 = vperm.xlu0 %4227, %v4604_v36  }
  0x65   : > { %554 = vperm.xlu1 %4228, %v4609_v37   ;;  %549 = vperm.xlu0 %4227, %v4612_v38  }
  0x69   : > { %564 = vperm.xlu1 %4228, %v4617_v39   ;;  %559 = vperm.xlu0 %4227, %v4620_v40  }
  0x6d   : > { %574 = vperm.xlu1 %4228, %v4625_v41   ;;  %569 = vperm.xlu0 %4227, %v4628_v42  }
  0x71   : > { %584 = vperm.xlu1 %4228, %v4633_v43   ;;  %579 = vperm.xlu0 %4227, %v4636_v44  }
  0x75   : > { %594 = vperm.xlu1 %4228, %v4641_v45   ;;  %589 = vperm.xlu0 %4227, %v4644_v46  }
  0x79   : > { %604 = vperm.xlu1 %4228, %v4649_v47   ;;  %599 = vperm.xlu0 %4227, %v4652_v48  }
  0x7d   : > { %614 = vperm.xlu1 %4228, %v4657_v49   ;;  %609 = vperm.xlu0 %4227, %v4660_v50  }
  0x81   : > { %624 = vperm.xlu1 %4228, %v4665_v51   ;;  %619 = vperm.xlu0 %4227, %v4668_v52  }
  0x85   : > { %634 = vperm.xlu1 %4228, %v4673_v53   ;;  %629 = vperm.xlu0 %4227, %v4676_v54  }
  0x89   : > { %644 = vperm.xlu1 %4228, %v4681_v55   ;;  %639 = vperm.xlu0 %4227, %v4684_v56   ;;  %v4847_v56 = vld [vmem:[%s4474_s9 + $0xfa] sm:$0xff]  ;;  %v4850_v55 = vld [vmem:[%s4474_s9 + $0xf2] sm:$0xff] }
  0x8a   : > { %6810 = vst [vmem:[#allocation67_spill] sm:$0xff] %v4847_v56  ;;  %6811 = vst [vmem:[#allocation68_spill] sm:$0xff] %v4850_v55 }
  0x8d   : > { %654 = vperm.xlu1 %4228, %v4689_v57   ;;  %649 = vperm.xlu0 %4227, %v4692_v58  }
  0x91   : > { %664 = vperm.xlu1 %4228, %v4697_v59   ;;  %659 = vperm.xlu0 %4227, %v4700_v60   ;;  %v4834_v59 = vld [vmem:[%s4474_s9 + $0xda] sm:$0xff] }
  0x92   : > { %6809 = vst [vmem:[#allocation66_spill] sm:$0xff] %v4834_v59 }
  0x95   : > { %674 = vperm.xlu1 %4228, %v4705_v61   ;;  %669 = vperm.xlu0 %4227, %v4708_v62   ;;  %v4727_v62 = vld [vmem:[%s4474_s9 + $0x22] sm:$0xff]  ;;  %v4730_v61 = vld [vmem:[%s4474_s9 + $0x1a] sm:$0xff] }
  0x96   : > { %6778 = vst [vmem:[#allocation35_spill] sm:$0xff] %v4727_v62  ;;  %6779 = vst [vmem:[#allocation36_spill] sm:$0xff] %v4730_v61 }
  0x99   : > { %684 = vperm.xlu1 %4228, %v4713_v63   ;;  %679 = vperm.xlu0 %4227, %v4716_v0  }
  0x9c   : > { %v4722_v33 = vpop.permute.xlu1 %275  ;;  %v4724_v34 = vpop.permute.xlu0 %265 }
  0x9d   : > { %6776 = vst [vmem:[#allocation33_spill] sm:$0xff] %v4722_v33  ;;  %6777 = vst [vmem:[#allocation34_spill] sm:$0xff] %v4724_v34  ;;  %798 = vperm.xlu1 %4228, %v758_v2   ;;  %793 = vperm.xlu0 %4227, %v757_v4   ;;  %v4739_v33 = vld [vmem:[%s4474_s9 + $0x3a] sm:$0xff]  ;;  %v4742_v34 = vld [vmem:[%s4474_s9 + $0x32] sm:$0xff] }
  0x9e   : > { %6782 = vst [vmem:[#allocation39_spill] sm:$0xff] %v4739_v33  ;;  %6783 = vst [vmem:[#allocation40_spill] sm:$0xff] %v4742_v34 }
  0xa0   : > { %v4732_v60 = vpop.permute.xlu1 %280  ;;  %v4734_v63 = vpop.permute.xlu0 %270 }
  0xa1   : > { %6780 = vst [vmem:[#allocation37_spill] sm:$0xff] %v4732_v60  ;;  %6781 = vst [vmem:[#allocation38_spill] sm:$0xff] %v4734_v63  ;;  %808 = vperm.xlu1 %4228, %v4727_v62   ;;  %803 = vperm.xlu0 %4227, %v4730_v61   ;;  %v4751_v63 = vld [vmem:[%s4474_s9 + $0x52] sm:$0xff]  ;;  %v4754_v60 = vld [vmem:[%s4474_s9 + $0x4a] sm:$0xff] }
  0xa2   : > { %6786 = vst [vmem:[#allocation43_spill] sm:$0xff] %v4751_v63  ;;  %6787 = vst [vmem:[#allocation44_spill] sm:$0xff] %v4754_v60 }
  0xa4   : > { %v4744_v2 = vpop.permute.xlu1 %290  ;;  %v4746_v4 = vpop.permute.xlu0 %285 }
  0xa5   : > { %6784 = vst [vmem:[#allocation41_spill] sm:$0xff] %v4744_v2  ;;  %6785 = vst [vmem:[#allocation42_spill] sm:$0xff] %v4746_v4  ;;  %818 = vperm.xlu1 %4228, %v4739_v33   ;;  %813 = vperm.xlu0 %4227, %v4742_v34   ;;  %v4763_v4 = vld [vmem:[%s4474_s9 + $0x6a] sm:$0xff]  ;;  %v4766_v2 = vld [vmem:[%s4474_s9 + $0x62] sm:$0xff] }
  0xa6   : > { %6790 = vst [vmem:[#allocation47_spill] sm:$0xff] %v4763_v4  ;;  %6791 = vst [vmem:[#allocation48_spill] sm:$0xff] %v4766_v2 }
  0xa8   : > { %v4756_v62 = vpop.permute.xlu1 %300  ;;  %v4758_v61 = vpop.permute.xlu0 %295 }
  0xa9   : > { %6788 = vst [vmem:[#allocation45_spill] sm:$0xff] %v4756_v62  ;;  %6789 = vst [vmem:[#allocation46_spill] sm:$0xff] %v4758_v61  ;;  %828 = vperm.xlu1 %4228, %v4751_v63   ;;  %823 = vperm.xlu0 %4227, %v4754_v60   ;;  %v4775_v61 = vld [vmem:[%s4474_s9 + $0x82] sm:$0xff]  ;;  %v4778_v62 = vld [vmem:[%s4474_s9 + $0x7a] sm:$0xff] }
  0xaa   : > { %6794 = vst [vmem:[#allocation51_spill] sm:$0xff] %v4775_v61  ;;  %6795 = vst [vmem:[#allocation52_spill] sm:$0xff] %v4778_v62 }
  0xac   : > { %v4768_v33 = vpop.permute.xlu1 %310  ;;  %v4770_v34 = vpop.permute.xlu0 %305 }
  0xad   : > { %6792 = vst [vmem:[#allocation49_spill] sm:$0xff] %v4768_v33  ;;  %6793 = vst [vmem:[#allocation50_spill] sm:$0xff] %v4770_v34  ;;  %838 = vperm.xlu1 %4228, %v4763_v4   ;;  %833 = vperm.xlu0 %4227, %v4766_v2   ;;  %v4787_v34 = vld [vmem:[%s4474_s9 + $0x9a] sm:$0xff]  ;;  %v4790_v33 = vld [vmem:[%s4474_s9 + $0x92] sm:$0xff] }
  0xae   : > { %6798 = vst [vmem:[#allocation55_spill] sm:$0xff] %v4787_v34  ;;  %6799 = vst [vmem:[#allocation56_spill] sm:$0xff] %v4790_v33 }
  0xb0   : > { %v4780_v63 = vpop.permute.xlu1 %320  ;;  %v4782_v60 = vpop.permute.xlu0 %315 }
  0xb1   : > { %6796 = vst [vmem:[#allocation53_spill] sm:$0xff] %v4780_v63  ;;  %6797 = vst [vmem:[#allocation54_spill] sm:$0xff] %v4782_v60  ;;  %848 = vperm.xlu1 %4228, %v4775_v61   ;;  %843 = vperm.xlu0 %4227, %v4778_v62   ;;  %v4799_v63 = vld [vmem:[%s4474_s9 + $0xb2] sm:$0xff]  ;;  %v4802_v60 = vld [vmem:[%s4474_s9 + $0xaa] sm:$0xff] }
  0xb2   : > { %6802 = vst [vmem:[#allocation59_spill] sm:$0xff] %v4799_v63  ;;  %6803 = vst [vmem:[#allocation60_spill] sm:$0xff] %v4802_v60 }
  0xb4   : > { %v4792_v4 = vpop.permute.xlu1 %330  ;;  %v4794_v2 = vpop.permute.xlu0 %325 }
  0xb5   : > { %6800 = vst [vmem:[#allocation57_spill] sm:$0xff] %v4792_v4  ;;  %6801 = vst [vmem:[#allocation58_spill] sm:$0xff] %v4794_v2  ;;  %858 = vperm.xlu1 %4228, %v4787_v34   ;;  %853 = vperm.xlu0 %4227, %v4790_v33   ;;  %v4811_v4 = vld [vmem:[%s4474_s9 + $0xca] sm:$0xff]  ;;  %v4814_v2 = vld [vmem:[%s4474_s9 + $0xc2] sm:$0xff] }
  0xb6   : > { %6806 = vst [vmem:[#allocation63_spill] sm:$0xff] %v4811_v4  ;;  %6807 = vst [vmem:[#allocation64_spill] sm:$0xff] %v4814_v2  ;;  %v4819_v33 = vld [vmem:[%s6693_s1] ss:$0 sm:$0xff] }
  0xb8   : > { %v4804_v61 = vpop.permute.xlu1 %340  ;;  %v4806_v62 = vpop.permute.xlu0 %335 }
  0xb9   : > { %6804 = vst [vmem:[#allocation61_spill] sm:$0xff] %v4804_v61  ;;  %6805 = vst [vmem:[#allocation62_spill] sm:$0xff] %v4806_v62  ;;  %868 = vperm.xlu1 %4228, %v4799_v63   ;;  %863 = vperm.xlu0 %4227, %v4802_v60   ;;  %v4828_v60 = vld [vmem:[%s6694_s2] ss:$0 sm:$0xff]  ;;  %v4831_v63 = vld [vmem:[%s4474_s9 + $0xe2] sm:$0xff] }
  0xba   : > { %6808 = vst [vmem:[#allocation65_spill] sm:$0xff] %v4831_v63 }
  0xbc   : > { %v351_v34 = vpop.permute.xlu1 %350  ;;  %v346_v0 = vpop.permute.xlu0 %345 }
  0xbd   : > { %v446_v61 = vmul.f32 %v4819_v33, %v351_v34  ;;  %v445_v62 = vmul.f32 %v4819_v33, %v346_v0  ;;  %878 = vperm.xlu1 %4228, %v4811_v4   ;;  %873 = vperm.xlu0 %4227, %v4814_v2  }
  0xbf   : > { %v4837_v58 = vadd.f32 %v4828_v60, %v446_v61  ;;  %v4840_v34 = vadd.f32 %v4828_v60, %v445_v62 }
  0xc0   : > { %v361_v0 = vpop.permute.xlu1 %360  ;;  %v356_v4 = vpop.permute.xlu0 %355 }
  0xc1   : > { %v448_v2 = vmul.f32 %v4819_v33, %v361_v0  ;;  %v447_v57 = vmul.f32 %v4819_v33, %v356_v4  ;;  %888 = vperm.xlu1 %4228, %v4831_v63   ;;  %883 = vperm.xlu0 %4227, %v4834_v59   ;;  %v4863_v59 = vld [vmem:[%s4474_s9 + $0x112] sm:$0xff]  ;;  %v4866_v63 = vld [vmem:[%s4474_s9 + $0x10a] sm:$0xff] }
  0xc2   : > { %6812 = vst [vmem:[#allocation69_spill] sm:$0xff] %v4863_v59  ;;  %6813 = vst [vmem:[#allocation70_spill] sm:$0xff] %v4866_v63 }
  0xc3   : > { %v4853_v61 = vadd.f32 %v4828_v60, %v448_v2  ;;  %v4856_v62 = vadd.f32 %v4828_v60, %v447_v57 }
  0xc4   : > { %v371_v54 = vpop.permute.xlu1 %370  ;;  %v366_v53 = vpop.permute.xlu0 %365 }
  0xc5   : > { %v450_v4 = vmul.f32 %v4819_v33, %v371_v54  ;;  %v449_v0 = vmul.f32 %v4819_v33, %v366_v53  ;;  %898 = vperm.xlu1 %4228, %v4847_v56   ;;  %893 = vperm.xlu0 %4227, %v4850_v55   ;;  %v4879_v55 = vld [vmem:[%s4474_s9 + $0x12a] sm:$0xff]  ;;  %v4882_v56 = vld [vmem:[%s4474_s9 + $0x122] sm:$0xff] }
  0xc6   : > { %6814 = vst [vmem:[#allocation71_spill] sm:$0xff] %v4879_v55  ;;  %6815 = vst [vmem:[#allocation72_spill] sm:$0xff] %v4882_v56 }
  0xc7   : > { %v4869_v2 = vadd.f32 %v4828_v60, %v450_v4  ;;  %v4872_v57 = vadd.f32 %v4828_v60, %v449_v0 }
  0xc8   : > { %v381_v52 = vpop.permute.xlu1 %380  ;;  %v376_v51 = vpop.permute.xlu0 %375 }
  0xc9   : > { %v452_v53 = vmul.f32 %v4819_v33, %v381_v52  ;;  %v451_v54 = vmul.f32 %v4819_v33, %v376_v51  ;;  %908 = vperm.xlu1 %4228, %v4863_v59   ;;  %903 = vperm.xlu0 %4227, %v4866_v63   ;;  %v4895_v63 = vld [vmem:[%s4474_s9 + $0x142] sm:$0xff]  ;;  %v4898_v59 = vld [vmem:[%s4474_s9 + $0x13a] sm:$0xff] }
  0xca   : > { %6816 = vst [vmem:[#allocation73_spill] sm:$0xff] %v4895_v63  ;;  %6817 = vst [vmem:[#allocation74_spill] sm:$0xff] %v4898_v59 }
  0xcb   : > { %v4885_v4 = vadd.f32 %v4828_v60, %v452_v53  ;;  %v4888_v0 = vadd.f32 %v4828_v60, %v451_v54 }
  0xcc   : > { %v391_v50 = vpop.permute.xlu1 %390  ;;  %v386_v49 = vpop.permute.xlu0 %385 }
  0xcd   : > { %v454_v51 = vmul.f32 %v4819_v33, %v391_v50  ;;  %v453_v52 = vmul.f32 %v4819_v33, %v386_v49  ;;  %918 = vperm.xlu1 %4228, %v4879_v55   ;;  %913 = vperm.xlu0 %4227, %v4882_v56   ;;  %v4911_v56 = vld [vmem:[%s4474_s9 + $0x15a] sm:$0xff]  ;;  %v4914_v55 = vld [vmem:[%s4474_s9 + $0x152] sm:$0xff] }
  0xce   : > { %6818 = vst [vmem:[#allocation75_spill] sm:$0xff] %v4911_v56  ;;  %6819 = vst [vmem:[#allocation76_spill] sm:$0xff] %v4914_v55 }
  0xcf   : > { %v4901_v53 = vadd.f32 %v4828_v60, %v454_v51  ;;  %v4904_v54 = vadd.f32 %v4828_v60, %v453_v52 }
  0xd0   : > { %v401_v48 = vpop.permute.xlu1 %400  ;;  %v396_v47 = vpop.permute.xlu0 %395 }
  0xd1   : > { %v456_v49 = vmul.f32 %v4819_v33, %v401_v48  ;;  %v455_v50 = vmul.f32 %v4819_v33, %v396_v47  ;;  %928 = vperm.xlu1 %4228, %v4895_v63   ;;  %923 = vperm.xlu0 %4227, %v4898_v59   ;;  %v4927_v59 = vld [vmem:[%s4474_s9 + $0x172] sm:$0xff]  ;;  %v4930_v63 = vld [vmem:[%s4474_s9 + $0x16a] sm:$0xff] }
  0xd3   : > { %v4917_v51 = vadd.f32 %v4828_v60, %v456_v49  ;;  %v4920_v52 = vadd.f32 %v4828_v60, %v455_v50 }
  0xd4   : > { %v411_v46 = vpop.permute.xlu1 %410  ;;  %v406_v45 = vpop.permute.xlu0 %405 }
  0xd5   : > { %v458_v48 = vmul.f32 %v4819_v33, %v411_v46  ;;  %v457_v47 = vmul.f32 %v4819_v33, %v406_v45  ;;  %938 = vperm.xlu1 %4228, %v4911_v56   ;;  %933 = vperm.xlu0 %4227, %v4914_v55  }
  0xd7   : > { %v4933_v49 = vadd.f32 %v4828_v60, %v458_v48  ;;  %v4936_v50 = vadd.f32 %v4828_v60, %v457_v47 }
  0xd8   : > { %v421_v44 = vpop.permute.xlu1 %420  ;;  %v416_v43 = vpop.permute.xlu0 %415 }
  0xd9   : > { %v460_v46 = vmul.f32 %v4819_v33, %v421_v44  ;;  %v459_v45 = vmul.f32 %v4819_v33, %v416_v43  ;;  %948 = vperm.xlu1 %4228, %v4927_v59   ;;  %943 = vperm.xlu0 %4227, %v4930_v63  }
  0xdb   : > { %v4943_v55 = vadd.f32 %v4828_v60, %v460_v46  ;;  %v4946_v56 = vadd.f32 %v4828_v60, %v459_v45 }
  0xdc   : > { %v4948_v48 = vpop.permute.xlu1 %534  ;;  %v4950_v47 = vpop.permute.xlu0 %529 }
  0xdd   : > { %1063 = vperm.xlu1 %4228, %v4482_v3   ;;  %1058 = vperm.xlu0 %4227, %v4477_v1  }
  0xe0   : > { %v4954_v44 = vpop.permute.xlu1 %544  ;;  %v4956_v43 = vpop.permute.xlu0 %539 }
  0xe1   : > { %1073 = vperm.xlu1 %4228, %v4487_v5   ;;  %1068 = vperm.xlu0 %4227, %v4490_v6  }
  0xe4   : > { %v4960_v33 = vpop.permute.xlu1 %554  ;;  %v4962_v60 = vpop.permute.xlu0 %549 }
  0xe5   : > { %1083 = vperm.xlu1 %4228, %v4495_v7   ;;  %1078 = vperm.xlu0 %4227, %v4498_v8  }
  0xe8   : > { %v4966_v46 = vpop.permute.xlu1 %564  ;;  %v4968_v3 = vpop.permute.xlu0 %559 }
  0xe9   : > { %1093 = vperm.xlu1 %4228, %v4503_v9   ;;  %1088 = vperm.xlu0 %4227, %v4506_v10  }
  0xec   : > { %v4972_v1 = vpop.permute.xlu1 %574  ;;  %v4974_v5 = vpop.permute.xlu0 %569 }
  0xed   : > { %1103 = vperm.xlu1 %4228, %v4511_v11   ;;  %1098 = vperm.xlu0 %4227, %v4514_v12   ;;  %v3668_v12 = vld [vmem:[%s6693_s1 + $0x1] ss:$0 sm:$0xff] }
  0xf0   : > { %v4978_v6 = vpop.permute.xlu1 %584  ;;  %v4980_v7 = vpop.permute.xlu0 %579 }
  0xf1   : > { %1113 = vperm.xlu1 %4228, %v4519_v13   ;;  %1108 = vperm.xlu0 %4227, %v4522_v14  }
  0xf4   : > { %v4984_v8 = vpop.permute.xlu1 %594  ;;  %v4986_v9 = vpop.permute.xlu0 %589 }
  0xf5   : > { %6820 = vst [vmem:[#allocation77_spill] sm:$0xff] %v4984_v8  ;;  %6821 = vst [vmem:[#allocation78_spill] sm:$0xff] %v4986_v9  ;;  %1123 = vperm.xlu1 %4228, %v4527_v15   ;;  %1118 = vperm.xlu0 %4227, %v4530_v16   ;;  %v6873_v8 = vld [vmem:[#allocation64_spill] sm:$0xff] }
  0xf8   : > { %v4990_v10 = vpop.permute.xlu1 %604  ;;  %v4992_v11 = vpop.permute.xlu0 %599 }
  0xf9   : > { %6822 = vst [vmem:[#allocation79_spill] sm:$0xff] %v4990_v10  ;;  %6823 = vst [vmem:[#allocation80_spill] sm:$0xff] %v4992_v11  ;;  %1133 = vperm.xlu1 %4228, %v4535_v17   ;;  %1128 = vperm.xlu0 %4227, %v4538_v18  }
  0xfc   : > { %v615_v13 = vpop.permute.xlu1 %614  ;;  %v610_v14 = vpop.permute.xlu0 %609 }
  0xfd   : > { %v710_v45 = vmul.f32 %v3668_v12, %v615_v13  ;;  %v709_v9 = vmul.f32 %v3668_v12, %v610_v14  ;;  %1143 = vperm.xlu1 %4228, %v4543_v19   ;;  %1138 = vperm.xlu0 %4227, %v4546_v20  }
  0xff   : > { %v5002_v15 = vadd.f32 %v710_v45, %v4837_v58  ;;  %v5005_v16 = vadd.f32 %v709_v9, %v4840_v34 }
 0x100   : > { %v625_v17 = vpop.permute.xlu1 %624  ;;  %v620_v18 = vpop.permute.xlu0 %619 }
 0x101   : > { %v712_v11 = vmul.f32 %v3668_v12, %v625_v17  ;;  %v711_v10 = vmul.f32 %v3668_v12, %v620_v18  ;;  %1153 = vperm.xlu1 %4228, %v4551_v21   ;;  %1148 = vperm.xlu0 %4227, %v4554_v22  }
 0x103   : > { %v5010_v13 = vadd.f32 %v712_v11, %v4853_v61  ;;  %v5013_v19 = vadd.f32 %v711_v10, %v4856_v62 }
 0x104   : > { %v635_v20 = vpop.permute.xlu1 %634  ;;  %v630_v58 = vpop.permute.xlu0 %629 }
 0x105   : > { %v714_v14 = vmul.f32 %v3668_v12, %v635_v20  ;;  %v713_v45 = vmul.f32 %v3668_v12, %v630_v58  ;;  %1163 = vperm.xlu1 %4228, %v4559_v23   ;;  %1158 = vperm.xlu0 %4227, %v4562_v24  }
 0x107   : > { %v5018_v34 = vadd.f32 %v714_v14, %v4869_v2  ;;  %v5021_v21 = vadd.f32 %v713_v45, %v4872_v57  ;;  %v3702_v14 = vld [vmem:[%s4474_s9 + $0x188] sm:$0xff]  ;;  %v3701_v45 = vld [vmem:[%s4474_s9 + $0x180] sm:$0xff] }
 0x108   : > { %v645_v22 = vpop.permute.xlu1 %644  ;;  %v640_v61 = vpop.permute.xlu0 %639 }
 0x109   : > { %v716_v9 = vmul.f32 %v3668_v12, %v645_v22  ;;  %v715_v11 = vmul.f32 %v3668_v12, %v640_v61  ;;  %1173 = vperm.xlu1 %4228, %v4567_v25   ;;  %1168 = vperm.xlu0 %4227, %v4570_v26  }
 0x10b   : > { %v5026_v62 = vadd.f32 %v716_v9, %v4885_v4  ;;  %v5029_v23 = vadd.f32 %v715_v11, %v4888_v0 }
 0x10c   : > { %v655_v24 = vpop.permute.xlu1 %654  ;;  %v650_v2 = vpop.permute.xlu0 %649 }
 0x10d   : > { %v718_v10 = vmul.f32 %v3668_v12, %v655_v24  ;;  %v717_v17 = vmul.f32 %v3668_v12, %v650_v2  ;;  %1183 = vperm.xlu1 %4228, %v4575_v27   ;;  %1178 = vperm.xlu0 %4227, %v4578_v28   ;;  %v6825_v24 = vld [vmem:[#allocation12_spill] sm:$0xff] }
 0x10f   : > { %v5034_v57 = vadd.f32 %v718_v10, %v4901_v53  ;;  %v5037_v25 = vadd.f32 %v717_v17, %v4904_v54  ;;  %v6827_v10 = vld [vmem:[#allocation14_spill] sm:$0xff] }
 0x110   : > { %v665_v26 = vpop.permute.xlu1 %664  ;;  %v660_v4 = vpop.permute.xlu0 %659 }
 0x111   : > { %v720_v0 = vmul.f32 %v3668_v12, %v665_v26  ;;  %v719_v18 = vmul.f32 %v3668_v12, %v660_v4  ;;  %1193 = vperm.xlu1 %4228, %v4583_v29   ;;  %1188 = vperm.xlu0 %4227, %v4586_v30   ;;  %v6831_v26 = vld [vmem:[#allocation16_spill] sm:$0xff] }
 0x113   : > { %v5042_v27 = vadd.f32 %v720_v0, %v4917_v51  ;;  %v5045_v28 = vadd.f32 %v719_v18, %v4920_v52  ;;  %v6834_v18 = vld [vmem:[#allocation17_spill] sm:$0xff] }
 0x114   : > { %v675_v53 = vpop.permute.xlu1 %674  ;;  %v670_v20 = vpop.permute.xlu0 %669 }
 0x115   : > { %v722_v58 = vmul.f32 %v3668_v12, %v675_v53  ;;  %v721_v54 = vmul.f32 %v3668_v12, %v670_v20  ;;  %1203 = vperm.xlu1 %4228, %v4591_v31   ;;  %1198 = vperm.xlu0 %4227, %v4594_v32   ;;  %v6835_v53 = vld [vmem:[#allocation18_spill] sm:$0xff]  ;;  %v3670_v20 = vld [vmem:[%s6693_s1 + $0x2] ss:$0 sm:$0xff] }
 0x117   : > { %v5052_v29 = vadd.f32 %v722_v58, %v4933_v49  ;;  %v5055_v30 = vadd.f32 %v721_v54, %v4936_v50 }
 0x118   : > { %v685_v51 = vpop.permute.xlu1 %684  ;;  %v680_v22 = vpop.permute.xlu0 %679 }
 0x119   : > { %v724_v52 = vmul.f32 %v3668_v12, %v685_v51  ;;  %v723_v61 = vmul.f32 %v3668_v12, %v680_v22  ;;  %1213 = vperm.xlu1 %4228, %v3702_v14   ;;  %1208 = vperm.xlu0 %4227, %v3701_v45   ;;  %v6836_v51 = vld [vmem:[#allocation19_spill] sm:$0xff]  ;;  %v6837_v22 = vld [vmem:[#allocation20_spill] sm:$0xff] }
 0x11b   : > { %v5058_v9 = vadd.f32 %v724_v52, %v4943_v55  ;;  %v5061_v31 = vadd.f32 %v723_v61, %v4946_v56 }
 0x11c   : > { %v5063_v32 = vpop.permute.xlu1 %798  ;;  %v5065_v11 = vpop.permute.xlu0 %793 }
 0x11d   : > { %1327 = vperm.xlu1 %4228, %v4601_v35   ;;  %1322 = vperm.xlu0 %4227, %v4604_v36  }
 0x120   : > { %v5069_v49 = vpop.permute.xlu1 %808  ;;  %v5071_v50 = vpop.permute.xlu0 %803 }
 0x121   : > { %1337 = vperm.xlu1 %4228, %v4609_v37   ;;  %1332 = vperm.xlu0 %4227, %v4612_v38   ;;  %v6824_v38 = vld [vmem:[#allocation11_spill] sm:$0xff] }
 0x124   : > { %v5075_v55 = vpop.permute.xlu1 %818  ;;  %v5077_v56 = vpop.permute.xlu0 %813 }
 0x125   : > { %1347 = vperm.xlu1 %4228, %v4617_v39   ;;  %1342 = vperm.xlu0 %4227, %v4620_v40   ;;  %v6826_v40 = vld [vmem:[#allocation13_spill] sm:$0xff] }
 0x128   : > { %v5081_v12 = vpop.permute.xlu1 %828  ;;  %v5083_v35 = vpop.permute.xlu0 %823 }
 0x129   : > { %1357 = vperm.xlu1 %4228, %v4625_v41   ;;  %1352 = vperm.xlu0 %4227, %v4628_v42   ;;  %v6830_v42 = vld [vmem:[#allocation15_spill] sm:$0xff] }
 0x12c   : > { %v5087_v36 = vpop.permute.xlu1 %838  ;;  %v5089_v37 = vpop.permute.xlu0 %833 }
 0x12d   : > { %1367 = vperm.xlu1 %4228, %v6824_v38   ;;  %1362 = vperm.xlu0 %4227, %v6825_v24  }
 0x130   : > { %v5093_v2 = vpop.permute.xlu1 %848  ;;  %v5095_v39 = vpop.permute.xlu0 %843 }
 0x131   : > { %1377 = vperm.xlu1 %4228, %v6826_v40   ;;  %1372 = vperm.xlu0 %4227, %v6827_v10  }
 0x134   : > { %v5099_v17 = vpop.permute.xlu1 %858  ;;  %v5101_v41 = vpop.permute.xlu0 %853 }
 0x135   : > { %6828 = vst [vmem:[#allocation11_spill] sm:$0xff] %v5099_v17  ;;  %6829 = vst [vmem:[#allocation12_spill] sm:$0xff] %v5101_v41  ;;  %1387 = vperm.xlu1 %4228, %v6830_v42   ;;  %1382 = vperm.xlu0 %4227, %v6831_v26   ;;  %v6838_v42 = vld [vmem:[#allocation21_spill] sm:$0xff]  ;;  %v6839_v26 = vld [vmem:[#allocation22_spill] sm:$0xff] }
 0x136   : > { %v6869_v41 = vld [vmem:[#allocation60_spill] sm:$0xff] }
 0x138   : > { %v5105_v4 = vpop.permute.xlu1 %868  ;;  %v5107_v0 = vpop.permute.xlu0 %863 }
 0x139   : > { %6832 = vst [vmem:[#allocation13_spill] sm:$0xff] %v5105_v4  ;;  %6833 = vst [vmem:[#allocation14_spill] sm:$0xff] %v5107_v0  ;;  %1397 = vperm.xlu1 %4228, %v6834_v18   ;;  %1392 = vperm.xlu0 %4227, %v6835_v53   ;;  %v6865_v0 = vld [vmem:[#allocation56_spill] sm:$0xff] }
 0x13c   : > { %v879_v58 = vpop.permute.xlu1 %878  ;;  %v874_v54 = vpop.permute.xlu0 %873 }
 0x13d   : > { %v974_v14 = vmul.f32 %v3670_v20, %v879_v58  ;;  %v973_v45 = vmul.f32 %v3670_v20, %v874_v54  ;;  %1407 = vperm.xlu1 %4228, %v6836_v51   ;;  %1402 = vperm.xlu0 %4227, %v6837_v22  }
 0x13f   : > { %v5117_v52 = vadd.f32 %v974_v14, %v5002_v15  ;;  %v5120_v61 = vadd.f32 %v973_v45, %v5005_v16  ;;  %v6840_v16 = vld [vmem:[#allocation23_spill] sm:$0xff]  ;;  %v6841_v45 = vld [vmem:[#allocation24_spill] sm:$0xff] }
 0x140   : > { %v889_v38 = vpop.permute.xlu1 %888  ;;  %v884_v24 = vpop.permute.xlu0 %883 }
 0x141   : > { %v976_v40 = vmul.f32 %v3670_v20, %v889_v38  ;;  %v975_v10 = vmul.f32 %v3670_v20, %v884_v24  ;;  %1417 = vperm.xlu1 %4228, %v6838_v42   ;;  %1412 = vperm.xlu0 %4227, %v6839_v26  }
 0x143   : > { %v5125_v18 = vadd.f32 %v976_v40, %v5010_v13  ;;  %v5128_v53 = vadd.f32 %v975_v10, %v5013_v19  ;;  %v6842_v19 = vld [vmem:[#allocation25_spill] sm:$0xff]  ;;  %v6843_v10 = vld [vmem:[#allocation26_spill] sm:$0xff] }
 0x144   : > { %v899_v58 = vpop.permute.xlu1 %898  ;;  %v894_v15 = vpop.permute.xlu0 %893 }
 0x145   : > { %v978_v54 = vmul.f32 %v3670_v20, %v899_v58  ;;  %v977_v14 = vmul.f32 %v3670_v20, %v894_v15  ;;  %1427 = vperm.xlu1 %4228, %v6840_v16   ;;  %1422 = vperm.xlu0 %4227, %v6841_v45  }
 0x147   : > { %v5133_v51 = vadd.f32 %v978_v54, %v5018_v34  ;;  %v5136_v22 = vadd.f32 %v977_v14, %v5021_v21  ;;  %v6844_v21 = vld [vmem:[#allocation27_spill] sm:$0xff]  ;;  %v6845_v14 = vld [vmem:[#allocation28_spill] sm:$0xff] }
 0x148   : > { %v909_v38 = vpop.permute.xlu1 %908  ;;  %v904_v13 = vpop.permute.xlu0 %903 }
 0x149   : > { %v980_v24 = vmul.f32 %v3670_v20, %v909_v38  ;;  %v979_v40 = vmul.f32 %v3670_v20, %v904_v13  ;;  %1437 = vperm.xlu1 %4228, %v6842_v19   ;;  %1432 = vperm.xlu0 %4227, %v6843_v10  }
 0x14b   : > { %v5141_v42 = vadd.f32 %v980_v24, %v5026_v62  ;;  %v5144_v26 = vadd.f32 %v979_v40, %v5029_v23  ;;  %v6846_v24 = vld [vmem:[#allocation29_spill] sm:$0xff]  ;;  %v6847_v40 = vld [vmem:[#allocation30_spill] sm:$0xff] }
 0x14c   : > { %v919_v58 = vpop.permute.xlu1 %918  ;;  %v914_v34 = vpop.permute.xlu0 %913 }
 0x14d   : > { %v982_v15 = vmul.f32 %v3670_v20, %v919_v58  ;;  %v981_v54 = vmul.f32 %v3670_v20, %v914_v34  ;;  %1447 = vperm.xlu1 %4228, %v6844_v21   ;;  %1442 = vperm.xlu0 %4227, %v6845_v14   ;;  %v3736_v21 = vld [vmem:[%s4474_s9 + $0x189] sm:$0xff]  ;;  %v3735_v14 = vld [vmem:[%s4474_s9 + $0x181] sm:$0xff] }
 0x14f   : > { %v5149_v16 = vadd.f32 %v982_v15, %v5034_v57  ;;  %v5152_v45 = vadd.f32 %v981_v54, %v5037_v25  ;;  %v6848_v15 = vld [vmem:[#allocation31_spill] sm:$0xff]  ;;  %v6849_v54 = vld [vmem:[#allocation32_spill] sm:$0xff] }
 0x150   : > { %v929_v62 = vpop.permute.xlu1 %928  ;;  %v924_v38 = vpop.permute.xlu0 %923 }
 0x151   : > { %v984_v23 = vmul.f32 %v3670_v20, %v929_v62  ;;  %v983_v13 = vmul.f32 %v3670_v20, %v924_v38  ;;  %1457 = vperm.xlu1 %4228, %v6846_v24   ;;  %1452 = vperm.xlu0 %4227, %v6847_v40  }
 0x153   : > { %v5157_v19 = vadd.f32 %v984_v23, %v5042_v27  ;;  %v5160_v10 = vadd.f32 %v983_v13, %v5045_v28 }
 0x154   : > { %v939_v57 = vpop.permute.xlu1 %938  ;;  %v934_v58 = vpop.permute.xlu0 %933 }
 0x155   : > { %v986_v34 = vmul.f32 %v3670_v20, %v939_v57  ;;  %v985_v25 = vmul.f32 %v3670_v20, %v934_v58  ;;  %1467 = vperm.xlu1 %4228, %v6848_v15   ;;  %1462 = vperm.xlu0 %4227, %v6849_v54   ;;  %v6853_v15 = vld [vmem:[#allocation40_spill] sm:$0xff]  ;;  %v6854_v54 = vld [vmem:[#allocation43_spill] sm:$0xff] }
 0x157   : > { %v5167_v62 = vadd.f32 %v986_v34, %v5052_v29  ;;  %v5170_v38 = vadd.f32 %v985_v25, %v5055_v30  ;;  %v6850_v29 = vld [vmem:[#allocation35_spill] sm:$0xff]  ;;  %v6851_v30 = vld [vmem:[#allocation36_spill] sm:$0xff] }
 0x158   : > { %v949_v27 = vpop.permute.xlu1 %948  ;;  %v944_v23 = vpop.permute.xlu0 %943 }
 0x159   : > { %v988_v28 = vmul.f32 %v3670_v20, %v949_v27  ;;  %v987_v13 = vmul.f32 %v3670_v20, %v944_v23  ;;  %1477 = vperm.xlu1 %4228, %v3736_v21   ;;  %1472 = vperm.xlu0 %4227, %v3735_v14   ;;  %v6852_v20 = vld [vmem:[#allocation39_spill] sm:$0xff]  ;;  %v6855_v21 = vld [vmem:[#allocation44_spill] sm:$0xff] }
 0x15a   : > { %v6856_v23 = vld [vmem:[#allocation47_spill] sm:$0xff] }
 0x15b   : > { %v5173_v24 = vadd.f32 %v988_v28, %v5058_v9  ;;  %v5176_v40 = vadd.f32 %v987_v13, %v5061_v31  ;;  %v6857_v28 = vld [vmem:[#allocation48_spill] sm:$0xff] }
 0x15c   : > { %v5178_v57 = vpop.permute.xlu1 %1063  ;;  %v5180_v58 = vpop.permute.xlu0 %1058 }
 0x15d   : > { %1591 = vperm.xlu1 %4228, %v6850_v29   ;;  %1586 = vperm.xlu0 %4227, %v6851_v30   ;;  %v6860_v30 = vld [vmem:[#allocation51_spill] sm:$0xff] }
 0x160   : > { %v5184_v34 = vpop.permute.xlu1 %1073  ;;  %v5186_v25 = vpop.permute.xlu0 %1068 }
 0x161   : > { %1601 = vperm.xlu1 %4228, %v6852_v20   ;;  %1596 = vperm.xlu0 %4227, %v6853_v15   ;;  %v6861_v20 = vld [vmem:[#allocation52_spill] sm:$0xff] }
 0x164   : > { %v5190_v9 = vpop.permute.xlu1 %1083  ;;  %v5192_v31 = vpop.permute.xlu0 %1078 }
 0x165   : > { %1611 = vperm.xlu1 %4228, %v6854_v54   ;;  %1606 = vperm.xlu0 %4227, %v6855_v21   ;;  %v6864_v21 = vld [vmem:[#allocation55_spill] sm:$0xff] }
 0x168   : > { %v5196_v14 = vpop.permute.xlu1 %1093  ;;  %v5198_v27 = vpop.permute.xlu0 %1088 }
 0x169   : > { %1621 = vperm.xlu1 %4228, %v6856_v23   ;;  %1616 = vperm.xlu0 %4227, %v6857_v28   ;;  %v6868_v28 = vld [vmem:[#allocation59_spill] sm:$0xff] }
 0x16c   : > { %v5202_v13 = vpop.permute.xlu1 %1103  ;;  %v5204_v29 = vpop.permute.xlu0 %1098 }
 0x16d   : > { %6858 = vst [vmem:[#allocation15_spill] sm:$0xff] %v5202_v13  ;;  %6859 = vst [vmem:[#allocation16_spill] sm:$0xff] %v5204_v29  ;;  %1631 = vperm.xlu1 %4228, %v6860_v30   ;;  %1626 = vperm.xlu0 %4227, %v6861_v20   ;;  %v6872_v20 = vld [vmem:[#allocation63_spill] sm:$0xff] }
 0x16e   : > { %v6876_v13 = vld [vmem:[#allocation67_spill] sm:$0xff] }
 0x170   : > { %v5208_v15 = vpop.permute.xlu1 %1113  ;;  %v5210_v54 = vpop.permute.xlu0 %1108 }
 0x171   : > { %6862 = vst [vmem:[#allocation17_spill] sm:$0xff] %v5208_v15  ;;  %6863 = vst [vmem:[#allocation18_spill] sm:$0xff] %v5210_v54  ;;  %1641 = vperm.xlu1 %4228, %v6864_v21   ;;  %1636 = vperm.xlu0 %4227, %v6865_v0   ;;  %v5229_v0 = vld [vmem:[%s6693_s1 + $0x3] ss:$0 sm:$0xff] }
 0x174   : > { %v5214_v4 = vpop.permute.xlu1 %1123  ;;  %v5216_v23 = vpop.permute.xlu0 %1118 }
 0x175   : > { %6866 = vst [vmem:[#allocation19_spill] sm:$0xff] %v5214_v4  ;;  %6867 = vst [vmem:[#allocation20_spill] sm:$0xff] %v5216_v23  ;;  %1651 = vperm.xlu1 %4228, %v6868_v28   ;;  %1646 = vperm.xlu0 %4227, %v6869_v41   ;;  %v6874_v41 = vld [vmem:[#allocation65_spill] sm:$0xff] }
 0x178   : > { %v5220_v17 = vpop.permute.xlu1 %1133  ;;  %v5222_v30 = vpop.permute.xlu0 %1128 }
 0x179   : > { %6870 = vst [vmem:[#allocation21_spill] sm:$0xff] %v5220_v17  ;;  %6871 = vst [vmem:[#allocation22_spill] sm:$0xff] %v5222_v30  ;;  %1661 = vperm.xlu1 %4228, %v6872_v20   ;;  %1656 = vperm.xlu0 %4227, %v6873_v8   ;;  %v6875_v17 = vld [vmem:[#allocation66_spill] sm:$0xff] }
 0x17c   : > { %v1144_v21 = vpop.permute.xlu1 %1143  ;;  %v1139_v4 = vpop.permute.xlu0 %1138 }
 0x17d   : > { %v1239_v23 = vmul.f32 %v5229_v0, %v1144_v21  ;;  %v1238_v28 = vmul.f32 %v5229_v0, %v1139_v4  ;;  %1671 = vperm.xlu1 %4228, %v6874_v41   ;;  %1666 = vperm.xlu0 %4227, %v6875_v17   ;;  %v6877_v21 = vld [vmem:[#allocation68_spill] sm:$0xff]  ;;  %v6878_v41 = vld [vmem:[#allocation69_spill] sm:$0xff] }
 0x17f   : > { %v5236_v30 = vadd.f32 %v1239_v23, %v5117_v52  ;;  %v5239_v8 = vadd.f32 %v1238_v28, %v5120_v61 }
 0x180   : > { %v1154_v20 = vpop.permute.xlu1 %1153  ;;  %v1149_v54 = vpop.permute.xlu0 %1148 }
 0x181   : > { %v1241_v15 = vmul.f32 %v5229_v0, %v1154_v20  ;;  %v1240_v29 = vmul.f32 %v5229_v0, %v1149_v54  ;;  %1681 = vperm.xlu1 %4228, %v6876_v13   ;;  %1676 = vperm.xlu0 %4227, %v6877_v21   ;;  %v6879_v20 = vld [vmem:[#allocation70_spill] sm:$0xff]  ;;  %v6880_v21 = vld [vmem:[#allocation71_spill] sm:$0xff] }
 0x183   : > { %v5246_v4 = vadd.f32 %v1241_v15, %v5125_v18  ;;  %v5249_v17 = vadd.f32 %v1240_v29, %v5128_v53 }
 0x184   : > { %v1164_v52 = vpop.permute.xlu1 %1163  ;;  %v1159_v23 = vpop.permute.xlu0 %1158 }
 0x185   : > { %v1243_v61 = vmul.f32 %v5229_v0, %v1164_v52  ;;  %v1242_v28 = vmul.f32 %v5229_v0, %v1159_v23  ;;  %1691 = vperm.xlu1 %4228, %v6878_v41   ;;  %1686 = vperm.xlu0 %4227, %v6879_v20   ;;  %v6881_v52 = vld [vmem:[#allocation72_spill] sm:$0xff]  ;;  %v6882_v20 = vld [vmem:[#allocation73_spill] sm:$0xff] }
 0x187   : > { %v5256_v13 = vadd.f32 %v1243_v61, %v5133_v51  ;;  %v5259_v54 = vadd.f32 %v1242_v28, %v5136_v22 }
 0x188   : > { %v1174_v18 = vpop.permute.xlu1 %1173  ;;  %v1169_v15 = vpop.permute.xlu0 %1168 }
 0x189   : > { %v1245_v53 = vmul.f32 %v5229_v0, %v1174_v18  ;;  %v1244_v29 = vmul.f32 %v5229_v0, %v1169_v15  ;;  %1701 = vperm.xlu1 %4228, %v6880_v21   ;;  %1696 = vperm.xlu0 %4227, %v6881_v52   ;;  %v6883_v18 = vld [vmem:[#allocation74_spill] sm:$0xff]  ;;  %v6884_v52 = vld [vmem:[#allocation75_spill] sm:$0xff] }
 0x18b   : > { %v5266_v23 = vadd.f32 %v1245_v53, %v5141_v42  ;;  %v5269_v41 = vadd.f32 %v1244_v29, %v5144_v26 }
 0x18c   : > { %v1184_v51 = vpop.permute.xlu1 %1183  ;;  %v1179_v61 = vpop.permute.xlu0 %1178 }
 0x18d   : > { %v1247_v22 = vmul.f32 %v5229_v0, %v1184_v51  ;;  %v1246_v28 = vmul.f32 %v5229_v0, %v1179_v61  ;;  %1711 = vperm.xlu1 %4228, %v6882_v20   ;;  %1706 = vperm.xlu0 %4227, %v6883_v18   ;;  %v6885_v51 = vld [vmem:[#allocation76_spill] sm:$0xff]  ;;  %v3770_v18 = vld [vmem:[%s4474_s9 + $0x18a] sm:$0xff] }
 0x18f   : > { %v5276_v15 = vadd.f32 %v1247_v22, %v5149_v16  ;;  %v5279_v42 = vadd.f32 %v1246_v28, %v5152_v45 }
 0x190   : > { %v1194_v26 = vpop.permute.xlu1 %1193  ;;  %v1189_v53 = vpop.permute.xlu0 %1188 }
 0x191   : > { %v1249_v29 = vmul.f32 %v5229_v0, %v1194_v26  ;;  %v1248_v21 = vmul.f32 %v5229_v0, %v1189_v53  ;;  %1721 = vperm.xlu1 %4228, %v6884_v52   ;;  %1716 = vperm.xlu0 %4227, %v6885_v51   ;;  %v3769_v26 = vld [vmem:[%s4474_s9 + $0x182] sm:$0xff] }
 0x193   : > { %v5286_v61 = vadd.f32 %v1249_v29, %v5157_v19  ;;  %v5289_v16 = vadd.f32 %v1248_v21, %v5160_v10 }
 0x194   : > { %v1204_v22 = vpop.permute.xlu1 %1203  ;;  %v1199_v45 = vpop.permute.xlu0 %1198 }
 0x195   : > { %v1251_v28 = vmul.f32 %v5229_v0, %v1204_v22  ;;  %v1250_v20 = vmul.f32 %v5229_v0, %v1199_v45  ;;  %1731 = vperm.xlu1 %4228, %v4927_v59   ;;  %1726 = vperm.xlu0 %4227, %v4930_v63   ;;  %v3774_v59 = vld [vmem:[%s4474_s9 + $0x38] sm:$0xff]  ;;  %v3773_v63 = vld [vmem:[%s4474_s9 + $0x30] sm:$0xff] }
 0x196   : > { %v3776_v45 = vld [vmem:[%s4474_s9 + $0x50] sm:$0xff] }
 0x197   : > { %v5298_v19 = vadd.f32 %v1251_v28, %v5167_v62  ;;  %v5301_v10 = vadd.f32 %v1250_v20, %v5170_v38  ;;  %v3775_v28 = vld [vmem:[%s4474_s9 + $0x48] sm:$0xff] }
 0x198   : > { %v1214_v53 = vpop.permute.xlu1 %1213  ;;  %v1209_v29 = vpop.permute.xlu0 %1208 }
 0x199   : > { %v1253_v21 = vmul.f32 %v5229_v0, %v1214_v53  ;;  %v1252_v52 = vmul.f32 %v5229_v0, %v1209_v29  ;;  %1741 = vperm.xlu1 %4228, %v3770_v18   ;;  %1736 = vperm.xlu0 %4227, %v3769_v26   ;;  %v3780_v29 = vld [vmem:[%s4474_s9 + $0x80] sm:$0xff] }
 0x19b   : > { %v5308_v62 = vadd.f32 %v1253_v21, %v5173_v24  ;;  %v5311_v51 = vadd.f32 %v1252_v52, %v5176_v40  ;;  %v3778_v24 = vld [vmem:[%s4474_s9 + $0x68] sm:$0xff]  ;;  %v3777_v40 = vld [vmem:[%s4474_s9 + $0x60] sm:$0xff]  ;;  %v3779_v21 = vld [vmem:[%s4474_s9 + $0x78] sm:$0xff] }
 0x19c   : > { %v5313_v38 = vpop.permute.xlu1 %1327  ;;  %v5315_v22 = vpop.permute.xlu0 %1322 }
 0x19d   : > { %6886 = vst [vmem:[#allocation23_spill] sm:$0xff] %v5315_v22  ;;  %1856 = vperm.xlu1 %4228, %v3774_v59   ;;  %1851 = vperm.xlu0 %4227, %v3773_v63   ;;  %v3808_v63 = vld [vmem:[%s4474_s9 + $0x39] sm:$0xff] }
 0x1a0   : > { %v5319_v20 = vpop.permute.xlu1 %1337  ;;  %v5321_v18 = vpop.permute.xlu0 %1332 }
 0x1a1   : > { %6887 = vst [vmem:[#allocation24_spill] sm:$0xff] %v5319_v20  ;;  %6888 = vst [vmem:[#allocation25_spill] sm:$0xff] %v5321_v18  ;;  %1866 = vperm.xlu1 %4228, %v3776_v45   ;;  %1861 = vperm.xlu0 %4227, %v3775_v28   ;;  %v3807_v45 = vld [vmem:[%s4474_s9 + $0x31] sm:$0xff] }
 0x1a4   : > { %v5325_v26 = vpop.permute.xlu1 %1347  ;;  %v5327_v53 = vpop.permute.xlu0 %1342 }
 0x1a5   : > { %6889 = vst [vmem:[#allocation26_spill] sm:$0xff] %v5325_v26  ;;  %6890 = vst [vmem:[#allocation27_spill] sm:$0xff] %v5327_v53  ;;  %1876 = vperm.xlu1 %4228, %v3778_v24   ;;  %1871 = vperm.xlu0 %4227, %v3777_v40   ;;  %v3810_v24 = vld [vmem:[%s4474_s9 + $0x51] sm:$0xff]  ;;  %v3809_v40 = vld [vmem:[%s4474_s9 + $0x49] sm:$0xff] }
 0x1a8   : > { %v5331_v52 = vpop.permute.xlu1 %1357  ;;  %v5333_v59 = vpop.permute.xlu0 %1352 }
 0x1a9   : > { %6891 = vst [vmem:[#allocation28_spill] sm:$0xff] %v5331_v52  ;;  %6892 = vst [vmem:[#allocation29_spill] sm:$0xff] %v5333_v59  ;;  %1886 = vperm.xlu1 %4228, %v3780_v29   ;;  %1881 = vperm.xlu0 %4227, %v3779_v21   ;;  %v3812_v29 = vld [vmem:[%s4474_s9 + $0x69] sm:$0xff]  ;;  %v3811_v21 = vld [vmem:[%s4474_s9 + $0x61] sm:$0xff] }
 0x1ac   : > { %v5337_v28 = vpop.permute.xlu1 %1367  ;;  %v5339_v26 = vpop.permute.xlu0 %1362 }
 0x1ad   : > { %6893 = vst [vmem:[#allocation30_spill] sm:$0xff] %v5337_v28  ;;  %6894 = vst [vmem:[#allocation31_spill] sm:$0xff] %v5339_v26  ;;  %2120 = vperm.xlu1 %4228, %v3808_v63   ;;  %2115 = vperm.xlu0 %4227, %v3807_v45   ;;  %v3814_v63 = vld [vmem:[%s4474_s9 + $0x81] sm:$0xff]  ;;  %v3813_v45 = vld [vmem:[%s4474_s9 + $0x79] sm:$0xff] }
 0x1b0   : > { %v5343_v53 = vpop.permute.xlu1 %1377  ;;  %v5345_v52 = vpop.permute.xlu0 %1372 }
 0x1b1   : > { %6895 = vst [vmem:[#allocation32_spill] sm:$0xff] %v5343_v53  ;;  %6896 = vst [vmem:[#allocation35_spill] sm:$0xff] %v5345_v52  ;;  %2130 = vperm.xlu1 %4228, %v3810_v24   ;;  %2125 = vperm.xlu0 %4227, %v3809_v40   ;;  %v3782_v24 = vld [vmem:[%s4474_s9 + $0x98] sm:$0xff]  ;;  %v3781_v40 = vld [vmem:[%s4474_s9 + $0x90] sm:$0xff] }
 0x1b4   : > { %v5349_v59 = vpop.permute.xlu1 %1387  ;;  %v5351_v28 = vpop.permute.xlu0 %1382 }
 0x1b5   : > { %6897 = vst [vmem:[#allocation36_spill] sm:$0xff] %v5349_v59  ;;  %6898 = vst [vmem:[#allocation39_spill] sm:$0xff] %v5351_v28  ;;  %2140 = vperm.xlu1 %4228, %v3812_v29   ;;  %2135 = vperm.xlu0 %4227, %v3811_v21   ;;  %v5364_v59 = vld [vmem:[%s6693_s1 + $0x4] ss:$0 sm:$0xff] }
 0x1b6   : > { %6901 = vst [vmem:[#allocation44_spill] sm:$0xff] %v5364_v59 }
 0x1b8   : > { %v5355_v26 = vpop.permute.xlu1 %1397  ;;  %v5357_v53 = vpop.permute.xlu0 %1392 }
 0x1b9   : > { %6899 = vst [vmem:[#allocation40_spill] sm:$0xff] %v5355_v26  ;;  %6900 = vst [vmem:[#allocation43_spill] sm:$0xff] %v5357_v53  ;;  %2150 = vperm.xlu1 %4228, %v3814_v63   ;;  %2145 = vperm.xlu0 %4227, %v3813_v45   ;;  %v3784_v53 = vld [vmem:[%s4474_s9 + $0xb0] sm:$0xff]  ;;  %v3783_v63 = vld [vmem:[%s4474_s9 + $0xa8] sm:$0xff] }
 0x1bc   : > { %v1408_v28 = vpop.permute.xlu1 %1407  ;;  %v1403_v29 = vpop.permute.xlu0 %1402 }
 0x1bd   : > { %v1503_v21 = vmul.f32 %v5364_v59, %v1408_v28  ;;  %v1502_v52 = vmul.f32 %v5364_v59, %v1403_v29  ;;  %1896 = vperm.xlu1 %4228, %v3782_v24   ;;  %1891 = vperm.xlu0 %4227, %v3781_v40   ;;  %v3842_v24 = vld [vmem:[%s4474_s9 + $0x3a] sm:$0xff]  ;;  %v3841_v40 = vld [vmem:[%s4474_s9 + $0x32] sm:$0xff] }
 0x1bf   : > { %v5371_v45 = vadd.f32 %v1503_v21, %v5236_v30  ;;  %v5374_v26 = vadd.f32 %v1502_v52, %v5239_v8 }
 0x1c0   : > { %v1418_v18 = vpop.permute.xlu1 %1417  ;;  %v1413_v20 = vpop.permute.xlu0 %1412 }
 0x1c1   : > { %v1505_v22 = vmul.f32 %v5364_v59, %v1418_v18  ;;  %v1504_v28 = vmul.f32 %v5364_v59, %v1413_v20  ;;  %1906 = vperm.xlu1 %4228, %v3784_v53   ;;  %1901 = vperm.xlu0 %4227, %v3783_v63   ;;  %v3844_v20 = vld [vmem:[%s4474_s9 + $0x52] sm:$0xff]  ;;  %v3843_v53 = vld [vmem:[%s4474_s9 + $0x4a] sm:$0xff] }
 0x1c3   : > { %v5381_v29 = vadd.f32 %v1505_v22, %v5246_v4  ;;  %v5384_v30 = vadd.f32 %v1504_v28, %v5249_v17 }
 0x1c4   : > { %v1428_v8 = vpop.permute.xlu1 %1427  ;;  %v1423_v52 = vpop.permute.xlu0 %1422 }
 0x1c5   : > { %v1507_v21 = vmul.f32 %v5364_v59, %v1428_v8  ;;  %v1506_v18 = vmul.f32 %v5364_v59, %v1423_v52  ;;  %2384 = vperm.xlu1 %4228, %v3842_v24   ;;  %2379 = vperm.xlu0 %4227, %v3841_v40   ;;  %v3846_v24 = vld [vmem:[%s4474_s9 + $0x6a] sm:$0xff]  ;;  %v3845_v40 = vld [vmem:[%s4474_s9 + $0x62] sm:$0xff] }
 0x1c7   : > { %v5391_v63 = vadd.f32 %v1507_v21, %v5256_v13  ;;  %v5394_v4 = vadd.f32 %v1506_v18, %v5259_v54 }
 0x1c8   : > { %v1438_v17 = vpop.permute.xlu1 %1437  ;;  %v1433_v22 = vpop.permute.xlu0 %1432 }
 0x1c9   : > { %v1509_v28 = vmul.f32 %v5364_v59, %v1438_v17  ;;  %v1508_v8 = vmul.f32 %v5364_v59, %v1433_v22  ;;  %2394 = vperm.xlu1 %4228, %v3844_v20   ;;  %2389 = vperm.xlu0 %4227, %v3843_v53   ;;  %v3848_v20 = vld [vmem:[%s4474_s9 + $0x82] sm:$0xff]  ;;  %v3847_v53 = vld [vmem:[%s4474_s9 + $0x7a] sm:$0xff] }
 0x1cb   : > { %v5401_v52 = vadd.f32 %v1509_v28, %v5266_v23  ;;  %v5404_v13 = vadd.f32 %v1508_v8, %v5269_v41 }
 0x1cc   : > { %v1448_v54 = vpop.permute.xlu1 %1447  ;;  %v1443_v21 = vpop.permute.xlu0 %1442 }
 0x1cd   : > { %v1511_v18 = vmul.f32 %v5364_v59, %v1448_v54  ;;  %v1510_v17 = vmul.f32 %v5364_v59, %v1443_v21  ;;  %2404 = vperm.xlu1 %4228, %v3846_v24   ;;  %2399 = vperm.xlu0 %4227, %v3845_v40   ;;  %v3816_v24 = vld [vmem:[%s4474_s9 + $0x99] sm:$0xff]  ;;  %v3815_v40 = vld [vmem:[%s4474_s9 + $0x91] sm:$0xff] }
 0x1cf   : > { %v5411_v22 = vadd.f32 %v1511_v18, %v5276_v15  ;;  %v5414_v23 = vadd.f32 %v1510_v17, %v5279_v42 }
 0x1d0   : > { %v1458_v41 = vpop.permute.xlu1 %1457  ;;  %v1453_v28 = vpop.permute.xlu0 %1452 }
 0x1d1   : > { %v1513_v8 = vmul.f32 %v5364_v59, %v1458_v41  ;;  %v1512_v54 = vmul.f32 %v5364_v59, %v1453_v28  ;;  %2414 = vperm.xlu1 %4228, %v3848_v20   ;;  %2409 = vperm.xlu0 %4227, %v3847_v53   ;;  %v3818_v20 = vld [vmem:[%s4474_s9 + $0xb1] sm:$0xff]  ;;  %v3817_v53 = vld [vmem:[%s4474_s9 + $0xa9] sm:$0xff] }
 0x1d3   : > { %v5421_v21 = vadd.f32 %v1513_v8, %v5286_v61  ;;  %v5424_v15 = vadd.f32 %v1512_v54, %v5289_v16 }
 0x1d4   : > { %v1468_v42 = vpop.permute.xlu1 %1467  ;;  %v1463_v18 = vpop.permute.xlu0 %1462 }
 0x1d5   : > { %v1515_v17 = vmul.f32 %v5364_v59, %v1468_v42  ;;  %v1514_v41 = vmul.f32 %v5364_v59, %v1463_v18  ;;  %2160 = vperm.xlu1 %4228, %v3816_v24   ;;  %2155 = vperm.xlu0 %4227, %v3815_v40   ;;  %v3786_v24 = vld [vmem:[%s4474_s9 + $0xc8] sm:$0xff]  ;;  %v3785_v40 = vld [vmem:[%s4474_s9 + $0xc0] sm:$0xff] }
 0x1d7   : > { %v5431_v28 = vadd.f32 %v1515_v17, %v5298_v19  ;;  %v5434_v61 = vadd.f32 %v1514_v41, %v5301_v10  ;;  %v3788_v41 = vld [vmem:[%s4474_s9 + $0xe0] sm:$0xff] }
 0x1d8   : > { %v1478_v16 = vpop.permute.xlu1 %1477  ;;  %v1473_v8 = vpop.permute.xlu0 %1472 }
 0x1d9   : > { %v1517_v54 = vmul.f32 %v5364_v59, %v1478_v16  ;;  %v1516_v42 = vmul.f32 %v5364_v59, %v1473_v8  ;;  %2170 = vperm.xlu1 %4228, %v3818_v20   ;;  %2165 = vperm.xlu0 %4227, %v3817_v53   ;;  %v3787_v16 = vld [vmem:[%s4474_s9 + $0xd8] sm:$0xff] }
 0x1da   : > { %v3849_v8 = vld [vmem:[%s4474_s9 + $0x92] sm:$0xff] }
 0x1db   : > { %v5441_v19 = vadd.f32 %v1517_v54, %v5308_v62  ;;  %v5444_v18 = vadd.f32 %v1516_v42, %v5311_v51  ;;  %v3850_v62 = vld [vmem:[%s4474_s9 + $0x9a] sm:$0xff]  ;;  %v4386_v54 = vmov 0.0  }
 0x1dc   : > { %v5446_v10 = vpop.permute.xlu1 %1591  ;;  %v5448_v17 = vpop.permute.xlu0 %1586  ;;  %2777 = vst.msk [vmem:[#allocation4 + $0x8] sm:$0xff] %vm2639_vm0, %v4386_v54  ;;  %2781 = vst.msk [vmem:[#allocation4 + $0x20] sm:$0xff] %vm2639_vm0, %v4386_v54 }
 0x1dd   : > { %6902 = vst [vmem:[#allocation47_spill] sm:$0xff] %v5446_v10  ;;  %6903 = vst [vmem:[#allocation48_spill] sm:$0xff] %v5448_v17  ;;  %1916 = vperm.xlu1 %4228, %v3786_v24   ;;  %1911 = vperm.xlu0 %4227, %v3785_v40   ;;  %v3852_v24 = vld [vmem:[%s4474_s9 + $0xb2] sm:$0xff]  ;;  %v3851_v40 = vld [vmem:[%s4474_s9 + $0xaa] sm:$0xff] }
 0x1de   : > { %2776 = vst.msk [vmem:[#allocation4] sm:$0xff] %vm2639_vm0, %v4386_v54  ;;  %2780 = vst.msk [vmem:[#allocation4 + $0x18] sm:$0xff] %vm2639_vm0, %v4386_v54 }
 0x1df   : > { %2783 = vst.msk [vmem:[#allocation4 + $0x30] sm:$0xff] %vm2639_vm0, %v4386_v54  ;;  %2784 = vst.msk [vmem:[#allocation4 + $0x38] sm:$0xff] %vm2639_vm0, %v4386_v54 }
 0x1e0   : > { %v5452_v20 = vpop.permute.xlu1 %1601  ;;  %v5454_v53 = vpop.permute.xlu0 %1596  ;;  %2786 = vst.msk [vmem:[#allocation4 + $0x48] sm:$0xff] %vm2639_vm0, %v4386_v54  ;;  %2787 = vst.msk [vmem:[#allocation4 + $0x50] sm:$0xff] %vm2639_vm0, %v4386_v54 }
 0x1e1   : > { %6904 = vst [vmem:[#allocation51_spill] sm:$0xff] %v5452_v20  ;;  %6905 = vst [vmem:[#allocation52_spill] sm:$0xff] %v5454_v53  ;;  %1926 = vperm.xlu1 %4228, %v3788_v41   ;;  %1921 = vperm.xlu0 %4227, %v3787_v16   ;;  %v3820_v53 = vld [vmem:[%s4474_s9 + $0xc9] sm:$0xff] }
 0x1e2   : > { %2789 = vst.msk [vmem:[#allocation4 + $0x60] sm:$0xff] %vm2639_vm0, %v4386_v54  ;;  %2790 = vst.msk [vmem:[#allocation4 + $0x68] sm:$0xff] %vm2639_vm0, %v4386_v54 }
 0x1e3   : > { %2792 = vst.msk [vmem:[#allocation4 + $0x78] sm:$0xff] %vm2639_vm0, %v4386_v54  ;;  %2793 = vst.msk [vmem:[#allocation4 + $0x80] sm:$0xff] %vm2639_vm0, %v4386_v54 }
 0x1e4   : > { %2795 = vst.msk [vmem:[#allocation4 + $0x90] sm:$0xff] %vm2639_vm0, %v4386_v54  ;;  %2796 = vst.msk [vmem:[#allocation4 + $0x98] sm:$0xff] %vm2639_vm0, %v4386_v54  ;;  %v5488_v51 = vpop.permute.xlu1 %1611  ;;  %v5490_v42 = vpop.permute.xlu0 %1606 }
 0x1e5   : > { %2798 = vst.msk [vmem:[#allocation4 + $0xa8] sm:$0xff] %vm2639_vm0, %v4386_v54  ;;  %2799 = vst.msk [vmem:[#allocation4 + $0xb0] sm:$0xff] %vm2639_vm0, %v4386_v54  ;;  %2424 = vperm.xlu1 %4228, %v3850_v62   ;;  %2419 = vperm.xlu0 %4227, %v3849_v8   ;;  %v3822_v62 = vld [vmem:[%s4474_s9 + $0xe1] sm:$0xff]  ;;  %v3821_v8 = vld [vmem:[%s4474_s9 + $0xd9] sm:$0xff] }
 0x1e6   : > { %2801 = vst.msk [vmem:[#allocation4 + $0xc0] sm:$0xff] %vm2639_vm0, %v4386_v54  ;;  %2802 = vst.msk [vmem:[#allocation4 + $0xc8] sm:$0xff] %vm2639_vm0, %v4386_v54 }
 0x1e7   : > { %2804 = vst.msk [vmem:[#allocation4 + $0xd8] sm:$0xff] %vm2639_vm0, %v4386_v54  ;;  %2805 = vst.msk [vmem:[#allocation4 + $0xe0] sm:$0xff] %vm2639_vm0, %v4386_v54 }
 0x1e8   : > { %2782 = vst.msk [vmem:[#allocation4 + $0x28] sm:$0x1] %vm2778_vm1, %v4386_v54  ;;  %2779 = vst.msk [vmem:[#allocation4 + $0x10] sm:$0x1] %vm2778_vm1, %v4386_v54  ;;  %v5494_v41 = vpop.permute.xlu1 %1621  ;;  %v5496_v16 = vpop.permute.xlu0 %1616 }
 0x1e9   : > { %2785 = vst.msk [vmem:[#allocation4 + $0x40] sm:$0x1] %vm2778_vm1, %v4386_v54  ;;  %2788 = vst.msk [vmem:[#allocation4 + $0x58] sm:$0x1] %vm2778_vm1, %v4386_v54  ;;  %2434 = vperm.xlu1 %4228, %v3852_v24   ;;  %2429 = vperm.xlu0 %4227, %v3851_v40   ;;  %v3790_v24 = vld [vmem:[%s4474_s9 + $0xf8] sm:$0xff]  ;;  %v3789_v40 = vld [vmem:[%s4474_s9 + $0xf0] sm:$0xff] }
 0x1ea   : > { %2791 = vst.msk [vmem:[#allocation4 + $0x70] sm:$0x1] %vm2778_vm1, %v4386_v54  ;;  %2794 = vst.msk [vmem:[#allocation4 + $0x88] sm:$0x1] %vm2778_vm1, %v4386_v54 }
 0x1eb   : > { %2797 = vst.msk [vmem:[#allocation4 + $0xa0] sm:$0x1] %vm2778_vm1, %v4386_v54  ;;  %2800 = vst.msk [vmem:[#allocation4 + $0xb8] sm:$0x1] %vm2778_vm1, %v4386_v54 }
 0x1ec   : > { %2803 = vst.msk [vmem:[#allocation4 + $0xd0] sm:$0x1] %vm2778_vm1, %v4386_v54  ;;  %2806 = vst.msk [vmem:[#allocation4 + $0xe8] sm:$0x1] %vm2778_vm1, %v4386_v54  ;;  %v3819_v54 = vld [vmem:[%s4474_s9 + $0xc1] sm:$0xff]  ;;  %v5500_v20 = vpop.permute.xlu1 %1631 }
 0x1ed   : > { %6906 = vst [vmem:[#allocation55_spill] sm:$0xff] %v5488_v51  ;;  %6907 = vst [vmem:[#allocation56_spill] sm:$0xff] %v5490_v42  ;;  %v5502_v51 = vpop.permute.xlu0 %1626  ;;  %2180 = vperm.xlu1 %4228, %v3820_v53   ;;  %2175 = vperm.xlu0 %4227, %v3819_v54   ;;  %v3792_v53 = vld [vmem:[%s4474_s9 + $0x110] sm:$0xff]  ;;  %v3791_v54 = vld [vmem:[%s4474_s9 + $0x108] sm:$0xff] }
 0x1ee   : > { %6908 = vst [vmem:[#allocation59_spill] sm:$0xff] %v5494_v41  ;;  %6909 = vst [vmem:[#allocation60_spill] sm:$0xff] %v5496_v16 }
 0x1ef   : > { %6910 = vst [vmem:[#allocation63_spill] sm:$0xff] %v5500_v20  ;;  %6911 = vst [vmem:[#allocation64_spill] sm:$0xff] %v5502_v51 }
 0x1f0   : > { %v5506_v42 = vpop.permute.xlu1 %1641 }
 0x1f1   : > { %6912 = vst [vmem:[#allocation65_spill] sm:$0xff] %v5506_v42  ;;  %v5508_v41 = vpop.permute.xlu0 %1636  ;;  %2190 = vperm.xlu1 %4228, %v3822_v62   ;;  %2185 = vperm.xlu0 %4227, %v3821_v8   ;;  %v3854_v62 = vld [vmem:[%s4474_s9 + $0xca] sm:$0xff]  ;;  %v3853_v8 = vld [vmem:[%s4474_s9 + $0xc2] sm:$0xff] }
 0x1f2   : > { %6913 = vst [vmem:[#allocation66_spill] sm:$0xff] %v5508_v41 }
 0x1f4   : > { %v5512_v16 = vpop.permute.xlu1 %1651 }
 0x1f5   : > { %6914 = vst [vmem:[#allocation67_spill] sm:$0xff] %v5512_v16  ;;  %v5514_v20 = vpop.permute.xlu0 %1646  ;;  %1936 = vperm.xlu1 %4228, %v3790_v24   ;;  %1931 = vperm.xlu0 %4227, %v3789_v40   ;;  %v5527_v16 = vld [vmem:[%s6693_s1 + $0x5] ss:$0 sm:$0xff] }
 0x1f6   : > { %6915 = vst [vmem:[#allocation68_spill] sm:$0xff] %v5514_v20 }
 0x1f8   : > { %v5518_v51 = vpop.permute.xlu1 %1661 }
 0x1f9   : > { %6916 = vst [vmem:[#allocation69_spill] sm:$0xff] %v5518_v51  ;;  %v5520_v42 = vpop.permute.xlu0 %1656  ;;  %1946 = vperm.xlu1 %4228, %v3792_v53   ;;  %1941 = vperm.xlu0 %4227, %v3791_v54   ;;  %v3855_v53 = vld [vmem:[%s4474_s9 + $0xda] sm:$0xff] }
 0x1fa   : > { %6917 = vst [vmem:[#allocation70_spill] sm:$0xff] %v5520_v42  ;;  %v3856_v42 = vld [vmem:[%s4474_s9 + $0xe2] sm:$0xff] }
 0x1fc   : > { %v1672_v20 = vpop.permute.xlu1 %1671 }
 0x1fd   : > { %v1667_v24 = vpop.permute.xlu0 %1666  ;;  %v1767_v40 = vmul.f32 %v5527_v16, %v1672_v20  ;;  %2444 = vperm.xlu1 %4228, %v3854_v62   ;;  %2439 = vperm.xlu0 %4227, %v3853_v8   ;;  %v3824_v62 = vld [vmem:[%s4474_s9 + $0xf9] sm:$0xff]  ;;  %v3823_v8 = vld [vmem:[%s4474_s9 + $0xf1] sm:$0xff] }
 0x1fe   : > { %v1766_v41 = vmul.f32 %v5527_v16, %v1667_v24 }
 0x1ff   : > { %v5534_v54 = vadd.f32 %v1767_v40, %v5371_v45 }
 0x200   : > { %v5537_v51 = vadd.f32 %v1766_v41, %v5374_v26  ;;  %v1682_v17 = vpop.permute.xlu1 %1681 }
 0x201   : > { %6918 = vst [vmem:[#allocation71_spill] sm:$0xff] %v5534_v54  ;;  %v1677_v10 = vpop.permute.xlu0 %1676  ;;  %v1769_v59 = vmul.f32 %v5527_v16, %v1682_v17  ;;  %2454 = vperm.xlu1 %4228, %v3856_v42   ;;  %2449 = vperm.xlu0 %4227, %v3855_v53   ;;  %v3825_v42 = vld [vmem:[%s4474_s9 + $0x109] sm:$0xff] }
 0x202   : > { %6919 = vst [vmem:[#allocation72_spill] sm:$0xff] %v5537_v51  ;;  %v1768_v20 = vmul.f32 %v5527_v16, %v1677_v10  ;;  %v3826_v10 = vld [vmem:[%s4474_s9 + $0x111] sm:$0xff]  ;;  %v6950_v51 = vld [vmem:[#allocation54_spill] sm:$0xff] }
 0x203   : > { %v5544_v24 = vadd.f32 %v1769_v59, %v5381_v29 }
 0x204   : > { %v5547_v45 = vadd.f32 %v1768_v20, %v5384_v30  ;;  %v1692_v26 = vpop.permute.xlu1 %1691 }
 0x205   : > { %6920 = vst [vmem:[#allocation73_spill] sm:$0xff] %v5544_v24  ;;  %v1687_v41 = vpop.permute.xlu0 %1686  ;;  %v1771_v40 = vmul.f32 %v5527_v16, %v1692_v26  ;;  %2200 = vperm.xlu1 %4228, %v3824_v62   ;;  %2195 = vperm.xlu0 %4227, %v3823_v8   ;;  %v3794_v62 = vld [vmem:[%s4474_s9 + $0x128] sm:$0xff]  ;;  %v3793_v8 = vld [vmem:[%s4474_s9 + $0x120] sm:$0xff] }
 0x206   : > { %6921 = vst [vmem:[#allocation74_spill] sm:$0xff] %v5547_v45  ;;  %v1770_v17 = vmul.f32 %v5527_v16, %v1687_v41 }
 0x207   : > { %v5554_v53 = vadd.f32 %v1771_v40, %v5391_v63 }
 0x208   : > { %v5557_v59 = vadd.f32 %v1770_v17, %v5394_v4  ;;  %v1702_v29 = vpop.permute.xlu1 %1701 }
 0x209   : > { %6922 = vst [vmem:[#allocation75_spill] sm:$0xff] %v5554_v53  ;;  %v1697_v30 = vpop.permute.xlu0 %1696  ;;  %v1773_v20 = vmul.f32 %v5527_v16, %v1702_v29  ;;  %2210 = vperm.xlu1 %4228, %v3826_v10   ;;  %2205 = vperm.xlu0 %4227, %v3825_v42   ;;  %v3796_v10 = vld [vmem:[%s4474_s9 + $0x140] sm:$0xff]  ;;  %v3795_v42 = vld [vmem:[%s4474_s9 + $0x138] sm:$0xff] }
 0x20a   : > { %6923 = vst [vmem:[#allocation76_spill] sm:$0xff] %v5557_v59  ;;  %v1772_v26 = vmul.f32 %v5527_v16, %v1697_v30 }
 0x20b   : > { %v5564_v41 = vadd.f32 %v1773_v20, %v5401_v52 }
 0x20c   : > { %v5567_v63 = vadd.f32 %v1772_v26, %v5404_v13  ;;  %v1712_v4 = vpop.permute.xlu1 %1711 }
 0x20d   : > { %6924 = vst [vmem:[#allocation81_spill] sm:$0xff] %v5564_v41  ;;  %v1707_v40 = vpop.permute.xlu0 %1706  ;;  %v1775_v17 = vmul.f32 %v5527_v16, %v1712_v4  ;;  %1956 = vperm.xlu1 %4228, %v3794_v62   ;;  %1951 = vperm.xlu0 %4227, %v3793_v8   ;;  %v3858_v62 = vld [vmem:[%s4474_s9 + $0xfa] sm:$0xff]  ;;  %v3857_v8 = vld [vmem:[%s4474_s9 + $0xf2] sm:$0xff]  ;;  %v6946_v41 = vld [vmem:[#allocation46_spill] sm:$0xff] }
 0x20e   : > { %6925 = vst [vmem:[#allocation82_spill] sm:$0xff] %v5567_v63  ;;  %v1774_v29 = vmul.f32 %v5527_v16, %v1707_v40 }
 0x20f   : > { %v5574_v30 = vadd.f32 %v1775_v17, %v5411_v22 }
 0x210   : > { %v5577_v52 = vadd.f32 %v1774_v29, %v5414_v23  ;;  %v1722_v13 = vpop.permute.xlu1 %1721 }
 0x211   : > { %6926 = vst [vmem:[#allocation83_spill] sm:$0xff] %v5574_v30  ;;  %v1717_v20 = vpop.permute.xlu0 %1716  ;;  %v1777_v26 = vmul.f32 %v5527_v16, %v1722_v13  ;;  %1966 = vperm.xlu1 %4228, %v3796_v10   ;;  %1961 = vperm.xlu0 %4227, %v3795_v42   ;;  %v3860_v10 = vld [vmem:[%s4474_s9 + $0x112] sm:$0xff]  ;;  %v3859_v42 = vld [vmem:[%s4474_s9 + $0x10a] sm:$0xff] }
 0x212   : > { %6927 = vst [vmem:[#allocation84_spill] sm:$0xff] %v5577_v52  ;;  %v1776_v4 = vmul.f32 %v5527_v16, %v1717_v20 }
 0x213   : > { %v5584_v40 = vadd.f32 %v1777_v26, %v5421_v21 }
 0x214   : > { %v5587_v22 = vadd.f32 %v1776_v4, %v5424_v15  ;;  %v1732_v23 = vpop.permute.xlu1 %1731 }
 0x215   : > { %6928 = vst [vmem:[#allocation85_spill] sm:$0xff] %v5584_v40  ;;  %v1727_v17 = vpop.permute.xlu0 %1726  ;;  %v1779_v29 = vmul.f32 %v5527_v16, %v1732_v23  ;;  %2464 = vperm.xlu1 %4228, %v3858_v62   ;;  %2459 = vperm.xlu0 %4227, %v3857_v8   ;;  %v3828_v62 = vld [vmem:[%s4474_s9 + $0x129] sm:$0xff]  ;;  %v3827_v8 = vld [vmem:[%s4474_s9 + $0x121] sm:$0xff] }
 0x216   : > { %6929 = vst [vmem:[#allocation86_spill] sm:$0xff] %v5587_v22  ;;  %v1778_v13 = vmul.f32 %v5527_v16, %v1727_v17  ;;  %v6941_v40 = vld [vmem:[#allocation41_spill] sm:$0xff] }
 0x217   : > { %v5594_v20 = vadd.f32 %v1779_v29, %v5431_v28 }
 0x218   : > { %v5597_v21 = vadd.f32 %v1778_v13, %v5434_v61  ;;  %v1742_v15 = vpop.permute.xlu1 %1741  ;;  %v3830_v13 = vld [vmem:[%s4474_s9 + $0x141] sm:$0xff] }
 0x219   : > { %6930 = vst [vmem:[#allocation87_spill] sm:$0xff] %v5594_v20  ;;  %v1737_v26 = vpop.permute.xlu0 %1736  ;;  %v1781_v4 = vmul.f32 %v5527_v16, %v1742_v15  ;;  %2474 = vperm.xlu1 %4228, %v3860_v10   ;;  %2469 = vperm.xlu0 %4227, %v3859_v42   ;;  %v3829_v15 = vld [vmem:[%s4474_s9 + $0x139] sm:$0xff] }
 0x21a   : > { %6931 = vst [vmem:[#allocation88_spill] sm:$0xff] %v5597_v21  ;;  %v1780_v23 = vmul.f32 %v5527_v16, %v1737_v26  ;;  %v5618_v10 = vld [vmem:[%s6693_s1] ss:$0 sm:$0xff]  ;;  %v6940_v21 = vld [vmem:[#allocation38_spill] sm:$0xff] }
 0x21b   : > { %v5604_v17 = vadd.f32 %v1781_v4, %v5441_v19  ;;  %6934 = vst [vmem:[#allocation91_spill] sm:$0xff] %v5618_v10  ;;  %v6935_v19 = vld [vmem:[#allocation33_spill] sm:$0xff]  ;;  %v6938_v4 = vld [vmem:[#allocation34_spill] sm:$0xff]  ;;  %v430_v20 = vmul.f32 %v5618_v10, %v6940_v21  ;;  %v435_v59 = vmul.f32 %v5618_v10, %v6946_v41  ;;  %v439_v54 = vmul.f32 %v5618_v10, %v6950_v51 }
 0x21c   : > { %v5607_v28 = vadd.f32 %v1780_v23, %v5444_v18  ;;  %v5609_v61 = vpop.permute.xlu1 %1856  ;;  %v431_v42 = vmul.f32 %v5618_v10, %v6935_v19  ;;  %v429_v23 = vmul.f32 %v5618_v10, %v6938_v4  ;;  %v5637_v19 = vld [vmem:[%s6694_s2] ss:$0 sm:$0xff] }
 0x21d   : > { %6932 = vst [vmem:[#allocation89_spill] sm:$0xff] %v5604_v17  ;;  %v5611_v29 = vpop.permute.xlu0 %1851  ;;  %2220 = vperm.xlu1 %4228, %v3828_v62   ;;  %2215 = vperm.xlu0 %4227, %v3827_v8   ;;  %v6939_v62 = vld [vmem:[#allocation37_spill] sm:$0xff]  ;;  %v3797_v17 = vld [vmem:[%s4474_s9 + $0x150] sm:$0xff]  ;;  %v462_v41 = vadd.f32 %v5637_v19, %v430_v20 }
 0x21e   : > { %6933 = vst [vmem:[#allocation90_spill] sm:$0xff] %v5607_v28  ;;  %v432_v8 = vmul.f32 %v5618_v10, %v6939_v62  ;;  %v3798_v28 = vld [vmem:[%s4474_s9 + $0x158] sm:$0xff]  ;;  %v463_v22 = vadd.f32 %v5637_v19, %v431_v42  ;;  %v6943_v62 = vld [vmem:[#allocation45_spill] sm:$0xff]  ;;  %v461_v63 = vadd.f32 %v5637_v19, %v429_v23  ;;  %v3800_v23 = vld [vmem:[%s4474_s9 + $0x170] sm:$0xff] }
 0x21f   : > { %v436_v52 = vmul.f32 %v5618_v10, %v6943_v62  ;;  %v6947_v42 = vld [vmem:[#allocation49_spill] sm:$0xff] }
 0x220   : > { %v5622_v26 = vpop.permute.xlu1 %1866  ;;  %v438_v53 = vmul.f32 %v5618_v10, %v6947_v42  ;;  %v6949_v62 = vld [vmem:[#allocation53_spill] sm:$0xff] }
 0x221   : > { %6936 = vst [vmem:[#allocation33_spill] sm:$0xff] %v5622_v26  ;;  %v5624_v18 = vpop.permute.xlu0 %1861  ;;  %2230 = vperm.xlu1 %4228, %v3830_v13   ;;  %2225 = vperm.xlu0 %4227, %v3829_v15   ;;  %v434_v13 = vmul.f32 %v5618_v10, %v6941_v40  ;;  %v6942_v15 = vld [vmem:[#allocation42_spill] sm:$0xff]  ;;  %v464_v40 = vadd.f32 %v5637_v19, %v432_v8 }
 0x222   : > { %6937 = vst [vmem:[#allocation92_spill] sm:$0xff] %v5624_v18  ;;  %v433_v4 = vmul.f32 %v5618_v10, %v6942_v15  ;;  %v6948_v15 = vld [vmem:[#allocation50_spill] sm:$0xff]  ;;  %v440_v24 = vmul.f32 %v5618_v10, %v6949_v62 }
 0x223   : > { %v437_v45 = vmul.f32 %v5618_v10, %v6948_v15  ;;  %v466_v51 = vadd.f32 %v5637_v19, %v434_v13  ;;  %v468_v15 = vadd.f32 %v5637_v19, %v436_v52 }
 0x224   : > { %v5646_v30 = vpop.permute.xlu1 %1876  ;;  %v465_v20 = vadd.f32 %v5637_v19, %v433_v4  ;;  %v472_v52 = vadd.f32 %v5637_v19, %v440_v24  ;;  %v471_v4 = vadd.f32 %v5637_v19, %v439_v54 }
 0x225   : > { %6944 = vst [vmem:[#allocation34_spill] sm:$0xff] %v5646_v30  ;;  %v5648_v21 = vpop.permute.xlu0 %1871  ;;  %1976 = vperm.xlu1 %4228, %v3798_v28   ;;  %1971 = vperm.xlu0 %4227, %v3797_v17   ;;  %v5668_v28 = vld [vmem:[%s6693_s1 + $0x1] ss:$0 sm:$0xff]  ;;  %v470_v30 = vadd.f32 %v5637_v19, %v438_v53  ;;  %v469_v13 = vadd.f32 %v5637_v19, %v437_v45 }
 0x226   : > { %6945 = vst [vmem:[#allocation37_spill] sm:$0xff] %v5648_v21  ;;  %v3799_v21 = vld [vmem:[%s4474_s9 + $0x168] sm:$0xff]  ;;  %v694_v17 = vmul.f32 %v5668_v28, %v4948_v48  ;;  %v693_v8 = vmul.f32 %v5668_v28, %v4950_v47  ;;  %v696_v42 = vmul.f32 %v5668_v28, %v4954_v44  ;;  %v695_v62 = vmul.f32 %v5668_v28, %v4956_v43 }
 0x227   : > { %v467_v47 = vadd.f32 %v5637_v19, %v435_v59  ;;  %v698_v44 = vmul.f32 %v5668_v28, %v4960_v33  ;;  %v697_v43 = vmul.f32 %v5668_v28, %v4962_v60  ;;  %v700_v53 = vmul.f32 %v5668_v28, %v4966_v46 }
 0x228   : > { %v5681_v10 = vpop.permute.xlu1 %1886  ;;  %v726_v18 = vadd.f32 %v694_v17, %v462_v41  ;;  %v725_v59 = vadd.f32 %v693_v8, %v461_v63  ;;  %v728_v26 = vadd.f32 %v696_v42, %v464_v40  ;;  %v727_v33 = vadd.f32 %v695_v62, %v463_v22  ;;  %v3863_v41 = vld [vmem:[%s4474_s9 + $0x13a] sm:$0xff] }
 0x229   : > { %6951 = vst [vmem:[#allocation38_spill] sm:$0xff] %v5681_v10  ;;  %v5683_v48 = vpop.permute.xlu0 %1881  ;;  %1986 = vperm.xlu1 %4228, %v3800_v23   ;;  %1981 = vperm.xlu0 %4227, %v3799_v21   ;;  %v3862_v10 = vld [vmem:[%s4474_s9 + $0x12a] sm:$0xff]  ;;  %v699_v45 = vmul.f32 %v5668_v28, %v4968_v3  ;;  %v702_v54 = vmul.f32 %v5668_v28, %v4972_v1  ;;  %v5715_v1 = vld [vmem:[%s6693_s1 + $0x2] ss:$0 sm:$0xff] }
 0x22a   : > { %6952 = vst [vmem:[#allocation41_spill] sm:$0xff] %v5683_v48  ;;  %v3861_v48 = vld [vmem:[%s4474_s9 + $0x122] sm:$0xff]  ;;  %v701_v60 = vmul.f32 %v5668_v28, %v4974_v5  ;;  %v730_v63 = vadd.f32 %v698_v44, %v466_v51  ;;  %v704_v46 = vmul.f32 %v5668_v28, %v4978_v6  ;;  %v703_v22 = vmul.f32 %v5668_v28, %v4980_v7 }
 0x22b   : > { %v729_v3 = vadd.f32 %v697_v43, %v465_v20  ;;  %v958_v5 = vmul.f32 %v5715_v1, %v5063_v32  ;;  %v957_v40 = vmul.f32 %v5715_v1, %v5065_v11  ;;  %v960_v6 = vmul.f32 %v5715_v1, %v5069_v49  ;;  %v3864_v23 = vld [vmem:[%s4474_s9 + $0x142] sm:$0xff] }
 0x22c   : > { %v5704_v24 = vpop.permute.xlu1 %2120  ;;  %v732_v7 = vadd.f32 %v700_v53, %v468_v15  ;;  %v962_v17 = vmul.f32 %v5715_v1, %v5075_v55  ;;  %v961_v8 = vmul.f32 %v5715_v1, %v5077_v56  ;;  %v731_v32 = vadd.f32 %v699_v45, %v467_v47  ;;  %v3831_v47 = vld [vmem:[%s4474_s9 + $0x151] sm:$0xff] }
 0x22d   : > { %v5706_v21 = vpop.permute.xlu0 %2115  ;;  %2484 = vperm.xlu1 %4228, %v3862_v10   ;;  %2479 = vperm.xlu0 %4227, %v3861_v48   ;;  %v959_v10 = vmul.f32 %v5715_v1, %v5071_v50  ;;  %v734_v42 = vadd.f32 %v702_v54, %v470_v30  ;;  %v5731_v11 = vadd.f32 %v701_v60, %v469_v13  ;;  %v3834_v54 = vld [vmem:[%s4474_s9 + $0x171] sm:$0xff]  ;;  %v3833_v60 = vld [vmem:[%s4474_s9 + $0x169] sm:$0xff] }
 0x22e   : > { %v964_v49 = vmul.f32 %v5715_v1, %v5081_v12  ;;  %v5739_v50 = vadd.f32 %v704_v46, %v472_v52  ;;  %v5741_v15 = vadd.f32 %v703_v22, %v471_v4  ;;  %v963_v55 = vmul.f32 %v5715_v1, %v5083_v35  ;;  %v3832_v12 = vld [vmem:[%s4474_s9 + $0x159] sm:$0xff] }
 0x22f   : > { %v990_v56 = vadd.f32 %v958_v5, %v726_v18  ;;  %v989_v30 = vadd.f32 %v957_v40, %v725_v59  ;;  %v992_v62 = vadd.f32 %v960_v6, %v728_v26  ;;  %v966_v48 = vmul.f32 %v5715_v1, %v5087_v36 }
 0x230   : > { %v5735_v51 = vpop.permute.xlu1 %2130  ;;  %v991_v44 = vadd.f32 %v959_v10, %v727_v33  ;;  %v994_v13 = vadd.f32 %v962_v17, %v730_v63  ;;  %v993_v43 = vadd.f32 %v961_v8, %v729_v3  ;;  %v1223_v52 = vmul.f32 %v5229_v0, %v5178_v57  ;;  %v6956_v10 = vld [vmem:[#allocation25_spill] sm:$0xff]  ;;  %v6957_v8 = vld [vmem:[#allocation26_spill] sm:$0xff] }
 0x231   : > { %v5737_v20 = vpop.permute.xlu0 %2125  ;;  %2494 = vperm.xlu1 %4228, %v3864_v23   ;;  %2489 = vperm.xlu0 %4227, %v3863_v41   ;;  %v996_v4 = vadd.f32 %v964_v49, %v732_v7  ;;  %v1222_v35 = vmul.f32 %v5229_v0, %v5180_v58  ;;  %v1225_v26 = vmul.f32 %v5229_v0, %v5184_v34  ;;  %v3801_v49 = vld [vmem:[%s4474_s9 + $0x180] sm:$0xff] }
 0x232   : > { %v1224_v36 = vmul.f32 %v5229_v0, %v5186_v25  ;;  %v995_v53 = vadd.f32 %v963_v55, %v731_v32  ;;  %v1227_v57 = vmul.f32 %v5229_v0, %v5190_v9  ;;  %v1226_v33 = vmul.f32 %v5229_v0, %v5192_v31  ;;  %v6958_v55 = vld [vmem:[#allocation15_spill] sm:$0xff] }
 0x233   : > { %v5765_v58 = vadd.f32 %v966_v48, %v734_v42  ;;  %v5769_v34 = vmul.f32 %v5715_v1, %v5089_v37  ;;  %v1229_v25 = vmul.f32 %v5229_v0, %v5196_v14  ;;  %v1228_v45 = vmul.f32 %v5229_v0, %v5198_v27  ;;  %v6953_v37 = vld [vmem:[#allocation44_spill] sm:$0xff]  ;;  %v6954_v27 = vld [vmem:[#allocation23_spill] sm:$0xff]  ;;  %v3802_v42 = vld [vmem:[%s4474_s9 + $0x188] sm:$0xff] }
 0x234   : > { %v5757_v18 = vpop.permute.xlu1 %2140  ;;  %v5779_v9 = vmul.f32 %v5715_v1, %v5093_v2  ;;  %v5783_v31 = vmul.f32 %v5715_v1, %v5095_v39  ;;  %v1255_v63 = vadd.f32 %v1223_v52, %v990_v56  ;;  %v1487_v46 = vmul.f32 %v6953_v37, %v5313_v38  ;;  %v6955_v39 = vld [vmem:[#allocation24_spill] sm:$0xff] }
 0x235   : > { %v5759_v59 = vpop.permute.xlu0 %2135  ;;  %2240 = vperm.xlu1 %4228, %v3832_v12   ;;  %2235 = vperm.xlu0 %4227, %v3831_v47   ;;  %v1254_v22 = vadd.f32 %v1222_v35, %v989_v30  ;;  %v1257_v14 = vadd.f32 %v1225_v26, %v992_v62  ;;  %v1256_v3 = vadd.f32 %v1224_v36, %v991_v44  ;;  %v6959_v62 = vld [vmem:[#allocation27_spill] sm:$0xff]  ;;  %v6960_v12 = vld [vmem:[#allocation28_spill] sm:$0xff]  ;;  %v5812_v44 = vld [vmem:[%s6693_s1 + $0x6] ss:$0 sm:$0xff] }
 0x236   : > { %v1486_v5 = vmul.f32 %v6953_v37, %v6954_v27  ;;  %v1259_v6 = vadd.f32 %v1227_v57, %v994_v13  ;;  %v1258_v23 = vadd.f32 %v1226_v33, %v993_v43  ;;  %v1489_v41 = vmul.f32 %v6953_v37, %v6955_v39  ;;  %v6961_v43 = vld [vmem:[#allocation29_spill] sm:$0xff]  ;;  %v6963_v35 = vld [vmem:[#allocation48_spill] sm:$0xff]  ;;  %v6964_v33 = vld [vmem:[#allocation51_spill] sm:$0xff] }
 0x237   : > { %v1261_v38 = vadd.f32 %v1229_v25, %v996_v4  ;;  %v1260_v7 = vadd.f32 %v1228_v45, %v995_v53  ;;  %v1488_v17 = vmul.f32 %v6953_v37, %v6956_v10  ;;  %v1491_v32 = vmul.f32 %v6953_v37, %v6957_v8  ;;  %v6962_v4 = vld [vmem:[#allocation47_spill] sm:$0xff]  ;;  %v6965_v45 = vld [vmem:[#allocation52_spill] sm:$0xff]  ;;  %v3804_v27 = vld [vmem:[%s4474_s9 + $0x1a0] sm:$0xff] }
 0x238   : > { %v5789_v40 = vpop.permute.xlu1 %2150  ;;  %v5803_v56 = vmul.f32 %v5229_v0, %v6958_v55  ;;  %v1519_v30 = vadd.f32 %v1487_v46, %v1255_v63  ;;  %v1490_v48 = vmul.f32 %v6953_v37, %v6959_v62  ;;  %v1493_v47 = vmul.f32 %v6953_v37, %v6960_v12  ;;  %v6966_v46 = vld [vmem:[#allocation55_spill] sm:$0xff]  ;;  %v6967_v10 = vld [vmem:[#allocation56_spill] sm:$0xff]  ;;  %v6968_v62 = vld [vmem:[#allocation33_spill] sm:$0xff] }
 0x239   : > { %v5791_v2 = vpop.permute.xlu0 %2145  ;;  %2250 = vperm.xlu1 %4228, %v3834_v54   ;;  %2245 = vperm.xlu0 %4227, %v3833_v60   ;;  %v1518_v13 = vadd.f32 %v1486_v5, %v1254_v22  ;;  %v1492_v52 = vmul.f32 %v6953_v37, %v6961_v43  ;;  %v1751_v0 = vmul.f32 %v5527_v16, %v6962_v4  ;;  %v5831_v60 = vld [vmem:[%s6693_s1 + $0x7] ss:$0 sm:$0xff]  ;;  %v3803_v5 = vld [vmem:[%s4474_s9 + $0x198] sm:$0xff] }
 0x23a   : > { %v1750_v26 = vmul.f32 %v5527_v16, %v6963_v35  ;;  %v1521_v57 = vadd.f32 %v1489_v41, %v1257_v14  ;;  %v1753_v25 = vmul.f32 %v5527_v16, %v6964_v33  ;;  %v1752_v54 = vmul.f32 %v5527_v16, %v6965_v45 }
 0x23b   : > { %v1520_v63 = vadd.f32 %v1488_v17, %v1256_v3  ;;  %v1523_v37 = vadd.f32 %v1491_v32, %v1259_v6  ;;  %v1755_v22 = vmul.f32 %v5527_v16, %v6966_v46  ;;  %v2016_v14 = vmul.f32 %v5812_v44, %v5609_v61 }
 0x23c   : > { %v5820_v36 = vpop.permute.xlu1 %1896  ;;  %v1522_v39 = vadd.f32 %v1490_v48, %v1258_v23  ;;  %v1525_v41 = vadd.f32 %v1493_v47, %v1261_v38  ;;  %v1754_v8 = vmul.f32 %v5527_v16, %v6967_v10  ;;  %v2015_v55 = vmul.f32 %v5812_v44, %v5611_v29  ;;  %v6969_v48 = vld [vmem:[#allocation92_spill] sm:$0xff] }
 0x23d   : > { %v5822_v53 = vpop.permute.xlu0 %1891  ;;  %1996 = vperm.xlu1 %4228, %v3802_v42   ;;  %1991 = vperm.xlu0 %4227, %v3801_v49   ;;  %v1524_v42 = vadd.f32 %v1492_v52, %v1260_v7  ;;  %v1783_v3 = vadd.f32 %v1751_v0, %v1519_v30  ;;  %v1782_v6 = vadd.f32 %v1750_v26, %v1518_v13  ;;  %v3866_v47 = vld [vmem:[%s4474_s9 + $0x15a] sm:$0xff]  ;;  %v3865_v13 = vld [vmem:[%s4474_s9 + $0x152] sm:$0xff]  ;;  %v6971_v0 = vld [vmem:[#allocation34_spill] sm:$0xff] }
 0x23e   : > { %v2280_v17 = vmul.f32 %v5831_v60, %v5704_v24  ;;  %v1785_v23 = vadd.f32 %v1753_v25, %v1521_v57  ;;  %v1784_v38 = vadd.f32 %v1752_v54, %v1520_v63  ;;  %v2279_v49 = vmul.f32 %v5831_v60, %v5706_v21  ;;  %v5858_v24 = vld [vmem:[%s6693_s1 + $0x8] ss:$0 sm:$0xff]  ;;  %v6970_v52 = vld [vmem:[#allocation59_spill] sm:$0xff]  ;;  %v6972_v26 = vld [vmem:[#allocation37_spill] sm:$0xff] }
 0x23f   : > { %v1787_v29 = vadd.f32 %v1755_v22, %v1523_v37  ;;  %v2048_v7 = vadd.f32 %v2016_v14, %v1783_v3  ;;  %v2018_v30 = vmul.f32 %v5812_v44, %v6968_v62  ;;  %v2017_v12 = vmul.f32 %v5812_v44, %v6969_v48  ;;  %v6973_v14 = vld [vmem:[#allocation60_spill] sm:$0xff] }
 0x240   : > { %v5845_v32 = vpop.permute.xlu1 %1906  ;;  %v1786_v43 = vadd.f32 %v1754_v8, %v1522_v39  ;;  %v1757_v21 = vmul.f32 %v5527_v16, %v6970_v52  ;;  %v2047_v4 = vadd.f32 %v2015_v55, %v1782_v6  ;;  %v2020_v35 = vmul.f32 %v5812_v44, %v6971_v0  ;;  %v3868_v10 = vld [vmem:[%s4474_s9 + $0x172] sm:$0xff]  ;;  %v3867_v8 = vld [vmem:[%s4474_s9 + $0x16a] sm:$0xff] }
 0x241   : > { %v5847_v61 = vpop.permute.xlu0 %1901  ;;  %2006 = vperm.xlu1 %4228, %v3804_v27   ;;  %2001 = vperm.xlu0 %4227, %v3803_v5   ;;  %v2019_v57 = vmul.f32 %v5812_v44, %v6972_v26  ;;  %v2312_v33 = vadd.f32 %v2280_v17, %v2048_v7  ;;  %v2282_v25 = vmul.f32 %v5831_v60, %v5735_v51  ;;  %v3154_v0 = vld [vmem:[%s6695_s3 + $0x88] sm:$0xff] }
 0x242   : > { %v2281_v45 = vmul.f32 %v5831_v60, %v5737_v20  ;;  %v2311_v37 = vadd.f32 %v2279_v49, %v2047_v4  ;;  %v1756_v27 = vmul.f32 %v5527_v16, %v6973_v14  ;;  %v2050_v5 = vadd.f32 %v2018_v30, %v1785_v23  ;;  %v3153_v4 = vld [vmem:[%s6695_s3 + $0x80] sm:$0xff] }
 0x243   : > { %v2049_v39 = vadd.f32 %v2017_v12, %v1784_v38  ;;  %v2284_v51 = vmul.f32 %v5831_v60, %v5757_v18  ;;  %v1789_v20 = vadd.f32 %v1757_v21, %v1525_v41  ;;  %v2283_v55 = vmul.f32 %v5831_v60, %v5759_v59  ;;  %v3836_v41 = vld [vmem:[%s4474_s9 + $0x189] sm:$0xff] }
 0x244   : > { %v2385_v54 = vpop.permute.xlu1 %2384  ;;  %v2052_v17 = vadd.f32 %v2020_v35, %v1787_v29  ;;  %v2051_v49 = vadd.f32 %v2019_v57, %v1786_v43  ;;  %v2314_v7 = vadd.f32 %v2282_v25, %v2050_v5  ;;  %v1788_v59 = vadd.f32 %v1756_v27, %v1524_v42  ;;  %v6975_v29 = vld [vmem:[#allocation41_spill] sm:$0xff]  ;;  %v3186_v25 = vld [vmem:[%s6695_s3 + $0x188] sm:$0xff] }
 0x245   : > { %v2380_v63 = vpop.permute.xlu0 %2379  ;;  %v2544_v46 = vmul.f32 %v5858_v24, %v2385_v54  ;;  %2504 = vperm.xlu1 %4228, %v3866_v47   ;;  %2499 = vperm.xlu0 %4227, %v3865_v13   ;;  %v2313_v62 = vadd.f32 %v2281_v45, %v2049_v39  ;;  %v3835_v47 = vld [vmem:[%s4474_s9 + $0x181] sm:$0xff]  ;;  %v2021_v43 = vmul.f32 %v5812_v44, %v6975_v29 }
 0x246   : > { %v2543_v22 = vmul.f32 %v5858_v24, %v2380_v63  ;;  %v6974_v13 = vld [vmem:[#allocation38_spill] sm:$0xff]  ;;  %v2316_v21 = vadd.f32 %v2284_v51, %v2052_v17  ;;  %v3185_v35 = vld [vmem:[%s6695_s3 + $0x180] sm:$0xff]  ;;  %v2315_v42 = vadd.f32 %v2283_v55, %v2051_v49  ;;  %v2286_v63 = vmul.f32 %v5831_v60, %v5789_v40  ;;  %v3155_v49 = vld [vmem:[%s6695_s3 + $0x90] sm:$0xff] }
 0x247   : > { %v2576_v3 = vadd.f32 %v2544_v46, %v2312_v33  ;;  %v2022_v52 = vmul.f32 %v5812_v44, %v6974_v13  ;;  %v4070_v33 = vpack.c.bf16 %v3154_v0, %v3153_v4  ;;  %v3137_v45 = vld [vmem:[%s6695_s3] sm:$0xff]  ;;  %v3138_v54 = vld [vmem:[%s6695_s3 + $0x8] sm:$0xff]  ;;  %v4102_v14 = vpack.c.bf16 %v3186_v25, %v3185_v35  ;;  %v3171_v4 = vld [vmem:[%s6695_s3 + $0x110] sm:$0xff] }
 0x248   : > { %v2575_v6 = vadd.f32 %v2543_v22, %v2311_v37  ;;  %v2395_v48 = vpop.permute.xlu1 %2394  ;;  %v2285_v37 = vmul.f32 %v5831_v60, %v5791_v2  ;;  %v4072_v27 = vpack.c.bf16 %v3138_v54, %v3137_v45  ;;  %v3169_v5 = vld [vmem:[%s6695_s3 + $0x100] sm:$0xff]  ;;  %v3170_v39 = vld [vmem:[%s6695_s3 + $0x108] sm:$0xff]  ;;  %v3172_v0 = vld [vmem:[%s6695_s3 + $0x118] sm:$0xff]  ;;  %v1000_v25 = vadd.f32 %v5779_v9, %v5739_v50 }
 0x249   : > { %v2390_v23 = vpop.permute.xlu0 %2389  ;;  %v2608_v38 = vmax.f32 %v2576_v3, 0.0  ;;  %v2546_v18 = vmul.f32 %v5858_v24, %v2395_v48  ;;  %2514 = vperm.xlu1 %4228, %v3868_v10   ;;  %2509 = vperm.xlu0 %4227, %v3867_v8   ;;  %v3838_v2 = vld [vmem:[%s4474_s9 + $0x1a1] sm:$0xff]  ;;  %v3837_v55 = vld [vmem:[%s4474_s9 + $0x199] sm:$0xff]  ;;  %v2054_v3 = vadd.f32 %v2022_v52, %v1789_v20  ;;  %v4104_v17 = vpack.c.bf16 %v3170_v39, %v3169_v5 }
 0x24a   : > { %v2607_v30 = vmax.f32 %v2575_v6, 0.0  ;;  %v2545_v12 = vmul.f32 %v5858_v24, %v2390_v23  ;;  %v2053_v6 = vadd.f32 %v2021_v43, %v1788_v59  ;;  %4071 = vmatprep.subr.bf16.mxu0 %v4070_v33  ;;  %4103 = vmatprep.subr.bf16.mxu1 %v4102_v14  ;;  %v5936_v20 = vld [vmem:[%s6693_s1 + $0x3] ss:$0 sm:$0xff]  ;;  %v6976_v48 = vld [vmem:[#allocation16_spill] sm:$0xff]  ;;  %v997_v33 = vadd.f32 %v5769_v34, %v5731_v11  ;;  %v3158_v34 = vld [vmem:[%s6695_s3 + $0xa8] sm:$0xff] }
 0x24b   : > { %2641 = vst.msk [vmem:[#allocation2 + $0x8] sm:$0xff] %vm2639_vm0, %v2608_v38  ;;  %v2578_v26 = vadd.f32 %v2546_v18, %v2314_v7  ;;  %v3156_v7 = vld [vmem:[%s6695_s3 + $0x98] sm:$0xff]  ;;  %v1230_v23 = vmul.f32 %v5936_v20, %v6976_v48  ;;  %4073 = vmatpush3.bf16.msra.mxu0 %v4072_v27  ;;  %v2318_v59 = vadd.f32 %v2286_v63, %v2054_v3  ;;  %v3157_v54 = vld [vmem:[%s6695_s3 + $0xa0] sm:$0xff]  ;;  %v6979_v3 = vld [vmem:[#allocation30_spill] sm:$0xff] }
 0x24c   : > { %2640 = vst.msk [vmem:[#allocation2] sm:$0xff] %vm2639_vm0, %v2607_v30  ;;  %v2577_v57 = vadd.f32 %v2545_v12, %v2313_v62  ;;  %v2405_v46 = vpop.permute.xlu1 %2404  ;;  %v3187_v62 = vld [vmem:[%s6695_s3 + $0x190] sm:$0xff]  ;;  %v4074_v18 = vpack.c.bf16 %v3156_v7, %v3155_v49  ;;  %v3188_v12 = vld [vmem:[%s6695_s3 + $0x198] sm:$0xff]  ;;  %v2317_v13 = vadd.f32 %v2285_v37, %v2053_v6  ;;  %4105 = vmatpush3.bf16.msra.mxu1 %v4104_v17  ;;  %v3189_v9 = vld [vmem:[%s6695_s3 + $0x1a0] sm:$0xff] }
 0x24d   : > { %v2400_v22 = vpop.permute.xlu0 %2399  ;;  %v2610_v51 = vmax.f32 %v2578_v26, 0.0  ;;  %v2548_v8 = vmul.f32 %v5858_v24, %v2405_v46  ;;  %2260 = vperm.xlu1 %4228, %v3836_v41   ;;  %2255 = vperm.xlu0 %4227, %v3835_v47   ;;  %v3139_v41 = vld [vmem:[%s6695_s3 + $0x10] sm:$0xff]  ;;  %v3140_v47 = vld [vmem:[%s6695_s3 + $0x18] sm:$0xff]  ;;  %v4106_v43 = vpack.c.bf16 %v3188_v12, %v3187_v62  ;;  %v4108_v45 = vpack.c.bf16 %v3172_v0, %v3171_v4  ;;  %v3872_v14 = vld [vmem:[%s4474_s9 + $0x1a2] sm:$0xff] }
 0x24e   : > { %v2609_v10 = vmax.f32 %v2577_v57, 0.0  ;;  %v2547_v40 = vmul.f32 %v5858_v24, %v2400_v22  ;;  %4075 = vmatprep.subr.bf16.mxu0 %v4074_v18  ;;  %v999_v63 = vadd.f32 %v5783_v31, %v5741_v15  ;;  %v5970_v37 = vadd.f32 %v5803_v56, %v5765_v58  ;;  %v3190_v15 = vld [vmem:[%s6695_s3 + $0x1a8] sm:$0xff]  ;;  %v6977_v31 = vld [vmem:[#allocation17_spill] sm:$0xff] }
 0x24f   : > { %2643 = vst.msk [vmem:[#allocation2 + $0x18] sm:$0xff] %vm2639_vm0, %v2610_v51  ;;  %v2580_v38 = vadd.f32 %v2548_v8, %v2316_v21  ;;  %v4076_v21 = vpack.c.bf16 %v3140_v47, %v3139_v41  ;;  %4107 = vmatprep.subr.bf16.mxu1 %v4106_v43  ;;  %v5983_v58 = vadd.f32 %v1230_v23, %v997_v33  ;;  %v3871_v27 = vld [vmem:[%s4474_s9 + $0x19a] sm:$0xff]  ;;  %v4315_v48 = vld [vmem:[%s4474_s9 + $0x18a] sm:$0xff]  ;;  %v4316_v23 = vld [vmem:[%s4474_s9 + $0x182] sm:$0xff] }
 0x250   : > { %2642 = vst.msk [vmem:[#allocation2 + $0x10] sm:$0xff] %vm2639_vm0, %v2609_v10  ;;  %v2579_v30 = vadd.f32 %v2547_v40, %v2315_v42  ;;  %v2415_v52 = vpop.permute.xlu1 %2414  ;;  %v1233_v56 = vmul.f32 %v5936_v20, %v6977_v31  ;;  %4109 = vmatpush3.bf16.msra.mxu1 %v4108_v45  ;;  %v4078_v5 = vpack.c.bf16 %v3158_v34, %v3157_v54  ;;  %v3141_v51 = vld [vmem:[%s6695_s3 + $0x20] sm:$0xff]  ;;  %v3142_v10 = vld [vmem:[%s6695_s3 + $0x28] sm:$0xff]  ;;  %v6982_v43 = vld [vmem:[#allocation35_spill] sm:$0xff] }
 0x251   : > { %v2410_v29 = vpop.permute.xlu0 %2409  ;;  %v2612_v35 = vmax.f32 %v2580_v38, 0.0  ;;  %v2550_v26 = vmul.f32 %v5858_v24, %v2415_v52  ;;  %2270 = vperm.xlu1 %4228, %v3838_v2   ;;  %2265 = vperm.xlu0 %4227, %v3837_v55   ;;  %v4110_v39 = vpack.c.bf16 %v3190_v15, %v3189_v9  ;;  %v3173_v8 = vld [vmem:[%s6695_s3 + $0x120] sm:$0xff]  ;;  %v6978_v40 = vld [vmem:[#allocation18_spill] sm:$0xff]  ;;  %v4080_v47 = vpack.c.bf16 %v3142_v10, %v3141_v51  ;;  %v6981_v52 = vld [vmem:[#allocation32_spill] sm:$0xff] }
 0x252   : > { %v2611_v42 = vmax.f32 %v2579_v30, 0.0  ;;  %v2549_v57 = vmul.f32 %v5858_v24, %v2410_v29  ;;  %4077 = vmatpush3.bf16.msra.mxu0 %v4076_v21  ;;  %v1232_v2 = vmul.f32 %v5936_v20, %v6978_v40  ;;  %v6007_v55 = vld [vmem:[%s6693_s1 + $0x4] ss:$0 sm:$0xff]  ;;  %v2673_v17 = vld [vmem:[#allocation2 + $0x8] sm:$0xff]  ;;  %v6980_v30 = vld [vmem:[#allocation31_spill] sm:$0xff] }
 0x253   : > { %2645 = vst.msk [vmem:[#allocation2 + $0x28] sm:$0xff] %vm2639_vm0, %v2612_v35  ;;  %v2582_v11 = vadd.f32 %v2550_v26, %v2318_v59  ;;  %v1495_v6 = vmul.f32 %v6007_v55, %v6979_v3  ;;  %v2672_v49 = vld [vmem:[#allocation2] sm:$0xff]  ;;  %v3174_v38 = vld [vmem:[%s6695_s3 + $0x128] sm:$0xff]  ;;  %v1494_v18 = vmul.f32 %v6007_v55, %v6980_v30  ;;  %4079 = vmatprep.subr.bf16.mxu0 %v4078_v5  ;;  %v3160_v35 = vld [vmem:[%s6695_s3 + $0xb8] sm:$0xff] }
 0x254   : > { %2644 = vst.msk [vmem:[#allocation2 + $0x20] sm:$0xff] %vm2639_vm0, %v2611_v42  ;;  %v2581_v50 = vadd.f32 %v2549_v57, %v2317_v13  ;;  %v5987_v46 = vpop.permute.xlu1 %2160  ;;  %4111 = vmatprep.subr.bf16.mxu1 %v4110_v39  ;;  %v4112_v59 = vpack.c.bf16 %v3174_v38, %v3173_v8  ;;  %v3159_v13 = vld [vmem:[%s6695_s3 + $0xb0] sm:$0xff]  ;;  %v1497_v29 = vmul.f32 %v6007_v55, %v6981_v52  ;;  %v3192_v26 = vld [vmem:[%s6695_s3 + $0x1b8] sm:$0xff]  ;;  %v6985_v10 = vld [vmem:[#allocation65_spill] sm:$0xff] }
 0x255   : > { %v5989_v22 = vpop.permute.xlu0 %2155  ;;  %v2614_v7 = vmax.f32 %v2582_v11, 0.0  ;;  %2524 = vperm.xlu1 %4228, %v4315_v48   ;;  %2519 = vperm.xlu0 %4227, %v4316_v23   ;;  %v1496_v21 = vmul.f32 %v6007_v55, %v6982_v43  ;;  %v3191_v42 = vld [vmem:[%s6695_s3 + $0x1b0] sm:$0xff]  ;;  %v1265_v57 = vadd.f32 %v1233_v56, %v1000_v25  ;;  %v4082_v54 = vpack.c.bf16 %v3160_v35, %v3159_v13  ;;  %v3144_v34 = vld [vmem:[%s6695_s3 + $0x38] sm:$0xff]  ;;  %v3161_v40 = vld [vmem:[%s6695_s3 + $0xc0] sm:$0xff] }
 0x256   : > { %v2613_v62 = vmax.f32 %v2581_v50, 0.0  ;;  %v2690_v12 = vld [vmem:[#allocation2 + $0x18] sm:$0xff]  ;;  %4081 = vmatpush3.bf16.msra.mxu0 %v4080_v47  ;;  %4113 = vmatpush3.bf16.msra.mxu1 %v4112_v59  ;;  %v4114_v11 = vpack.c.bf16 %v3192_v26, %v3191_v42  ;;  %v3143_v50 = vld [vmem:[%s6695_s3 + $0x30] sm:$0xff]  ;;  %v1264_v9 = vadd.f32 %v1232_v2, %v999_v63  ;;  %v1761_v63 = vmul.f32 %v5527_v16, %v6985_v10  ;;  %v3145_v38 = vld [vmem:[%s6695_s3 + $0x40] sm:$0xff] }
 0x257   : > { %v2689_v41 = vld [vmem:[#allocation2 + $0x10] sm:$0xff]  ;;  %v2706_v4 = vmax.f32 %v2673_v17, %v2690_v12  ;;  %2647 = vst.msk [vmem:[#allocation2 + $0x38] sm:$0xff] %vm2639_vm0, %v2614_v7  ;;  %v4084_v56 = vpack.c.bf16 %v3144_v34, %v3143_v50  ;;  %v3176_v5 = vld [vmem:[%s6695_s3 + $0x138] sm:$0xff]  ;;  %4083 = vmatprep.subr.bf16.mxu0 %v4082_v54  ;;  %v1529_v2 = vadd.f32 %v1497_v29, %v1265_v57  ;;  %v3162_v17 = vld [vmem:[%s6695_s3 + $0xc8] sm:$0xff] }
 0x258   : > { %v2705_v0 = vmax.f32 %v2672_v49, %v2689_v41  ;;  %2646 = vst.msk [vmem:[#allocation2 + $0x30] sm:$0xff] %vm2639_vm0, %v2613_v62  ;;  %v6036_v33 = vpop.permute.xlu1 %2170  ;;  %v3175_v25 = vld [vmem:[%s6695_s3 + $0x130] sm:$0xff]  ;;  %v6984_v39 = vld [vmem:[#allocation64_spill] sm:$0xff]  ;;  %4115 = vmatprep.subr.bf16.mxu1 %v4114_v11  ;;  %v1528_v3 = vadd.f32 %v1496_v21, %v1264_v9  ;;  %v3193_v49 = vld [vmem:[%s6695_s3 + $0x1c0] sm:$0xff]  ;;  %v2024_v12 = vmul.f32 %v5812_v44, %v5820_v36 }
 0x259   : > { %v6038_v45 = vpop.permute.xlu0 %2165  ;;  %v6983_v15 = vld [vmem:[#allocation63_spill] sm:$0xff]  ;;  %2722 = vst.msk [vmem:[#allocation3 + $0x8] sm:$0xff] %vm2639_vm0, %v2706_v4  ;;  %2534 = vperm.xlu1 %4228, %v3872_v14   ;;  %2529 = vperm.xlu0 %4227, %v3871_v27   ;;  %v1758_v51 = vmul.f32 %v5527_v16, %v6984_v39  ;;  %v4116_v8 = vpack.c.bf16 %v3176_v5, %v3175_v25  ;;  %v3194_v7 = vld [vmem:[%s6695_s3 + $0x1c8] sm:$0xff]  ;;  %v3164_v57 = vld [vmem:[%s6695_s3 + $0xd8] sm:$0xff] }
 0x25a   : > { %v1759_v31 = vmul.f32 %v5527_v16, %v6983_v15  ;;  %2721 = vst.msk [vmem:[#allocation3] sm:$0xff] %vm2639_vm0, %v2705_v0  ;;  %v1527_v14 = vadd.f32 %v1495_v6, %v5970_v37  ;;  %v1526_v27 = vadd.f32 %v1494_v18, %v5983_v58  ;;  %v6986_v62 = vld [vmem:[#allocation66_spill] sm:$0xff]  ;;  %4085 = vmatpush3.bf16.msra.mxu0 %v4084_v56  ;;  %v3163_v36 = vld [vmem:[%s6695_s3 + $0xd0] sm:$0xff]  ;;  %v3196_v11 = vld [vmem:[%s6695_s3 + $0x1d8] sm:$0xff] }
 0x25b   : > { %v1760_v48 = vmul.f32 %v5527_v16, %v6986_v62  ;;  %4117 = vmatpush3.bf16.msra.mxu1 %v4116_v8  ;;  %v4086_v6 = vpack.c.bf16 %v3162_v17, %v3161_v40  ;;  %v4118_v23 = vpack.c.bf16 %v3194_v7, %v3193_v49  ;;  %v3146_v30 = vld [vmem:[%s6695_s3 + $0x48] sm:$0xff]  ;;  %v3177_v16 = vld [vmem:[%s6695_s3 + $0x140] sm:$0xff]  ;;  %v2023_v41 = vmul.f32 %v5812_v44, %v5822_v53  ;;  %v3195_v54 = vld [vmem:[%s6695_s3 + $0x1d0] sm:$0xff] }
 0x25c   : > { %v6076_v37 = vpop.permute.xlu1 %1916  ;;  %v1791_v18 = vadd.f32 %v1759_v31, %v1527_v14  ;;  %v2675_v47 = vld [vmem:[#allocation2 + $0x28] sm:$0xff]  ;;  %v2674_v59 = vld [vmem:[#allocation2 + $0x20] sm:$0xff]  ;;  %v4088_v13 = vpack.c.bf16 %v3146_v30, %v3145_v38  ;;  %v1790_v29 = vadd.f32 %v1758_v51, %v1526_v27  ;;  %v1793_v43 = vadd.f32 %v1761_v63, %v1529_v2  ;;  %v3147_v31 = vld [vmem:[%s6695_s3 + $0x50] sm:$0xff] }
 0x25d   : > { %v6078_v58 = vpop.permute.xlu0 %1911  ;;  %v3178_v52 = vld [vmem:[%s6695_s3 + $0x148] sm:$0xff]  ;;  %4087 = vmatprep.subr.bf16.mxu0 %v4086_v6  ;;  %4119 = vmatprep.subr.bf16.mxu1 %v4118_v23  ;;  %v2026_v53 = vmul.f32 %v5812_v44, %v5845_v32  ;;  %v2288_v26 = vmul.f32 %v5831_v60, %v5987_v46  ;;  %v1792_v50 = vadd.f32 %v1760_v48, %v1528_v3  ;;  %v3148_v10 = vld [vmem:[%s6695_s3 + $0x58] sm:$0xff]  ;;  %v3179_v63 = vld [vmem:[%s6695_s3 + $0x150] sm:$0xff] }
 0x25e   : > { %v2692_v21 = vld [vmem:[#allocation2 + $0x38] sm:$0xff]  ;;  %v4120_v0 = vpack.c.bf16 %v3178_v52, %v3177_v16  ;;  %4089 = vmatpush3.bf16.msra.mxu0 %v4088_v13  ;;  %v4090_v46 = vpack.c.bf16 %v3164_v57, %v3163_v36  ;;  %v4122_v15 = vpack.c.bf16 %v3196_v11, %v3195_v54  ;;  %v2056_v56 = vadd.f32 %v2024_v12, %v1791_v18  ;;  %v3165_v27 = vld [vmem:[%s6695_s3 + $0xe0] sm:$0xff]  ;;  %v3166_v2 = vld [vmem:[%s6695_s3 + $0xe8] sm:$0xff] }
 0x25f   : > { %v2691_v4 = vld [vmem:[#allocation2 + $0x30] sm:$0xff]  ;;  %v2708_v35 = vmax.f32 %v2675_v47, %v2692_v21  ;;  %v2055_v5 = vadd.f32 %v2023_v41, %v1790_v29  ;;  %v2287_v39 = vmul.f32 %v5831_v60, %v5989_v22  ;;  %v3180_v8 = vld [vmem:[%s6695_s3 + $0x158] sm:$0xff]  ;;  %v2025_v40 = vmul.f32 %v5812_v44, %v5847_v61  ;;  %v3197_v3 = vld [vmem:[%s6695_s3 + $0x1e0] sm:$0xff] }
 0x260   : > { %v2707_v42 = vmax.f32 %v2674_v59, %v2691_v4  ;;  %v6112_v34 = vpop.permute.xlu1 %1926  ;;  %4121 = vmatpush3.bf16.msra.mxu1 %v4120_v0  ;;  %4091 = vmatprep.subr.bf16.mxu0 %v4090_v46  ;;  %v4092_v14 = vpack.c.bf16 %v3148_v10, %v3147_v31  ;;  %v4124_v22 = vpack.c.bf16 %v3180_v8, %v3179_v63  ;;  %v3198_v62 = vld [vmem:[%s6695_s3 + $0x1e8] sm:$0xff]  ;;  %v3149_v48 = vld [vmem:[%s6695_s3 + $0x60] sm:$0xff]  ;;  %v6988_v52 = vld [vmem:[#allocation91_spill] sm:$0xff] }
 0x261   : > { %v6114_v32 = vpop.permute.xlu0 %1921  ;;  %v2737_v25 = vld [vmem:[#allocation3] ss:$2 sm:$0xff]  ;;  %v2753_v9 = vld [vmem:[#allocation3 + $0x1] ss:$2 sm:$0xff]  ;;  %2724 = vst.msk [vmem:[#allocation3 + $0x18] sm:$0xff] %vm2639_vm0, %v2708_v35  ;;  %4123 = vmatprep.subr.bf16.mxu1 %v4122_v15  ;;  %v2058_v17 = vadd.f32 %v2026_v53, %v1793_v43  ;;  %v2320_v49 = vadd.f32 %v2288_v26, %v2056_v56  ;;  %v2290_v61 = vmul.f32 %v5831_v60, %v6036_v33  ;;  %v3167_v35 = vld [vmem:[%s6695_s3 + $0xf0] sm:$0xff] }
 0x262   : > { %2723 = vst.msk [vmem:[#allocation3 + $0x10] sm:$0xff] %vm2639_vm0, %v2707_v42  ;;  %v2768_v51 = vmax.f32 %v2737_v25, %v2753_v9  ;;  %v4094_v7 = vpack.c.bf16 %v3166_v2, %v3165_v27  ;;  %v3150_v6 = vld [vmem:[%s6695_s3 + $0x68] sm:$0xff]  ;;  %v2289_v23 = vmul.f32 %v5831_v60, %v6038_v45  ;;  %4093 = vmatpush3.bf16.msra.mxu0 %v4092_v14  ;;  %v3181_v18 = vld [vmem:[%s6695_s3 + $0x160] sm:$0xff]  ;;  %v3168_v42 = vld [vmem:[%s6695_s3 + $0xf8] sm:$0xff] }
 0x263   : > { %v4126_v30 = vpack.c.bf16 %v3198_v62, %v3197_v3  ;;  %v4096_v16 = vpack.c.bf16 %v3150_v6, %v3149_v48  ;;  %v3182_v12 = vld [vmem:[%s6695_s3 + $0x168] sm:$0xff]  ;;  %v2319_v41 = vadd.f32 %v2287_v39, %v2055_v5  ;;  %v6987_v13 = vld [vmem:[#allocation57_spill] sm:$0xff]  ;;  %v2057_v36 = vadd.f32 %v2025_v40, %v1792_v50  ;;  %v3199_v26 = vld [vmem:[%s6695_s3 + $0x1f0] sm:$0xff] }
 0x264   : > { %2808 = vst.msk [vmem:[#allocation4 + $0x20] sm:$0xff] %vm2639_vm0, %v2768_v51  ;;  %v2425_v38 = vpop.permute.xlu1 %2424  ;;  %4125 = vmatpush3.bf16.msra.mxu1 %v4124_v22  ;;  %4095 = vmatprep.subr.bf16.mxu0 %v4094_v7  ;;  %v4128_v45 = vpack.c.bf16 %v3182_v12, %v3181_v18  ;;  %v442_v29 = vmul.f32 %v6988_v52, %v6987_v13  ;;  %v6989_v43 = vld [vmem:[#allocation58_spill] sm:$0xff]  ;;  %v6990_v4 = vld [vmem:[#allocation61_spill] sm:$0xff]  ;;  %v3200_v50 = vld [vmem:[%s6695_s3 + $0x1f8] sm:$0xff] }
 0x265   : > { %v2420_v33 = vpop.permute.xlu0 %2419  ;;  %v2552_v47 = vmul.f32 %v5858_v24, %v2425_v38  ;;  %v441_v21 = vmul.f32 %v6988_v52, %v6989_v43  ;;  %v444_v0 = vmul.f32 %v6988_v52, %v6990_v4  ;;  %v2824_v53 = vld [vmem:[#allocation4 + $0x8] sm:$0xff]  ;;  %4127 = vmatprep.subr.bf16.mxu1 %v4126_v30  ;;  %v2322_v57 = vadd.f32 %v2290_v61, %v2058_v17  ;;  %v3151_v9 = vld [vmem:[%s6695_s3 + $0x70] sm:$0xff]  ;;  %v3152_v46 = vld [vmem:[%s6695_s3 + $0x78] sm:$0xff] }
 0x266   : > { %v2551_v59 = vmul.f32 %v5858_v24, %v2420_v33  ;;  %v4098_v25 = vpack.c.bf16 %v3168_v42, %v3167_v35  ;;  %v2321_v15 = vadd.f32 %v2289_v23, %v2057_v36  ;;  %4097 = vmatpush3.bf16.msra.mxu0 %v4096_v16  ;;  %v4130_v51 = vpack.c.bf16 %v3200_v50, %v3199_v26  ;;  %v3183_v63 = vld [vmem:[%s6695_s3 + $0x170] sm:$0xff]  ;;  %v3184_v27 = vld [vmem:[%s6695_s3 + $0x178] sm:$0xff]  ;;  %v6991_v2 = vld [vmem:[#allocation77_spill] sm:$0xff] }
 0x267   : > { %v2584_v54 = vadd.f32 %v2552_v47, %v2320_v49  ;;  %v4100_v10 = vpack.c.bf16 %v3152_v46, %v3151_v9  ;;  %v706_v3 = vmul.f32 %v5668_v28, %v6991_v2  ;;  %v6992_v17 = vld [vmem:[#allocation78_spill] sm:$0xff]  ;;  %v4132_v62 = vpack.c.bf16 %v3184_v27, %v3183_v63  ;;  %v6994_v18 = vld [vmem:[#allocation79_spill] sm:$0xff]  ;;  %v6996_v13 = vld [vmem:[#allocation12_spill] sm:$0xff] }
 0x268   : > { %v2583_v11 = vadd.f32 %v2551_v59, %v2319_v41  ;;  %v2435_v31 = vpop.permute.xlu1 %2434  ;;  %4129 = vmatpush3.bf16.msra.mxu1 %v4128_v45  ;;  %4099 = vmatprep.subr.bf16.mxu0 %v4098_v25  ;;  %v705_v49 = vmul.f32 %v5668_v28, %v6992_v17  ;;  %v474_v48 = vadd.f32 %v5637_v19, %v442_v29  ;;  %v6993_v30 = vld [vmem:[#allocation62_spill] sm:$0xff]  ;;  %v6995_v59 = vld [vmem:[#allocation11_spill] sm:$0xff]  ;;  %v6998_v42 = vld [vmem:[#allocation13_spill] sm:$0xff] }
 0x269   : > { %v2430_v56 = vpop.permute.xlu0 %2429  ;;  %v2739_v5 = vld [vmem:[#allocation3 + $0x10] ss:$2 sm:$0xff]  ;;  %v2755_v39 = vld [vmem:[#allocation3 + $0x11] ss:$2 sm:$0xff]  ;;  %v2616_v8 = vmax.f32 %v2584_v54, 0.0  ;;  %v2554_v14 = vmul.f32 %v5858_v24, %v2435_v31  ;;  %4131 = vmatprep.subr.bf16.mxu1 %v4130_v51  ;;  %v473_v33 = vadd.f32 %v5637_v19, %v441_v21  ;;  %v443_v16 = vmul.f32 %v6988_v52, %v6993_v30  ;;  %v7001_v31 = vld [vmem:[#allocation14_spill] sm:$0xff] }
 0x26a   : > { %v2615_v40 = vmax.f32 %v2583_v11, 0.0  ;;  %v2553_v22 = vmul.f32 %v5858_v24, %v2430_v56  ;;  %v2769_v7 = vmax.f32 %v2739_v5, %v2755_v39  ;;  %v708_v12 = vmul.f32 %v5668_v28, %v6994_v18  ;;  %4101 = vmatpush3.bf16.msra.mxu0 %v4100_v10  ;;  %v7000_v11 = vld [vmem:[#allocation20_spill] sm:$0xff]  ;;  %v7003_v51 = vld [vmem:[#allocation39_spill] sm:$0xff]  ;;  %v7005_v17 = vld [vmem:[#allocation22_spill] sm:$0xff] }
 0x26b   : > { %v2952_v61 = vld [vmem:[#allocation4 + $0x21] sm:$0xff]  ;;  %2649 = vst.msk [vmem:[#allocation2 + $0x48] sm:$0xff] %vm2639_vm0, %v2616_v8  ;;  %v2586_v6 = vadd.f32 %v2554_v14, %v2322_v57  ;;  %v970_v45 = vmul.f32 %v5715_v1, %v6995_v59  ;;  %v969_v29 = vmul.f32 %v5715_v1, %v6996_v13  ;;  %v476_v52 = vadd.f32 %v5637_v19, %v444_v0  ;;  %v6999_v57 = vld [vmem:[#allocation19_spill] sm:$0xff]  ;;  %v7002_v5 = vld [vmem:[#allocation36_spill] sm:$0xff] }
 0x26c   : > { %2648 = vst.msk [vmem:[#allocation2 + $0x40] sm:$0xff] %vm2639_vm0, %v2615_v40  ;;  %v2585_v23 = vadd.f32 %v2553_v22, %v2321_v15  ;;  %v4234_v38 = vpack.i.bf16 %v2952_v61, %v2824_v53  ;;  %v6209_v41 = vpop.permute.xlu1 %2180  ;;  %2809 = vst.msk [vmem:[#allocation4 + $0x38] sm:$0xff] %vm2639_vm0, %v2769_v7  ;;  %4133 = vmatpush3.bf16.msra.mxu1 %v4132_v62  ;;  %v738_v4 = vadd.f32 %v706_v3, %v474_v48  ;;  %v6997_v53 = vld [vmem:[#allocation80_spill] sm:$0xff]  ;;  %v6241_v27 = vld [vmem:[#allocation4 + $0x20] sm:$0xff] }
 0x26d   : > { %v6211_v47 = vpop.permute.xlu0 %2175  ;;  %v2618_v43 = vmax.f32 %v2586_v6, 0.0  ;;  %v737_v36 = vadd.f32 %v705_v49, %v473_v33  ;;  %v707_v35 = vmul.f32 %v5668_v28, %v6997_v53  ;;  %v972_v26 = vmul.f32 %v5715_v1, %v6998_v42  ;;  %v6237_v63 = vld [vmem:[#allocation4 + $0x1f] sm:$0xff]  ;;  %v7006_v33 = vld [vmem:[#allocation67_spill] sm:$0xff] }
 0x26e   : > { %v2617_v21 = vmax.f32 %v2585_v23, 0.0  ;;  %4235 = vrot.lane.b32.xlu1 %v4234_v38, %s4387_s15  ;;  %v1235_v54 = vmul.f32 %v5936_v20, %v6999_v57  ;;  %v1234_v25 = vmul.f32 %v5936_v20, %v7000_v11  ;;  %v475_v0 = vadd.f32 %v5637_v19, %v443_v16  ;;  %v7004_v3 = vld [vmem:[#allocation21_spill] sm:$0xff]  ;;  %v7007_v16 = vld [vmem:[#allocation68_spill] sm:$0xff]  ;;  %v7009_v13 = vld [vmem:[#allocation43_spill] sm:$0xff] }
 0x26f   : > { %2651 = vst.msk [vmem:[#allocation2 + $0x58] sm:$0xff] %vm2639_vm0, %v2618_v43  ;;  %v740_v50 = vadd.f32 %v708_v12, %v476_v52  ;;  %v1002_v15 = vadd.f32 %v970_v45, %v738_v4  ;;  %v1001_v28 = vadd.f32 %v969_v29, %v737_v36  ;;  %v971_v56 = vmul.f32 %v5715_v1, %v7001_v31  ;;  %v4317_v38 = vld [vmem:[%s6693_s1 + $0x5] ss:$0 sm:$0xff]  ;;  %v7008_v59 = vld [vmem:[#allocation40_spill] sm:$0xff] }
 0x270   : > { %2650 = vst.msk [vmem:[#allocation2 + $0x50] sm:$0xff] %vm2639_vm0, %v2617_v21  ;;  %v2191_v9 = vpop.permute.xlu1 %2190  ;;  %v1499_v39 = vmul.f32 %v6007_v55, %v7002_v5  ;;  %v1498_v10 = vmul.f32 %v6007_v55, %v7003_v51  ;;  %v739_v8 = vadd.f32 %v707_v35, %v475_v0  ;;  %v1237_v1 = vmul.f32 %v5936_v20, %v7004_v3  ;;  %v7010_v57 = vld [vmem:[#allocation69_spill] sm:$0xff] }
 0x271   : > { %v2186_v46 = vpop.permute.xlu0 %2185  ;;  %v1004_v40 = vadd.f32 %v972_v26, %v740_v50  ;;  %v1267_v14 = vadd.f32 %v1235_v54, %v1002_v15  ;;  %v1266_v19 = vadd.f32 %v1234_v25, %v1001_v28  ;;  %v1236_v49 = vmul.f32 %v5936_v20, %v7005_v17 }
 0x272   : > { %v1003_v6 = vadd.f32 %v971_v56, %v739_v8  ;;  %v1763_v30 = vmul.f32 %v4317_v38, %v7006_v33  ;;  %v1762_v20 = vmul.f32 %v4317_v38, %v7007_v16  ;;  %v2677_v18 = vld [vmem:[#allocation2 + $0x48] sm:$0xff]  ;;  %v1501_v45 = vmul.f32 %v6007_v55, %v7008_v59 }
 0x273   : > { %v6239_v22 = vld [vmem:[#allocation4 + $0x38] sm:$0xff]  ;;  %v1531_v23 = vadd.f32 %v1499_v39, %v1267_v14  ;;  %v1530_v12 = vadd.f32 %v1498_v10, %v1266_v19  ;;  %v1500_v29 = vmul.f32 %v6007_v55, %v7009_v13  ;;  %v2676_v43 = vld [vmem:[#allocation2 + $0x40] sm:$0xff]  ;;  %v2028_v4 = vmul.f32 %v5812_v44, %v6076_v37  ;;  %v7011_v55 = vld [vmem:[#allocation70_spill] sm:$0xff] }
 0x274   : > { %v6243_v2 = vld [vmem:[#allocation4 + $0x39] sm:$0xff]  ;;  %v6249_v61 = vpop.permute.xlu1 %1936  ;;  %v4229_v62 = vpack.i.bf16 %v6239_v22, %v6237_v63  ;;  %v2027_v36 = vmul.f32 %v5812_v44, %v6078_v58  ;;  %v1269_v42 = vadd.f32 %v1237_v1, %v1004_v40  ;;  %v1268_v26 = vadd.f32 %v1236_v49, %v1003_v6 }
 0x275   : > { %v6251_v7 = vpop.permute.xlu0 %1931  ;;  %v4244_v48 = vpack.i.bf16 %v6243_v2, %v6241_v27  ;;  %v1765_v54 = vmul.f32 %v4317_v38, %v7010_v57  ;;  %v1764_v11 = vmul.f32 %v4317_v38, %v7011_v55  ;;  %v1795_v50 = vadd.f32 %v1763_v30, %v1531_v23 }
 0x276   : > { %v2694_v21 = vld [vmem:[#allocation2 + $0x58] sm:$0xff]  ;;  %4230 = vrot.lane.b32.xlu0 %v4229_v62, %s4387_s15  ;;  %v1794_v15 = vadd.f32 %v1762_v20, %v1530_v12  ;;  %v2292_v37 = vmul.f32 %v5831_v60, %v6209_v41  ;;  %v2291_v58 = vmul.f32 %v5831_v60, %v6211_v47  ;;  %v1533_v28 = vadd.f32 %v1501_v45, %v1269_v42 }
 0x277   : > { %v2693_v52 = vld [vmem:[#allocation2 + $0x50] sm:$0xff]  ;;  %4245 = vrot.lane.b32.xlu1 %v4244_v48, %s4387_s15  ;;  %v2710_v53 = vmax.f32 %v2677_v18, %v2694_v21  ;;  %v1532_v31 = vadd.f32 %v1500_v29, %v1268_v26  ;;  %v2030_v56 = vmul.f32 %v5812_v44, %v6112_v34  ;;  %v2029_v5 = vmul.f32 %v5812_v44, %v6114_v32 }
 0x278   : > { %v2709_v35 = vmax.f32 %v2676_v43, %v2693_v52  ;;  %v6274_v25 = vpop.permute.xlu1 %1946  ;;  %v2060_v39 = vadd.f32 %v2028_v4, %v1795_v50  ;;  %v2059_v51 = vadd.f32 %v2027_v36, %v1794_v15  ;;  %v1797_v10 = vadd.f32 %v1765_v54, %v1533_v28  ;;  %v6299_v4 = vld [vmem:[#allocation4 + $0x37] sm:$0xff] }
 0x279   : > { %v6276_v0 = vpop.permute.xlu0 %1941  ;;  %2726 = vst.msk [vmem:[#allocation3 + $0x28] sm:$0xff] %vm2639_vm0, %v2710_v53  ;;  %v1796_v8 = vadd.f32 %v1764_v11, %v1532_v31  ;;  %v2294_v40 = vmul.f32 %v5831_v60, %v2191_v9  ;;  %v2293_v14 = vmul.f32 %v5831_v60, %v2186_v46  ;;  %v2032_v15 = vmul.f32 %v5812_v44, %v6249_v61 }
 0x27a   : > { %2725 = vst.msk [vmem:[#allocation3 + $0x20] sm:$0xff] %vm2639_vm0, %v2709_v35  ;;  %v2324_v3 = vadd.f32 %v2292_v37, %v2060_v39  ;;  %v2323_v47 = vadd.f32 %v2291_v58, %v2059_v51  ;;  %v2062_v34 = vadd.f32 %v2030_v56, %v1797_v10  ;;  %v2031_v37 = vmul.f32 %v5812_v44, %v6251_v7  ;;  %v7012_v51 = vld [vmem:[#allocation71_spill] sm:$0xff] }
 0x27b   : > { %v2061_v49 = vadd.f32 %v2029_v5, %v1796_v8  ;;  %v2034_v61 = vmul.f32 %v5812_v44, %v6274_v25  ;;  %v2033_v7 = vmul.f32 %v5812_v44, %v6276_v0  ;;  %v2064_v10 = vadd.f32 %v2032_v15, %v7012_v51  ;;  %v7013_v8 = vld [vmem:[#allocation72_spill] sm:$0xff]  ;;  %v7014_v25 = vld [vmem:[#allocation73_spill] sm:$0xff] }
 0x27c   : > { %v2445_v41 = vpop.permute.xlu1 %2444  ;;  %v2326_v48 = vadd.f32 %v2294_v40, %v2062_v34  ;;  %v2063_v40 = vadd.f32 %v2031_v37, %v7013_v8  ;;  %v6380_v8 = vld [vmem:[%s6693_s1 + $0x7] ss:$0 sm:$0xff] }
 0x27d   : > { %v2440_v19 = vpop.permute.xlu0 %2439  ;;  %v2556_v1 = vmul.f32 %v5858_v24, %v2445_v41  ;;  %v2325_v6 = vadd.f32 %v2293_v14, %v2061_v49  ;;  %v2066_v49 = vadd.f32 %v2034_v61, %v7014_v25 }
 0x27e   : > { %v2555_v17 = vmul.f32 %v5858_v24, %v2440_v19 }
 0x27f   : > { %v2588_v62 = vadd.f32 %v2556_v1, %v2324_v3 }
 0x280   : > { %v2587_v32 = vadd.f32 %v2555_v17, %v2323_v47  ;;  %v2455_v23 = vpop.permute.xlu1 %2454 }
 0x281   : > { %v2450_v38 = vpop.permute.xlu0 %2449  ;;  %v2741_v33 = vld [vmem:[#allocation3 + $0x20] ss:$2 sm:$0xff]  ;;  %v2757_v9 = vld [vmem:[#allocation3 + $0x21] ss:$2 sm:$0xff]  ;;  %v2620_v30 = vmax.f32 %v2588_v62, 0.0  ;;  %v2558_v16 = vmul.f32 %v5858_v24, %v2455_v23 }
 0x282   : > { %v2619_v46 = vmax.f32 %v2587_v32, 0.0  ;;  %v2557_v20 = vmul.f32 %v5858_v24, %v2450_v38  ;;  %v2770_v18 = vmax.f32 %v2741_v33, %v2757_v9  ;;  %v7015_v62 = vld [vmem:[#allocation74_spill] sm:$0xff] }
 0x283   : > { %2653 = vst.msk [vmem:[#allocation2 + $0x68] sm:$0xff] %vm2639_vm0, %v2620_v30  ;;  %v2590_v12 = vadd.f32 %v2558_v16, %v2326_v48  ;;  %v2065_v44 = vadd.f32 %v2033_v7, %v7015_v62 }
 0x284   : > { %2652 = vst.msk [vmem:[#allocation2 + $0x60] sm:$0xff] %vm2639_vm0, %v2619_v46  ;;  %v2589_v59 = vadd.f32 %v2557_v20, %v2325_v6  ;;  %v2201_v45 = vpop.permute.xlu1 %2200  ;;  %2810 = vst.msk [vmem:[#allocation4 + $0x50] sm:$0xff] %vm2639_vm0, %v2770_v18 }
 0x285   : > { %v2196_v13 = vpop.permute.xlu0 %2195  ;;  %v2622_v29 = vmax.f32 %v2590_v12, 0.0  ;;  %v2296_v5 = vmul.f32 %v5831_v60, %v2201_v45 }
 0x286   : > { %v2621_v43 = vmax.f32 %v2589_v59, 0.0  ;;  %v2295_v39 = vmul.f32 %v5831_v60, %v2196_v13 }
 0x287   : > { %2655 = vst.msk [vmem:[#allocation2 + $0x78] sm:$0xff] %vm2639_vm0, %v2622_v29  ;;  %v2328_v47 = vadd.f32 %v2296_v5, %v2064_v10 }
 0x288   : > { %2654 = vst.msk [vmem:[#allocation2 + $0x70] sm:$0xff] %vm2639_vm0, %v2621_v43  ;;  %v2211_v21 = vpop.permute.xlu1 %2210  ;;  %v2327_v1 = vadd.f32 %v2295_v39, %v2063_v40 }
 0x289   : > { %v2206_v52 = vpop.permute.xlu0 %2205  ;;  %v2298_v14 = vmul.f32 %v5831_v60, %v2211_v21 }
 0x28a   : > { %v2679_v54 = vld [vmem:[#allocation2 + $0x68] sm:$0xff]  ;;  %v2297_v41 = vmul.f32 %v5831_v60, %v2206_v52 }
 0x28b   : > { %v6301_v36 = vld [vmem:[#allocation4 + $0x50] sm:$0xff]  ;;  %v2678_v55 = vld [vmem:[#allocation2 + $0x60] sm:$0xff]  ;;  %v2330_v48 = vadd.f32 %v2298_v14, %v2066_v49 }
 0x28c   : > { %v6303_v53 = vld [vmem:[#allocation4 + $0x51] sm:$0xff]  ;;  %v6305_v35 = vpop.permute.xlu1 %1956  ;;  %v4239_v26 = vpack.i.bf16 %v6301_v36, %v6299_v4  ;;  %v2329_v6 = vadd.f32 %v2297_v41, %v2065_v44  ;;  %v6395_v44 = vld [vmem:[%s6693_s1 + $0x8] ss:$0 sm:$0xff] }
 0x28d   : > { %v6307_v42 = vpop.permute.xlu0 %1951  ;;  %v4254_v57 = vpack.i.bf16 %v6303_v53, %v6239_v22  ;;  %v7016_v41 = vld [vmem:[#allocation75_spill] sm:$0xff] }
 0x28e   : > { %v2696_v11 = vld [vmem:[#allocation2 + $0x78] sm:$0xff]  ;;  %4240 = vrot.lane.b32.xlu0 %v4239_v26, %s4387_s15 }
 0x28f   : > { %v2695_v50 = vld [vmem:[#allocation2 + $0x70] sm:$0xff]  ;;  %4255 = vrot.lane.b32.xlu1 %v4254_v57, %s4387_s15  ;;  %v2712_v58 = vmax.f32 %v2679_v54, %v2696_v11 }
 0x290   : > { %v2711_v28 = vmax.f32 %v2678_v55, %v2695_v50  ;;  %v6319_v31 = vpop.permute.xlu1 %1966 }
 0x291   : > { %v6321_v56 = vpop.permute.xlu0 %1961  ;;  %2728 = vst.msk [vmem:[#allocation3 + $0x38] sm:$0xff] %vm2639_vm0, %v2712_v58 }
 0x292   : > { %2727 = vst.msk [vmem:[#allocation3 + $0x30] sm:$0xff] %vm2639_vm0, %v2711_v28  ;;  %v6365_v28 = vld [vmem:[%s6693_s1 + $0x6] ss:$0 sm:$0xff] }
 0x293   : > { %v2036_v5 = vmul.f32 %v6365_v28, %v6305_v35  ;;  %v2035_v39 = vmul.f32 %v6365_v28, %v6307_v42  ;;  %v2038_v42 = vmul.f32 %v6365_v28, %v6319_v31  ;;  %v2037_v14 = vmul.f32 %v6365_v28, %v6321_v56 }
 0x294   : > { %v2465_v19 = vpop.permute.xlu1 %2464 }
 0x295   : > { %v2460_v3 = vpop.permute.xlu0 %2459  ;;  %v2560_v17 = vmul.f32 %v5858_v24, %v2465_v19  ;;  %v2068_v19 = vadd.f32 %v2036_v5, %v7016_v41 }
 0x296   : > { %v2559_v34 = vmul.f32 %v5858_v24, %v2460_v3  ;;  %v7017_v3 = vld [vmem:[#allocation76_spill] sm:$0xff] }
 0x297   : > { %v2592_v0 = vadd.f32 %v2560_v17, %v2328_v47  ;;  %v2067_v47 = vadd.f32 %v2035_v39, %v7017_v3 }
 0x298   : > { %v2591_v32 = vadd.f32 %v2559_v34, %v2327_v1  ;;  %v2475_v23 = vpop.permute.xlu1 %2474 }
 0x299   : > { %v2470_v38 = vpop.permute.xlu0 %2469  ;;  %v2743_v33 = vld [vmem:[#allocation3 + $0x30] ss:$2 sm:$0xff]  ;;  %v2759_v60 = vld [vmem:[#allocation3 + $0x31] ss:$2 sm:$0xff]  ;;  %v2624_v9 = vmax.f32 %v2592_v0, 0.0  ;;  %v2562_v46 = vmul.f32 %v5858_v24, %v2475_v23  ;;  %v7018_v0 = vld [vmem:[#allocation81_spill] sm:$0xff] }
 0x29a   : > { %v2623_v30 = vmax.f32 %v2591_v32, 0.0  ;;  %v2561_v16 = vmul.f32 %v5858_v24, %v2470_v38  ;;  %v2771_v20 = vmax.f32 %v2743_v33, %v2759_v60  ;;  %v6346_v24 = vld [vmem:[#allocation4 + $0x4f] sm:$0xff]  ;;  %v2070_v32 = vadd.f32 %v2038_v42, %v7018_v0 }
 0x29b   : > { %2657 = vst.msk [vmem:[#allocation2 + $0x88] sm:$0xff] %vm2639_vm0, %v2624_v9  ;;  %v2594_v18 = vadd.f32 %v2562_v46, %v2330_v48  ;;  %v7019_v48 = vld [vmem:[#allocation82_spill] sm:$0xff] }
 0x29c   : > { %2656 = vst.msk [vmem:[#allocation2 + $0x80] sm:$0xff] %vm2639_vm0, %v2623_v30  ;;  %v2593_v12 = vadd.f32 %v2561_v16, %v2329_v6  ;;  %v2221_v59 = vpop.permute.xlu1 %2220  ;;  %2811 = vst.msk [vmem:[#allocation4 + $0x68] sm:$0xff] %vm2639_vm0, %v2771_v20  ;;  %v2069_v6 = vadd.f32 %v2037_v14, %v7019_v48 }
 0x29d   : > { %v2216_v45 = vpop.permute.xlu0 %2215  ;;  %v2626_v13 = vmax.f32 %v2594_v18, 0.0  ;;  %v2300_v35 = vmul.f32 %v6380_v8, %v2221_v59 }
 0x29e   : > { %v2625_v29 = vmax.f32 %v2593_v12, 0.0  ;;  %v2299_v40 = vmul.f32 %v6380_v8, %v2216_v45 }
 0x29f   : > { %2659 = vst.msk [vmem:[#allocation2 + $0x98] sm:$0xff] %vm2639_vm0, %v2626_v13  ;;  %v2332_v49 = vadd.f32 %v2300_v35, %v2068_v19 }
 0x2a0   : > { %2658 = vst.msk [vmem:[#allocation2 + $0x90] sm:$0xff] %vm2639_vm0, %v2625_v29  ;;  %v2231_v43 = vpop.permute.xlu1 %2230  ;;  %v2331_v62 = vadd.f32 %v2299_v40, %v2067_v47 }
 0x2a1   : > { %v2226_v21 = vpop.permute.xlu0 %2225  ;;  %v2302_v1 = vmul.f32 %v6380_v8, %v2231_v43 }
 0x2a2   : > { %v2681_v50 = vld [vmem:[#allocation2 + $0x88] sm:$0xff]  ;;  %v2301_v17 = vmul.f32 %v6380_v8, %v2226_v21 }
 0x2a3   : > { %v6348_v52 = vld [vmem:[#allocation4 + $0x68] sm:$0xff]  ;;  %v2680_v15 = vld [vmem:[#allocation2 + $0x80] sm:$0xff]  ;;  %v2334_v33 = vadd.f32 %v2302_v1, %v2070_v32 }
 0x2a4   : > { %v6350_v26 = vld [vmem:[#allocation4 + $0x69] sm:$0xff]  ;;  %v6352_v57 = vpop.permute.xlu1 %1976  ;;  %v4249_v55 = vpack.i.bf16 %v6348_v52, %v6346_v24  ;;  %v2333_v60 = vadd.f32 %v2301_v17, %v2069_v6 }
 0x2a5   : > { %v6354_v54 = vpop.permute.xlu0 %1971  ;;  %v4264_v11 = vpack.i.bf16 %v6350_v26, %v6301_v36  ;;  %v2040_v19 = vmul.f32 %v6365_v28, %v6352_v57 }
 0x2a6   : > { %v2698_v37 = vld [vmem:[#allocation2 + $0x98] sm:$0xff]  ;;  %4250 = vrot.lane.b32.xlu0 %v4249_v55, %s4387_s15  ;;  %v2039_v3 = vmul.f32 %v6365_v28, %v6354_v54 }
 0x2a7   : > { %v2697_v58 = vld [vmem:[#allocation2 + $0x90] sm:$0xff]  ;;  %4265 = vrot.lane.b32.xlu1 %v4264_v11, %s4387_s15  ;;  %v2714_v61 = vmax.f32 %v2681_v50, %v2698_v37  ;;  %v6408_v37 = vld [vmem:[#allocation4 + $0x67] sm:$0xff] }
 0x2a8   : > { %v2713_v7 = vmax.f32 %v2680_v15, %v2697_v58  ;;  %v6371_v51 = vpop.permute.xlu1 %1986 }
 0x2a9   : > { %v6373_v10 = vpop.permute.xlu0 %1981  ;;  %2730 = vst.msk [vmem:[#allocation3 + $0x48] sm:$0xff] %vm2639_vm0, %v2714_v61 }
 0x2aa   : > { %2729 = vst.msk [vmem:[#allocation3 + $0x40] sm:$0xff] %vm2639_vm0, %v2713_v7  ;;  %v2041_v57 = vmul.f32 %v6365_v28, %v6373_v10 }
 0x2ac   : > { %v2485_v34 = vpop.permute.xlu1 %2484 }
 0x2ad   : > { %v2480_v25 = vpop.permute.xlu0 %2479  ;;  %v2564_v31 = vmul.f32 %v6395_v44, %v2485_v34 }
 0x2ae   : > { %v2563_v56 = vmul.f32 %v6395_v44, %v2480_v25 }
 0x2af   : > { %v2596_v23 = vadd.f32 %v2564_v31, %v2332_v49  ;;  %v7020_v31 = vld [vmem:[#allocation83_spill] sm:$0xff] }
 0x2b0   : > { %v2595_v38 = vadd.f32 %v2563_v56, %v2331_v62  ;;  %v2495_v9 = vpop.permute.xlu1 %2494  ;;  %v2042_v62 = vmul.f32 %v6365_v28, %v6371_v51  ;;  %v2072_v54 = vadd.f32 %v2040_v19, %v7020_v31  ;;  %v7021_v56 = vld [vmem:[#allocation84_spill] sm:$0xff]  ;;  %v7022_v51 = vld [vmem:[#allocation85_spill] sm:$0xff]  ;;  %v3202_v19 = vld [vmem:[%s6695_s3 + $0x208] sm:$0xff] }
 0x2b1   : > { %v2490_v30 = vpop.permute.xlu0 %2489  ;;  %v2745_v46 = vld [vmem:[#allocation3 + $0x40] ss:$2 sm:$0xff]  ;;  %v2761_v16 = vld [vmem:[#allocation3 + $0x41] ss:$2 sm:$0xff]  ;;  %v2628_v20 = vmax.f32 %v2596_v23, 0.0  ;;  %v2566_v12 = vmul.f32 %v6395_v44, %v2495_v9  ;;  %v2071_v0 = vadd.f32 %v2039_v3, %v7021_v56  ;;  %v7025_v56 = vld [vmem:[#allocation88_spill] sm:$0xff] }
 0x2b2   : > { %v2627_v18 = vmax.f32 %v2595_v38, 0.0  ;;  %v2565_v59 = vmul.f32 %v6395_v44, %v2490_v30  ;;  %v2772_v45 = vmax.f32 %v2745_v46, %v2761_v16  ;;  %v2074_v30 = vadd.f32 %v2042_v62, %v7022_v51  ;;  %v7023_v46 = vld [vmem:[#allocation86_spill] sm:$0xff] }
 0x2b3   : > { %2661 = vst.msk [vmem:[#allocation2 + $0xa8] sm:$0xff] %vm2639_vm0, %v2628_v20  ;;  %v2598_v13 = vadd.f32 %v2566_v12, %v2334_v33  ;;  %v2073_v10 = vadd.f32 %v2041_v57, %v7023_v46 }
 0x2b4   : > { %2660 = vst.msk [vmem:[#allocation2 + $0xa0] sm:$0xff] %vm2639_vm0, %v2627_v18  ;;  %v2597_v29 = vadd.f32 %v2565_v59, %v2333_v60  ;;  %v2241_v43 = vpop.permute.xlu1 %2240  ;;  %2812 = vst.msk [vmem:[#allocation4 + $0x80] sm:$0xff] %vm2639_vm0, %v2772_v45 }
 0x2b5   : > { %v2236_v21 = vpop.permute.xlu0 %2235  ;;  %v2630_v55 = vmax.f32 %v2598_v13, 0.0  ;;  %v2304_v25 = vmul.f32 %v6380_v8, %v2241_v43 }
 0x2b6   : > { %v2629_v11 = vmax.f32 %v2597_v29, 0.0  ;;  %v2303_v49 = vmul.f32 %v6380_v8, %v2236_v21 }
 0x2b7   : > { %2663 = vst.msk [vmem:[#allocation2 + $0xb8] sm:$0xff] %vm2639_vm0, %v2630_v55  ;;  %v2336_v38 = vadd.f32 %v2304_v25, %v2072_v54  ;;  %v7024_v54 = vld [vmem:[#allocation87_spill] sm:$0xff] }
 0x2b8   : > { %2662 = vst.msk [vmem:[#allocation2 + $0xb0] sm:$0xff] %vm2639_vm0, %v2629_v11  ;;  %v2251_v50 = vpop.permute.xlu1 %2250  ;;  %v2335_v33 = vadd.f32 %v2303_v49, %v2071_v0 }
 0x2b9   : > { %v2246_v15 = vpop.permute.xlu0 %2245  ;;  %v2306_v32 = vmul.f32 %v6380_v8, %v2251_v50 }
 0x2ba   : > { %v2683_v40 = vld [vmem:[#allocation2 + $0xa8] sm:$0xff]  ;;  %v2305_v48 = vmul.f32 %v6380_v8, %v2246_v15 }
 0x2bb   : > { %v6410_v58 = vld [vmem:[#allocation4 + $0x80] sm:$0xff]  ;;  %v2338_v18 = vadd.f32 %v2306_v32, %v2074_v30 }
 0x2bc   : > { %v6412_v5 = vld [vmem:[#allocation4 + $0x81] sm:$0xff]  ;;  %v1997_v39 = vpop.permute.xlu1 %1996  ;;  %v4259_v7 = vpack.i.bf16 %v6410_v58, %v6408_v37  ;;  %v2337_v12 = vadd.f32 %v2305_v48, %v2073_v10 }
 0x2bd   : > { %v1992_v61 = vpop.permute.xlu0 %1991  ;;  %v4274_v35 = vpack.i.bf16 %v6412_v5, %v6348_v52  ;;  %v2682_v42 = vld [vmem:[#allocation2 + $0xa0] sm:$0xff] }
 0x2be   : > { %v2700_v14 = vld [vmem:[#allocation2 + $0xb8] sm:$0xff]  ;;  %4260 = vrot.lane.b32.xlu0 %v4259_v7, %s4387_s15  ;;  %v7026_v10 = vld [vmem:[#allocation89_spill] sm:$0xff] }
 0x2bf   : > { %v2699_v41 = vld [vmem:[#allocation2 + $0xb0] sm:$0xff]  ;;  %4275 = vrot.lane.b32.xlu1 %v4274_v35, %s4387_s15  ;;  %v2716_v47 = vmax.f32 %v2683_v40, %v2700_v14  ;;  %v6465_v32 = vld [vmem:[#allocation4 + $0x7f] sm:$0xff] }
 0x2c0   : > { %v2715_v1 = vmax.f32 %v2682_v42, %v2699_v41  ;;  %v2007_v17 = vpop.permute.xlu1 %2006  ;;  %v3201_v41 = vld [vmem:[%s6695_s3 + $0x200] sm:$0xff] }
 0x2c1   : > { %v2002_v34 = vpop.permute.xlu0 %2001  ;;  %2732 = vst.msk [vmem:[#allocation3 + $0x58] sm:$0xff] %vm2639_vm0, %v2716_v47  ;;  %v6451_v3 = vpack.c.bf16 %v3202_v19, %v3201_v41  ;;  %v2044_v47 = vmul.f32 %v6365_v28, %v1997_v39  ;;  %v2046_v31 = vmul.f32 %v6365_v28, %v2007_v17 }
 0x2c2   : > { %2731 = vst.msk [vmem:[#allocation3 + $0x50] sm:$0xff] %vm2639_vm0, %v2715_v1  ;;  %v2043_v1 = vmul.f32 %v6365_v28, %v1992_v61  ;;  %v2045_v39 = vmul.f32 %v6365_v28, %v2002_v34 }
 0x2c3   : > { %4135 = vmatprep.subr.bf16.mxu0 %v6451_v3  ;;  %4166 = vmatprep.subr.bf16.mxu1 %v6451_v3  ;;  %v2076_v61 = vadd.f32 %v2044_v47, %v7024_v54 }
 0x2c4   : > { %v2505_v6 = vpop.permute.xlu1 %2504  ;;  %v2075_v0 = vadd.f32 %v2043_v1, %v7025_v56 }
 0x2c5   : > { %v2500_v23 = vpop.permute.xlu0 %2499  ;;  %v2568_v60 = vmul.f32 %v6395_v44, %v2505_v6 }
 0x2c6   : > { %v2567_v9 = vmul.f32 %v6395_v44, %v2500_v23 }
 0x2c7   : > { %v2600_v16 = vadd.f32 %v2568_v60, %v2336_v38 }
 0x2c8   : > { %v2599_v20 = vadd.f32 %v2567_v9, %v2335_v33  ;;  %v2515_v59 = vpop.permute.xlu1 %2514 }
 0x2c9   : > { %v2510_v45 = vpop.permute.xlu0 %2509  ;;  %v2747_v13 = vld [vmem:[#allocation3 + $0x50] ss:$2 sm:$0xff]  ;;  %v2763_v29 = vld [vmem:[#allocation3 + $0x51] ss:$2 sm:$0xff]  ;;  %v2632_v43 = vmax.f32 %v2600_v16, 0.0  ;;  %v2570_v55 = vmul.f32 %v6395_v44, %v2515_v59  ;;  %v2078_v16 = vadd.f32 %v2046_v31, %v7026_v10 }
 0x2ca   : > { %v2631_v21 = vmax.f32 %v2599_v20, 0.0  ;;  %v2569_v11 = vmul.f32 %v6395_v44, %v2510_v45  ;;  %v2773_v50 = vmax.f32 %v2747_v13, %v2763_v29  ;;  %v7027_v20 = vld [vmem:[#allocation90_spill] sm:$0xff] }
 0x2cb   : > { %2665 = vst.msk [vmem:[#allocation2 + $0xc8] sm:$0xff] %vm2639_vm0, %v2632_v43  ;;  %v2602_v15 = vadd.f32 %v2570_v55, %v2338_v18  ;;  %v2077_v18 = vadd.f32 %v2045_v39, %v7027_v20 }
 0x2cc   : > { %2664 = vst.msk [vmem:[#allocation2 + $0xc0] sm:$0xff] %vm2639_vm0, %v2631_v21  ;;  %v2601_v7 = vadd.f32 %v2569_v11, %v2337_v12  ;;  %v2261_v35 = vpop.permute.xlu1 %2260  ;;  %2813 = vst.msk [vmem:[#allocation4 + $0x98] sm:$0xff] %vm2639_vm0, %v2773_v50 }
 0x2cd   : > { %v2256_v40 = vpop.permute.xlu0 %2255  ;;  %v2634_v42 = vmax.f32 %v2602_v15, 0.0  ;;  %v2308_v62 = vmul.f32 %v6380_v8, %v2261_v35 }
 0x2ce   : > { %v2633_v14 = vmax.f32 %v2601_v7, 0.0  ;;  %v2307_v57 = vmul.f32 %v6380_v8, %v2256_v40 }
 0x2cf   : > { %2667 = vst.msk [vmem:[#allocation2 + $0xd8] sm:$0xff] %vm2639_vm0, %v2634_v42  ;;  %v2340_v9 = vadd.f32 %v2308_v62, %v2076_v61 }
 0x2d0   : > { %2666 = vst.msk [vmem:[#allocation2 + $0xd0] sm:$0xff] %vm2639_vm0, %v2633_v14  ;;  %v2271_v25 = vpop.permute.xlu1 %2270  ;;  %v2339_v51 = vadd.f32 %v2307_v57, %v2075_v0 }
 0x2d1   : > { %v2266_v49 = vpop.permute.xlu0 %2265  ;;  %v2310_v23 = vmul.f32 %v6380_v8, %v2271_v25 }
 0x2d2   : > { %v2309_v38 = vmul.f32 %v6380_v8, %v2266_v49  ;;  %v2685_v34 = vld [vmem:[#allocation2 + $0xc8] sm:$0xff] }
 0x2d3   : > { %v6467_v48 = vld [vmem:[#allocation4 + $0x98] sm:$0xff]  ;;  %v2684_v8 = vld [vmem:[#allocation2 + $0xc0] sm:$0xff]  ;;  %v2342_v21 = vadd.f32 %v2310_v23, %v2078_v16  ;;  %v2880_v23 = vld [vmem:[#allocation4 + $0x9] sm:$0xff] }
 0x2d4   : > { %v6469_v6 = vld [vmem:[#allocation4 + $0x99] sm:$0xff]  ;;  %v2525_v33 = vpop.permute.xlu1 %2524  ;;  %v4269_v17 = vpack.i.bf16 %v6467_v48, %v6465_v32  ;;  %v2341_v55 = vadd.f32 %v2309_v38, %v2077_v18 }
 0x2d5   : > { %v2520_v60 = vpop.permute.xlu0 %2519  ;;  %v4284_v28 = vpack.i.bf16 %v6469_v6, %v6410_v58  ;;  %v2572_v30 = vmul.f32 %v6395_v44, %v2525_v33 }
 0x2d6   : > { %v2571_v46 = vmul.f32 %v6395_v44, %v2520_v60  ;;  %v2702_v12 = vld [vmem:[#allocation2 + $0xd8] sm:$0xff]  ;;  %4270 = vrot.lane.b32.xlu0 %v4269_v17, %s4387_s15  ;;  %v2816_v60 = vld [vmem:[#allocation4 + $0x7] sm:$0xff]  ;;  %v3203_v17 = vld [vmem:[%s6695_s3 + $0x210] sm:$0xff] }
 0x2d7   : > { %v2701_v59 = vld [vmem:[#allocation2 + $0xd0] sm:$0xff]  ;;  %4285 = vrot.lane.b32.xlu1 %v4284_v28, %s4387_s15  ;;  %v2718_v45 = vmax.f32 %v2685_v34, %v2702_v12  ;;  %v2604_v29 = vadd.f32 %v2572_v30, %v2340_v9  ;;  %v3204_v28 = vld [vmem:[%s6695_s3 + $0x218] sm:$0xff]  ;;  %v3205_v12 = vld [vmem:[%s6695_s3 + $0x220] sm:$0xff] }
 0x2d8   : > { %v2717_v13 = vmax.f32 %v2684_v8, %v2701_v59  ;;  %v2603_v43 = vadd.f32 %v2571_v46, %v2339_v51  ;;  %v2535_v11 = vpop.permute.xlu1 %2534  ;;  %v6500_v34 = vld [vmem:[#allocation4 + $0x97] sm:$0xff]  ;;  %v4138_v8 = vpack.c.bf16 %v3204_v28, %v3203_v17  ;;  %v3206_v59 = vld [vmem:[%s6695_s3 + $0x228] sm:$0xff] }
 0x2d9   : > { %v2530_v50 = vpop.permute.xlu0 %2529  ;;  %2734 = vst.msk [vmem:[#allocation3 + $0x68] sm:$0xff] %vm2639_vm0, %v2718_v45  ;;  %v2636_v15 = vmax.f32 %v2604_v29, 0.0  ;;  %v2574_v35 = vmul.f32 %v6395_v44, %v2535_v11  ;;  %v3210_v11 = vld [vmem:[%s6695_s3 + $0x248] sm:$0xff] }
 0x2da   : > { %2733 = vst.msk [vmem:[#allocation3 + $0x60] sm:$0xff] %vm2639_vm0, %v2717_v13  ;;  %v2635_v7 = vmax.f32 %v2603_v43, 0.0  ;;  %v2573_v40 = vmul.f32 %v6395_v44, %v2530_v50  ;;  %v4142_v13 = vpack.c.bf16 %v3206_v59, %v3205_v12  ;;  %v3207_v43 = vld [vmem:[%s6695_s3 + $0x230] sm:$0xff] }
 0x2db   : > { %2669 = vst.msk [vmem:[#allocation2 + $0xe8] sm:$0xff] %vm2639_vm0, %v2636_v15  ;;  %v2606_v42 = vadd.f32 %v2574_v35, %v2342_v21  ;;  %v3208_v21 = vld [vmem:[%s6695_s3 + $0x238] sm:$0xff]  ;;  %v3211_v15 = vld [vmem:[%s6695_s3 + $0x250] sm:$0xff] }
 0x2dc   : > { %2668 = vst.msk [vmem:[#allocation2 + $0xe0] sm:$0xff] %vm2639_vm0, %v2635_v7  ;;  %v2605_v14 = vadd.f32 %v2573_v40, %v2341_v55  ;;  %v3209_v55 = vld [vmem:[%s6695_s3 + $0x240] sm:$0xff]  ;;  %v3212_v7 = vld [vmem:[%s6695_s3 + $0x258] sm:$0xff] }
 0x2dd   : > { %v2638_v41 = vmax.f32 %v2606_v42, 0.0  ;;  %v4150_v50 = vpack.c.bf16 %v3210_v11, %v3209_v55 }
 0x2de   : > { %v2637_v19 = vmax.f32 %v2605_v14, 0.0 }
 0x2df   : > { %2671 = vst.msk [vmem:[#allocation2 + $0xf8] sm:$0xff] %vm2639_vm0, %v2638_v41 }
 0x2e0   : > { %2670 = vst.msk [vmem:[#allocation2 + $0xf0] sm:$0xff] %vm2639_vm0, %v2637_v19  ;;  %v4236_v62 = vpop.permute.xlu1 %4235 }
 0x2e1   : > { %v2749_v47 = vld [vmem:[#allocation3 + $0x60] ss:$2 sm:$0xff]  ;;  %v2765_v1 = vld [vmem:[#allocation3 + $0x61] ss:$2 sm:$0xff]  ;;  %v4238_v61 = vunpack.i.h.bf16 %v4236_v62  ;;  %v4237_v56 = vunpack.i.l.bf16 %v4236_v62 }
 0x2e2   : > { %v2774_v25 = vmax.f32 %v2749_v47, %v2765_v1  ;;  %v2687_v49 = vld [vmem:[#allocation2 + $0xe8] sm:$0xff]  ;;  %v3024_v47 = vld [vmem:[#allocation4 + $0xe0] sm:$0xff]  ;;  %v4154_v1 = vpack.c.bf16 %v3212_v7, %v3211_v15 }
 0x2e3   : > { %v2686_v44 = vld [vmem:[#allocation2 + $0xe0] sm:$0xff]  ;;  %v2864_v20 = vsel %vm2639_vm0, %v2816_v60, %v4237_v56  ;;  %v2992_v18 = vsel %vm2639_vm0, %v6241_v27, %v4238_v61  ;;  %v3215_v56 = vld [vmem:[%s6695_s3 + $0x270] sm:$0xff] }
 0x2e4   : > { %2814 = vst.msk [vmem:[#allocation4 + $0xb0] sm:$0xff] %vm2639_vm0, %v2774_v25  ;;  %v3213_v62 = vld [vmem:[%s6695_s3 + $0x260] sm:$0xff] }
 0x2e6   : > { %v2704_v57 = vld [vmem:[#allocation2 + $0xf8] sm:$0xff] }
 0x2e7   : > { %v2703_v31 = vld [vmem:[#allocation2 + $0xf0] sm:$0xff]  ;;  %v2720_v39 = vmax.f32 %v2687_v49, %v2704_v57 }
 0x2e8   : > { %v2719_v54 = vmax.f32 %v2686_v44, %v2703_v31  ;;  %v4231_v0 = vpop.permute.xlu0 %4230  ;;  %v3214_v44 = vld [vmem:[%s6695_s3 + $0x268] sm:$0xff] }
 0x2e9   : > { %2736 = vst.msk [vmem:[#allocation3 + $0x78] sm:$0xff] %vm2639_vm0, %v2720_v39  ;;  %v4233_v38 = vunpack.i.h.bf16 %v4231_v0  ;;  %v4232_v33 = vunpack.i.l.bf16 %v4231_v0  ;;  %v4246_v25 = vpop.permute.xlu1 %4245  ;;  %v3216_v0 = vld [vmem:[%s6695_s3 + $0x278] sm:$0xff] }
 0x2ea   : > { %2735 = vst.msk [vmem:[#allocation3 + $0x70] sm:$0xff] %vm2639_vm0, %v2719_v54  ;;  %v4248_v57 = vunpack.i.h.bf16 %v4246_v25  ;;  %v4247_v31 = vunpack.i.l.bf16 %v4246_v25 }
 0x2eb   : > { %v6502_v9 = vld [vmem:[#allocation4 + $0xb0] sm:$0xff]  ;;  %v2928_v30 = vsel %vm2639_vm0, %v2880_v23, %v4232_v33  ;;  %v3057_v46 = vsel %vm2639_vm0, %v6299_v4, %v4233_v38  ;;  %v2881_v23 = vld [vmem:[#allocation4 + $0x21] sm:$0xff]  ;;  %v4158_v38 = vpack.c.bf16 %v3214_v44, %v3213_v62 }
 0x2ec   : > { %v6504_v51 = vld [vmem:[#allocation4 + $0xb1] sm:$0xff]  ;;  %v4279_v10 = vpack.i.bf16 %v6502_v9, %v6500_v34  ;;  %3288 = vmatprep.mubr.f32.mxu0 %v2928_v30  ;;  %3393 = vmatprep.mubr.f32.mxu1 %v3057_v46  ;;  %v2865_v17 = vsel %vm2639_vm0, %v6237_v63, %v4247_v31  ;;  %v2993_v28 = vsel %vm2639_vm0, %v6239_v22, %v4248_v57 }
 0x2ed   : > { %v4294_v16 = vpack.i.bf16 %v6504_v51, %v6467_v48  ;;  %3289 = vmatmul.mubr.f32.vlgmr.msra.gmra.mrb[0].mxu0 %v2864_v20  ;;  %3394 = vmatmul.mubr.f32.vlgmr.msra.gmra.mrb[0].mxu1 %v2992_v18  ;;  %v6545_v35 = vld [vmem:[#allocation4 + $0xaf] sm:$0xff]  ;;  %v4162_v30 = vpack.c.bf16 %v3216_v0, %v3215_v56 }
 0x2ee   : > { %4280 = vrot.lane.b32.xlu0 %v4279_v10, %s4387_s15  ;;  %4137 = vmatpush3.bf16.msra.mxu0 %v6451_v3 }
 0x2ef   : > { %4295 = vrot.lane.b32.xlu1 %v4294_v16, %s4387_s15  ;;  %4174 = vmatpush3.bf16.msra.mxu1 %v6451_v3  ;;  %v4146_v3 = vpack.c.bf16 %v3208_v21, %v3207_v43 }
 0x2f0   : > { %4139 = vmatprep.subr.bf16.mxu0 %v4138_v8  ;;  %4167 = vmatprep.subr.bf16.mxu1 %v4138_v8 }
 0x2f1   : > { %v2751_v27 = vld [vmem:[#allocation3 + $0x70] ss:$2 sm:$0xff]  ;;  %v2767_v45 = vld [vmem:[#allocation3 + $0x71] ss:$2 sm:$0xff] }
 0x2f2   : > { %v2775_v29 = vmax.f32 %v2751_v27, %v2767_v45  ;;  %4141 = vmatpush3.bf16.msra.mxu0 %v4138_v8 }
 0x2f3   : > { %4175 = vmatpush3.bf16.msra.mxu1 %v4138_v8  ;;  %4143 = vmatprep.subr.bf16.mxu0 %v4142_v13 }
 0x2f4   : > { %2815 = vst.msk [vmem:[#allocation4 + $0xc8] sm:$0xff] %vm2639_vm0, %v2775_v29  ;;  %4168 = vmatprep.subr.bf16.mxu1 %v4142_v13 }
 0x2f6   : > { %4145 = vmatpush3.bf16.msra.mxu0 %v4142_v13 }
 0x2f7   : > { %4176 = vmatpush3.bf16.msra.mxu1 %v4142_v13  ;;  %4147 = vmatprep.subr.bf16.mxu0 %v4146_v3 }
 0x2f8   : > { %4169 = vmatprep.subr.bf16.mxu1 %v4146_v3 }
 0x2fa   : > { %4149 = vmatpush3.bf16.msra.mxu0 %v4146_v3 }
 0x2fb   : > { %v6547_v40 = vld [vmem:[#allocation4 + $0xc8] sm:$0xff]  ;;  %4177 = vmatpush3.bf16.msra.mxu1 %v4146_v3  ;;  %4151 = vmatprep.subr.bf16.mxu0 %v4150_v50 }
 0x2fc   : > { %v6549_v42 = vld [vmem:[#allocation4 + $0xc9] sm:$0xff]  ;;  %v4289_v14 = vpack.i.bf16 %v6547_v40, %v6545_v35  ;;  %4170 = vmatprep.subr.bf16.mxu1 %v4150_v50 }
 0x2fd   : > { %v4304_v41 = vpack.i.bf16 %v6549_v42, %v6502_v9  ;;  %v6555_v19 = vld [vmem:[#allocation4 + $0xc7] sm:$0xff] }
 0x2fe   : > { %4290 = vrot.lane.b32.xlu0 %v4289_v14, %s4387_s15  ;;  %v4299_v49 = vpack.i.bf16 %v3024_v47, %v6555_v19  ;;  %4153 = vmatpush3.bf16.msra.mxu0 %v4150_v50 }
 0x2ff   : > { %4305 = vrot.lane.b32.xlu1 %v4304_v41, %s4387_s15  ;;  %4178 = vmatpush3.bf16.msra.mxu1 %v4150_v50 }
 0x300   : > { %v4241_v39 = vpop.permute.xlu0 %4240  ;;  %4155 = vmatprep.subr.bf16.mxu0 %v4154_v1  ;;  %4171 = vmatprep.subr.bf16.mxu1 %v4154_v1 }
 0x301   : > { %v4243_v54 = vunpack.i.h.bf16 %v4241_v39  ;;  %v4242_v61 = vunpack.i.l.bf16 %v4241_v39  ;;  %v4256_v46 = vpop.permute.xlu1 %4255 }
 0x302   : > { %4300 = vrot.lane.b32.xlu0 %v4299_v49, %s4387_s15  ;;  %4157 = vmatpush3.bf16.msra.mxu0 %v4154_v1  ;;  %v4258_v10 = vunpack.i.h.bf16 %v4256_v46  ;;  %v4257_v16 = vunpack.i.l.bf16 %v4256_v46 }
 0x303   : > { %v2929_v33 = vsel %vm2639_vm0, %v2881_v23, %v4242_v61  ;;  %v3058_v60 = vsel %vm2639_vm0, %v6346_v24, %v4243_v54  ;;  %4179 = vmatpush3.bf16.msra.mxu1 %v4154_v1  ;;  %4159 = vmatprep.subr.bf16.mxu0 %v4158_v38 }
 0x304   : > { %3293 = vmatprep.mubr.f32.mxu0 %v2929_v33  ;;  %3398 = vmatprep.mubr.f32.mxu1 %v3058_v60  ;;  %v2866_v12 = vsel %vm2639_vm0, %v6299_v4, %v4257_v16  ;;  %v2994_v59 = vsel %vm2639_vm0, %v6301_v36, %v4258_v10 }
 0x305   : > { %3294 = vmatmul.mubr.f32.gmra.mrb[2].mxu0 %v2865_v17  ;;  %3399 = vmatmul.mubr.f32.gmra.mrb[2].mxu1 %v2993_v28 }
 0x306   : > { %4172 = vmatprep.subr.bf16.mxu1 %v4158_v38  ;;  %4161 = vmatpush3.bf16.msra.mxu0 %v4158_v38 }
 0x307   : > { %4163 = vmatprep.subr.bf16.mxu0 %v4162_v30  ;;  %4180 = vmatpush3.bf16.msra.mxu1 %v4158_v38 }
 0x308   : > { %4173 = vmatprep.subr.bf16.mxu1 %v4162_v30 }
 0x30a   : > { %4165 = vmatpush3.bf16.msra.mxu0 %v4162_v30 }
 0x30b   : > { %4181 = vmatpush3.bf16.msra.mxu1 %v4162_v30  ;;  %v3016_v30 = vld [vmem:[#allocation4 + $0xdf] sm:$0xff] }
 0x318   : > { %v4251_v20 = vpop.permute.xlu0 %4250 }
 0x319   : > { %v4253_v63 = vunpack.i.h.bf16 %v4251_v20  ;;  %v4252_v18 = vunpack.i.l.bf16 %v4251_v20  ;;  %v4266_v27 = vpop.permute.xlu1 %4265 }
 0x31a   : > { %v4268_v45 = vunpack.i.h.bf16 %v4266_v27  ;;  %v4267_v13 = vunpack.i.l.bf16 %v4266_v27 }
 0x31b   : > { %v2930_v22 = vsel %vm2639_vm0, %v6243_v2, %v4252_v18  ;;  %v3059_v8 = vsel %vm2639_vm0, %v6408_v37, %v4253_v63  ;;  %v3074_v63 = vld [vmem:[#allocation4 + $0x51] sm:$0xff]  ;;  %v3075_v18 = vld [vmem:[#allocation4 + $0x69] sm:$0xff] }
 0x31c   : > { %3298 = vmatprep.mubr.f32.mxu0 %v2930_v22  ;;  %3403 = vmatprep.mubr.f32.mxu1 %v3059_v8  ;;  %v2867_v4 = vsel %vm2639_vm0, %v6346_v24, %v4267_v13  ;;  %v2995_v36 = vsel %vm2639_vm0, %v6348_v52, %v4268_v45  ;;  %v3875_v22 = vld [vmem:[%s6696_s4] ss:$0 sm:$0xff] }
 0x31d   : > { %3299 = vmatmul.mubr.f32.gmra.mrb[4].mxu0 %v2866_v12  ;;  %3404 = vmatmul.mubr.f32.gmra.mrb[4].mxu1 %v2994_v59 }
 0x330   : > { %v4261_v29 = vpop.permute.xlu0 %4260 }
 0x331   : > { %v4263_v43 = vunpack.i.h.bf16 %v4261_v29  ;;  %v4262_v21 = vunpack.i.l.bf16 %v4261_v29  ;;  %v4276_v55 = vpop.permute.xlu1 %4275 }
 0x332   : > { %v4278_v11 = vunpack.i.h.bf16 %v4276_v55  ;;  %v4277_v50 = vunpack.i.l.bf16 %v4276_v55 }
 0x333   : > { %v2931_v2 = vsel %vm2639_vm0, %v6303_v53, %v4262_v21  ;;  %v3060_v3 = vsel %vm2639_vm0, %v6465_v32, %v4263_v43 }
 0x334   : > { %3303 = vmatprep.mubr.f32.mxu0 %v2931_v2  ;;  %3408 = vmatprep.mubr.f32.mxu1 %v3060_v3  ;;  %v2868_v24 = vsel %vm2639_vm0, %v6408_v37, %v4277_v50  ;;  %v2996_v52 = vsel %vm2639_vm0, %v6410_v58, %v4278_v11 }
 0x335   : > { %3304 = vmatmul.mubr.f32.gmra.mrb[6].mxu0 %v2867_v4  ;;  %3409 = vmatmul.mubr.f32.gmra.mrb[6].mxu1 %v2995_v36 }
 0x348   : > { %v4271_v15 = vpop.permute.xlu0 %4270 }
 0x349   : > { %v4273_v7 = vunpack.i.h.bf16 %v4271_v15  ;;  %v4272_v14 = vunpack.i.l.bf16 %v4271_v15  ;;  %v4286_v47 = vpop.permute.xlu1 %4285 }
 0x34a   : > { %v4288_v1 = vunpack.i.h.bf16 %v4286_v47  ;;  %v4287_v25 = vunpack.i.l.bf16 %v4286_v47 }
 0x34b   : > { %v2932_v53 = vsel %vm2639_vm0, %v6350_v26, %v4272_v14  ;;  %v3061_v41 = vsel %vm2639_vm0, %v6500_v34, %v4273_v7 }
 0x34c   : > { %3308 = vmatprep.mubr.f32.mxu0 %v2932_v53  ;;  %3413 = vmatprep.mubr.f32.mxu1 %v3061_v41  ;;  %v2869_v37 = vsel %vm2639_vm0, %v6465_v32, %v4287_v25  ;;  %v2997_v58 = vsel %vm2639_vm0, %v6467_v48, %v4288_v1 }
 0x34d   : > { %3309 = vmatmul.mubr.f32.gmra.mrb[8].mxu0 %v2868_v24  ;;  %3414 = vmatmul.mubr.f32.gmra.mrb[8].mxu1 %v2996_v52 }
 0x360   : > { %v4281_v49 = vpop.permute.xlu0 %4280 }
 0x361   : > { %v4283_v62 = vunpack.i.h.bf16 %v4281_v49  ;;  %v4282_v44 = vunpack.i.l.bf16 %v4281_v49  ;;  %v4296_v31 = vpop.permute.xlu1 %4295 }
 0x362   : > { %v4298_v39 = vunpack.i.h.bf16 %v4296_v31  ;;  %v4297_v54 = vunpack.i.l.bf16 %v4296_v31 }
 0x363   : > { %v2933_v26 = vsel %vm2639_vm0, %v6412_v5, %v4282_v44  ;;  %v3062_v57 = vsel %vm2639_vm0, %v6545_v35, %v4283_v62 }
 0x364   : > { %3313 = vmatprep.mubr.f32.mxu0 %v2933_v26  ;;  %3418 = vmatprep.mubr.f32.mxu1 %v3062_v57  ;;  %v2870_v48 = vsel %vm2639_vm0, %v6500_v34, %v4297_v54  ;;  %v2998_v28 = vsel %vm2639_vm0, %v6502_v9, %v4298_v39  ;;  %v3073_v9 = vld [vmem:[#allocation4 + $0x39] sm:$0xff] }
 0x365   : > { %3314 = vmatmul.mubr.f32.gmra.mrb[10].mxu0 %v2869_v37  ;;  %3419 = vmatmul.mubr.f32.gmra.mrb[10].mxu1 %v2997_v58 }
 0x370   : > { %v4291_v61 = vpop.permute.xlu0 %4290 }
 0x371   : > { %v4306_v56 = vpop.permute.xlu1 %4305  ;;  %v4293_v0 = vunpack.i.h.bf16 %v4291_v61  ;;  %v4292_v23 = vunpack.i.l.bf16 %v4291_v61 }
 0x372   : > { %v4308_v60 = vunpack.i.h.bf16 %v4306_v56  ;;  %v4307_v32 = vunpack.i.l.bf16 %v4306_v56 }
 0x373   : > { %v2934_v38 = vsel %vm2639_vm0, %v6469_v6, %v4292_v23  ;;  %v3063_v33 = vsel %vm2639_vm0, %v6555_v19, %v4293_v0 }
 0x374   : > { %v4301_v17 = vpop.permute.xlu0 %4300  ;;  %3318 = vmatprep.mubr.f32.mxu0 %v2934_v38  ;;  %3423 = vmatprep.mubr.f32.mxu1 %v3063_v33  ;;  %v2871_v20 = vsel %vm2639_vm0, %v6545_v35, %v4307_v32  ;;  %v2999_v34 = vsel %vm2639_vm0, %v6547_v40, %v4308_v60  ;;  %v3080_v35 = vld [vmem:[#allocation4 + $0xe1] sm:$0xff] }
 0x375   : > { %v4303_v46 = vunpack.i.h.bf16 %v4301_v17  ;;  %v4302_v10 = vunpack.i.l.bf16 %v4301_v17  ;;  %3319 = vmatmul.mubr.f32.gmra.mrb[12].mxu0 %v2870_v48  ;;  %3424 = vmatmul.mubr.f32.gmra.mrb[12].mxu1 %v2998_v28 }
 0x377   : > { %v2935_v16 = vsel %vm2639_vm0, %v6504_v51, %v4302_v10  ;;  %v3064_v19 = vsel %vm2639_vm0, %v3016_v30, %v4303_v46 }
 0x378   : > { %3323 = vmatprep.mubr.f32.mxu0 %v2935_v16  ;;  %3428 = vmatprep.mubr.f32.mxu1 %v3064_v19 }
 0x379   : > { %3324 = vmatmul.mubr.f32.gmra.mrb[14].mxu0 %v2871_v20  ;;  %3429 = vmatmul.mubr.f32.gmra.mrb[14].mxu1 %v2999_v34 }
 0x37a   : > { %4058 = vmatprep.mubr.msk.f32.mxu0 %vm2639_vm0, %v3073_v9  ;;  %4064 = vmatprep.mubr.msk.f32.mxu1 %vm2639_vm0, %v6469_v6 }
 0x37d   : > { %4059 = vmatmul.mubr.msk.f32.vlgmr.msra.gmra.mrb[16].mxu0 %vm2639_vm0, %v3074_v63  ;;  %4065 = vmatmul.mubr.msk.f32.vlgmr.msra.gmra.mrb[16].mxu1 %vm2639_vm0, %v6504_v51 }
 0x37e   : > { %4061 = vmatprep.mubr.msk.f32.mxu0 %vm2639_vm0, %v3075_v18  ;;  %4067 = vmatprep.mubr.msk.f32.mxu1 %vm2639_vm0, %v6549_v42 }
 0x381   : > { %4062 = vmatmul.mubr.msk.f32.gmra.mrb[18].mxu0 %vm2639_vm0, %v6412_v5  ;;  %4068 = vmatmul.mubr.msk.f32.gmra.mrb[18].mxu1 %vm2639_vm0, %v3080_v35 }
 0x3c0   : > { %v3922_v40 = vpop.f32.mrb[0].mxu0  ;;  %v3978_v6 = vpop.f32.mrb[0].mxu1 }
 0x3c1   : > { %v3923_v8 = vpop.f32.mrb[1].mxu0  ;;  %v3979_v51 = vpop.f32.mrb[1].mxu1 }
 0x3c2   : > { %v3924_v12 = vadd.f32 %v3923_v8, %v3922_v40  ;;  %v3980_v59 = vadd.f32 %v3979_v51, %v3978_v6 }
 0x3c4   : > { %v3291_v27 = vadd.f32 %v3924_v12, %v3875_v22 }
 0x3c6   : > { %v3396_v45 = vadd.f32 %v3980_v59, %v3291_v27 }
 0x3d8   : > { %v3925_v13 = vpop.f32.mrb[2].mxu0  ;;  %v3981_v42 = vpop.f32.mrb[2].mxu1 }
 0x3d9   : > { %v3926_v29 = vpop.f32.mrb[3].mxu0  ;;  %v3982_v43 = vpop.f32.mrb[3].mxu1 }
 0x3da   : > { %v3927_v21 = vadd.f32 %v3926_v29, %v3925_v13  ;;  %v3983_v5 = vadd.f32 %v3982_v43, %v3981_v42 }
 0x3dc   : > { %v3296_v2 = vadd.f32 %v3927_v21, %v3875_v22 }
 0x3de   : > { %v3401_v3 = vadd.f32 %v3983_v5, %v3296_v2 }
 0x3f0   : > { %v3928_v4 = vpop.f32.mrb[4].mxu0  ;;  %v3984_v36 = vpop.f32.mrb[4].mxu1 }
 0x3f1   : > { %v3929_v55 = vpop.f32.mrb[5].mxu0  ;;  %v3985_v11 = vpop.f32.mrb[5].mxu1 }
 0x3f2   : > { %v3930_v50 = vadd.f32 %v3929_v55, %v3928_v4  ;;  %v3986_v15 = vadd.f32 %v3985_v11, %v3984_v36 }
 0x3f4   : > { %v3301_v7 = vadd.f32 %v3930_v50, %v3875_v22 }
 0x3f6   : > { %v3406_v14 = vadd.f32 %v3986_v15, %v3301_v7 }
 0x408   : > { %v3931_v53 = vpop.f32.mrb[6].mxu0  ;;  %v3987_v41 = vpop.f32.mrb[6].mxu1 }
 0x409   : > { %v3932_v24 = vpop.f32.mrb[7].mxu0  ;;  %v3988_v52 = vpop.f32.mrb[7].mxu1 }
 0x40a   : > { %v3933_v47 = vadd.f32 %v3932_v24, %v3931_v53  ;;  %v3989_v1 = vadd.f32 %v3988_v52, %v3987_v41 }
 0x40c   : > { %v3306_v25 = vadd.f32 %v3933_v47, %v3875_v22 }
 0x40e   : > { %v3411_v49 = vadd.f32 %v3989_v1, %v3306_v25 }
 0x420   : > { %v3934_v62 = vpop.f32.mrb[8].mxu0  ;;  %v3990_v44 = vpop.f32.mrb[8].mxu1 }
 0x421   : > { %v3935_v26 = vpop.f32.mrb[9].mxu0  ;;  %v3991_v57 = vpop.f32.mrb[9].mxu1 }
 0x422   : > { %v3936_v37 = vadd.f32 %v3935_v26, %v3934_v62  ;;  %v3992_v58 = vadd.f32 %v3991_v57, %v3990_v44 }
 0x424   : > { %v3311_v31 = vadd.f32 %v3936_v37, %v3875_v22 }
 0x426   : > { %v3416_v39 = vadd.f32 %v3992_v58, %v3311_v31 }
 0x438   : > { %v3937_v54 = vpop.f32.mrb[10].mxu0  ;;  %v3993_v61 = vpop.f32.mrb[10].mxu1 }
 0x439   : > { %v3938_v56 = vpop.f32.mrb[11].mxu0  ;;  %v3994_v0 = vpop.f32.mrb[11].mxu1 }
 0x43a   : > { %v3939_v23 = vadd.f32 %v3938_v56, %v3937_v54  ;;  %v3995_v38 = vadd.f32 %v3994_v0, %v3993_v61 }
 0x43c   : > { %v3316_v33 = vadd.f32 %v3939_v23, %v3875_v22 }
 0x43e   : > { %v3421_v60 = vadd.f32 %v3995_v38, %v3316_v33 }
 0x448   : > { %v3940_v32 = vpop.f32.mrb[12].mxu0  ;;  %v3996_v17 = vpop.f32.mrb[12].mxu1 }
 0x449   : > { %v3941_v48 = vpop.f32.mrb[13].mxu0  ;;  %v3997_v28 = vpop.f32.mrb[13].mxu1 }
 0x44a   : > { %v3942_v30 = vadd.f32 %v3941_v48, %v3940_v32  ;;  %v3998_v46 = vadd.f32 %v3997_v28, %v3996_v17 }
 0x44c   : > { %v3321_v10 = vadd.f32 %v3942_v30, %v3875_v22  ;;  %v3943_v16 = vpop.f32.mrb[14].mxu0  ;;  %v3999_v19 = vpop.f32.mrb[14].mxu1 }
 0x44d   : > { %v3944_v20 = vpop.f32.mrb[15].mxu0  ;;  %v4000_v34 = vpop.f32.mrb[15].mxu1 }
 0x44e   : > { %v3945_v9 = vadd.f32 %v3944_v20, %v3943_v16  ;;  %v4001_v63 = vadd.f32 %v4000_v34, %v3999_v19  ;;  %v3426_v18 = vadd.f32 %v3998_v46, %v3321_v10 }
 0x450   : > { %v3326_v35 = vadd.f32 %v3945_v9, %v3875_v22  ;;  %v4060_v40 = vpop.f32.mrb[16].mxu0  ;;  %v4066_v6 = vpop.f32.mrb[16].mxu1 }
 0x451   : > { %v3506_v8 = vadd.f32 %v4060_v40, %v3401_v3  ;;  %v3526_v51 = vadd.f32 %v4066_v6, %v3421_v60  ;;  %v3500_v12 = vpop.f32.mrb[17].mxu0  ;;  %v3520_v59 = vpop.f32.mrb[17].mxu1 }
 0x452   : > { %v3501_v27 = vadd.f32 %v3500_v12, %v3396_v45  ;;  %v3521_v13 = vadd.f32 %v3520_v59, %v3416_v39  ;;  %v3431_v42 = vadd.f32 %v4001_v63, %v3326_v35 }
 0x453   : > { %v3540_v29 = vmax.f32 %v3506_v8, 0.0  ;;  %v3544_v43 = vmax.f32 %v3526_v51, 0.0 }
 0x454   : > { %v3539_v21 = vmax.f32 %v3501_v27, 0.0  ;;  %v3543_v5 = vmax.f32 %v3521_v13, 0.0  ;;  %v4063_v2 = vpop.f32.mrb[18].mxu0  ;;  %v4069_v4 = vpop.f32.mrb[18].mxu1 }
 0x455   : > { %v3516_v36 = vadd.f32 %v4063_v2, %v3411_v49  ;;  %v3536_v55 = vadd.f32 %v4069_v4, %v3431_v42  ;;  %v3510_v11 = vpop.f32.mrb[19].mxu0  ;;  %v3530_v22 = vpop.f32.mrb[19].mxu1 }
 0x456   : > { %v3564_v50 = vmax.f32 %v3539_v21, %v3540_v29  ;;  %v3566_v3 = vmax.f32 %v3543_v5, %v3544_v43  ;;  %v3511_v15 = vadd.f32 %v3510_v11, %v3406_v14  ;;  %v3531_v7 = vadd.f32 %v3530_v22, %v3426_v18 }
 0x457   : > { %v3542_v53 = vmax.f32 %v3516_v36, 0.0  ;;  %v3546_v45 = vmax.f32 %v3536_v55, 0.0 }
 0x458   : > { %3568 = vst [vmem:[#allocation7] sm:$0xff] %v3564_v50  ;;  %3570 = vst [vmem:[#allocation7 + $0x10] sm:$0xff] %v3566_v3  ;;  %v3541_v41 = vmax.f32 %v3511_v15, 0.0  ;;  %v3545_v24 = vmax.f32 %v3531_v7, 0.0 }
 0x45a   : > { %v3565_v52 = vmax.f32 %v3541_v41, %v3542_v53  ;;  %v3567_v47 = vmax.f32 %v3545_v24, %v3546_v45 }
 0x45c   : > { %3569 = vst [vmem:[#allocation7 + $0x8] sm:$0xff] %v3565_v52  ;;  %3571 = vst [vmem:[#allocation7 + $0x18] sm:$0xff] %v3567_v47 }
 0x463   : > { %v3572_v1 = vld [vmem:[#allocation7] ss:$2 sm:$0xff]  ;;  %v3574_v25 = vld [vmem:[#allocation7 + $0x10] ss:$2 sm:$0xff]  ;;  %v3576_v14 = vld [vmem:[#allocation7 + $0x1] ss:$2 sm:$0xff] }
 0x464   : > { %v3578_v49 = vld [vmem:[#allocation7 + $0x11] ss:$2 sm:$0xff]  ;;  %v3579_v62 = vmax.f32 %v3572_v1, %v3576_v14 }
 0x465   : > { %v3580_v44 = vmax.f32 %v3574_v25, %v3578_v49 }
 0x466   : > { %3581 = vst [vmem:[%s217_s14] sm:$0xff] %v3579_v62 }
 0x467   : > { %3582 = vst [vmem:[%s217_s14 + $0x8] sm:$0xff] %v3580_v44 }
 0x468   : > { %4334 = shalt.err (!%p4331_p3)
}
 0x469   : > { %s4335_s7 = scalar_lea.hbm %s6647_s23, 256  ;;  %s4339_s10 = scalar_lea.hbm %s6697_s5, 512 }
 0x46a   : > { %p4336_p4 = scmp.ne.s32.totalorder %s6647_s23, %s4335_s7  ;;  %p4340_p9 = scmp.lt.u32.totalorder %s6647_s23, %s6697_s5 }
 0x46b   : > { %p4341_p10 = scmp.lt.u32.totalorder %s4339_s10, %s4335_s7  ;;  %p4343_p12 = scmp.lt.u32.totalorder %s4335_s7, %s6647_s23 }
 0x46c   : > { %p4337_p7 = pnand %p4336_p4, %p4459_p5 }
 0x46d   : > { %p4342_p11 = por %p4341_p10, %p4340_p9 }
 0x46e   : > { %p4338_p8 = pneg %p4337_p7 }
 0x46f   : > { %p4344_p13 = por %p4343_p12, %p4342_p11 }
 0x471   : > { %p4345_p0 = pnand %p4344_p13, %p4338_p8 }
 0x473   : > { %4348 = shalt.err (!%p4345_p0)
}
 0x474   : > { %s4389_s13 = smov 128   ;;  %s4390_s14 = smov 8  }
 0x475   : > { %4183 = dma.vmem_to_hbm [thread:$0]  (%p4459_p5), %s6649_s16, 256, %s6647_s23, %s6651_s22, %s4389_s13, %s4389_s13, %s4390_s14  }
 0x476 PF: > { %p4189_p1 = scmp.ge.s32.totalorder %s4383_s21, 2  ;;  %s3612_s9 = sand.u32 1, %s4371_s18  }
 0x477   : > { %s3613_s17 = scalar_lea.sflag [#allocation9], %s3612_s9 }
 0x478   : > { %p4186_p2 = pnand %p4189_p1, %p4463_p6 }
 0x47a   : > { %4366 = dma.done.wait (!%p4186_p2), %s3613_s17, 256  }
 0x47b   : > { %4368 = vsyncadd (!%p4186_p2), %s3613_s17, 4294967040  ;;  %p15_p3 = scmp.ge.s32.totalorder %s4446_s24, 4   ;;  %s7028_s18 = smov %s4375_s19 }
 0x47c   : > { %s7029_s19 = smov %s4379_s20  ;;  %s7030_s20 = smov %s4457_s27 }
 0x47d   : > { %s7031_s21 = smov %s4446_s24  ;;  %17 = sbr.rel (!%p15_p3) target bundleno = 3 (0x3), region = 107 }
 0x484   :  { %3618 = vsyncpa [#allocation9], 1 }
 0x485   :  { %3620 = vsyncpa [#allocation9 + $0x1], 1 }

</bundles_post_ra>
